<compile_context>
chip_gen: v7x
topology: tpu7x:2x2x1
jax: 0.10.0
libtpu: 0.0.40
codegen_flags: <defaults>
</compile_context>

<pallas_src>
import functools

import jax
import jax.numpy as jnp
from jax import lax
from jax.experimental import pallas as pl
from jax.experimental.pallas import tpu as pltpu
import numpy as np


# ----------------------------- Pallas kernel -------------------------------

def fused_lstm_kernel(x_ref, w1x_ref, b1_ref, w1comb_ref, b2_ref,
                      wout_ref, bout_ref, w2hh_hbm_ref, o_ref,
                      w2hh_vmem, dma_sem, *, T, B, Bp, H1, H2):
    """Fused 2-layer LSTM + Linear head, single invocation (no grid).

    x_ref      : (T*Bp, F)  bf16   time-major, batch padded to 8 sublanes
    w1x_ref    : (F, 4*H1)  bf16   layer-1 W_ih^T, gate-column padded
    b1_ref     : (1, 4*H1)  f32    layer-1 combined bias (b_ih + b_hh)
    w1comb_ref : (H1, 4*H1 + 4*H2) bf16   [W_hh1^T | W_ih2^T]
    b2_ref     : (1, 4*H2)  f32
    wout_ref   : (1, H2)    f32    output-head weight as a lane row
    bout_ref   : (1, 1)     f32
    w2hh_hbm_ref : (H2, 4*H2) bf16 layer-2 W_hh^T, left in HBM (manual DMA)
    o_ref      : (B, 1)     f32
    H1 / H2 are the lane-padded (multiple-of-128) hidden sizes.
    """
    # Kick off the layer-2 recurrent-weight copy; it is hidden behind the
    # hoisted input projection + step-0 compute and waited before first use.
    w2hh_copy = pltpu.make_async_copy(w2hh_hbm_ref, w2hh_vmem, dma_sem)
    w2hh_copy.start()

    # Hoisted layer-1 input projection (+ bias): one MXU pass over all T steps.
    xproj = jnp.dot(x_ref[...], w1x_ref[...],
                    preferred_element_type=jnp.float32) + b1_ref[...]

    w1comb = w1comb_ref[...]       # (H1, 4*H1 + 4*H2), bf16
    b2 = b2_ref[...]
    G1 = 4 * H1                    # split point: layer-1 gates | layer-2 ih gates

    def sigmoid(v):
        # tanh form -> EUP slot, keeps the VALU free on the serial chain.
        return 0.5 * (jnp.tanh(0.5 * v) + 1.0)

    def gates(pre, h):
        # PyTorch gate order [i, f, g, o]; every slice is a whole-vreg
        # 128-lane slice thanks to padding.
        i = sigmoid(pre[:, 0 * h:1 * h])
        f = sigmoid(pre[:, 1 * h:2 * h])
        g = jnp.tanh(pre[:, 2 * h:3 * h])
        o = sigmoid(pre[:, 3 * h:4 * h])
        return i, f, g, o

    c1 = jnp.zeros((Bp, H1), jnp.float32)
    h2 = jnp.zeros((Bp, H2), jnp.float32)
    c2 = jnp.zeros((Bp, H2), jnp.float32)
    # h1_{t-1} @ [W_hh1^T | W_ih2^T]: columns [:G1] are this step's layer-1
    # recurrent pre-activation, columns [G1:] were consumed by the previous
    # step's layer 2.  Zero at t=0 (h1_{-1} = 0).
    h1proj = jnp.zeros((Bp, 4 * H1 + 4 * H2), jnp.float32)
    w2hh = None

    # Fully unrolled time recurrence (T small & static); all state stays in
    # vregs/VMEM.
    for t in range(T):
        # Layer-2 recurrent contribution: depends only on h2_{t-1}, so its
        # MXU push issues at the top of the step, off the layer-1 chain.
        if t == 0:
            g2_rec = jnp.zeros((Bp, 4 * H2), jnp.float32)
        else:
            if w2hh is None:
                w2hh_copy.wait()
                w2hh = w2hh_vmem[...]
            g2_rec = jnp.dot(h2.astype(jnp.bfloat16), w2hh,
                             preferred_element_type=jnp.float32)

        # Layer-1 cell update (recurrent pre-activation carried from the
        # previous step's combined dot).  8-row sublane-aligned xproj slice.
        g1 = xproj[t * Bp:(t + 1) * Bp, :] + h1proj[:, :G1]
        i1, f1, gg1, o1 = gates(g1, H1)
        c1 = f1 * c1 + i1 * gg1
        h1 = o1 * jnp.tanh(c1)

        # ONE combined dot with h1_t: next step's layer-1 recurrence AND this
        # step's layer-2 input contribution (no per-step concat, one fewer
        # dependent MXU round-trip per step).
        h1proj = jnp.dot(h1.astype(jnp.bfloat16), w1comb,
                         preferred_element_type=jnp.float32)

        # Layer-2 cell update.
        g2 = h1proj[:, G1:] + g2_rec + b2
        i2, f2, gg2, o2 = gates(g2, H2)
        c2 = f2 * c2 + i2 * gg2
        h2 = o2 * jnp.tanh(c2)

    if w2hh is None:
        # T == 1: the copy was never consumed; retire it before kernel exit.
        w2hh_copy.wait()

    # Output head as VPU multiply + lane reduction (drops the final N=1 MXU
    # pass); only the real batch rows are written.
    out = jnp.sum(h2 * wout_ref[...], axis=-1, keepdims=True) + bout_ref[...]
    o_ref[...] = out[:B, :]


# --------------------------- Parameter preparation --------------------------

def _round_up(n, m=128):
    return ((n + m - 1) // m) * m


def _pad_gate_cols(w, h, hp):
    """(rows, 4h) -> (rows, 4hp): zero-pad each of the 4 gate column blocks."""
    rows = w.shape[0]
    w4 = w.reshape(rows, 4, h)
    return jnp.pad(w4, ((0, 0), (0, 0), (0, hp - h))).reshape(rows, 4 * hp)


def _pad_rows(w, rp):
    return jnp.pad(w, ((0, rp - w.shape[0]), (0, 0)))


def _pad_bias(b, h, hp):
    return jnp.pad(b.reshape(4, h), ((0, 0), (0, hp - h))).reshape(1, 4 * hp)


def prepare_params(params):
    """One-time weight re-layout: pad, fuse, cast. Call ONCE, reuse per call."""
    H1 = params["w_hh1"].shape[0]          # hidden_dim = 2 * embed_dim
    H2 = params["w_hh2"].shape[0]          # embed_dim
    H1p, H2p = _round_up(H1), _round_up(H2)

    w1x = _pad_gate_cols(params["w_ih1"], H1, H1p).astype(jnp.bfloat16)
    w1h = _pad_rows(_pad_gate_cols(params["w_hh1"], H1, H1p), H1p)   # (H1p, 4H1p)
    w2i = _pad_rows(_pad_gate_cols(params["w_ih2"], H2, H2p), H1p)   # (H1p, 4H2p)
    w1comb = jnp.concatenate([w1h, w2i], axis=1).astype(jnp.bfloat16)
    b1 = _pad_bias(params["b1"], H1, H1p).astype(jnp.float32)
    w2hh = _pad_rows(_pad_gate_cols(params["w_hh2"], H2, H2p),
                     H2p).astype(jnp.bfloat16)                        # (H2p, 4H2p)
    b2 = _pad_bias(params["b2"], H2, H2p).astype(jnp.float32)
    wout = jnp.pad(params["w_out"].T, ((0, 0), (0, H2p - H2)))        # (1, H2p)
    bout = params["b_out"].astype(jnp.float32)                        # (1, 1)

    prepped = {"w1x": w1x, "b1": b1, "w1comb": w1comb, "b2": b2,
               "wout": wout.astype(jnp.float32), "bout": bout, "w2hh": w2hh}
    return jax.tree_util.tree_map(jax.device_put, prepped)


# ------------------------------ JAX wrapper ---------------------------------

@jax.jit
def lstm_model_forward(x_btf, prepped):
    """Replicates LSTM.forward: x -> lstm1 -> lstm2 -> Linear(hidden_n)."""
    B, T, F = x_btf.shape
    H1p = prepped["w1comb"].shape[0]
    H2p = prepped["w2hh"].shape[0]
    Bp = _round_up(B, 8)

    # Time-major, batch padded to the 8-sublane boundary, bf16 MXU operand.
    x_tbf = jnp.transpose(x_btf, (1, 0, 2))
    x_flat = jnp.pad(x_tbf, ((0, 0), (0, Bp - B), (0, 0))) \
        .reshape(T * Bp, F).astype(jnp.bfloat16)

    kernel = functools.partial(fused_lstm_kernel,
                               T=T, B=B, Bp=Bp, H1=H1p, H2=H2p)
    vmem_spec = pl.BlockSpec(memory_space=pltpu.MemorySpace.VMEM)
    return pl.pallas_call(
        kernel,
        out_shape=jax.ShapeDtypeStruct((B, 1), jnp.float32),
        in_specs=[vmem_spec] * 7 + [pl.BlockSpec(memory_space=pl.ANY)],
        out_specs=vmem_spec,
        scratch_shapes=[
            pltpu.VMEM((H2p, 4 * H2p), jnp.bfloat16),   # layer-2 W_hh buffer
            pltpu.SemaphoreType.DMA,                    # its DMA semaphore
        ],
        compiler_params=pltpu.CompilerParams(
            vmem_limit_bytes=32 * 1024 * 1024),
    )(x_flat, prepped["w1x"], prepped["b1"], prepped["w1comb"],
      prepped["b2"], prepped["wout"], prepped["bout"], prepped["w2hh"])


# ------------------------------ Reference -----------------------------------

def lstm_layer_ref(x_tbf, w_ih_t, w_hh_t, bias):
    T, B, D = x_tbf.shape
    H = w_hh_t.shape[0]

    def step(carry, x_t):
        h, c = carry
        g = x_t @ w_ih_t + h @ w_hh_t + bias
        i = jax.nn.sigmoid(g[:, 0 * H:1 * H])
        f = jax.nn.sigmoid(g[:, 1 * H:2 * H])
        gg = jnp.tanh(g[:, 2 * H:3 * H])
        o = jax.nn.sigmoid(g[:, 3 * H:4 * H])
        c = f * c + i * gg
        h = o * jnp.tanh(c)
        return (h, c), h

    init = (jnp.zeros((B, H), jnp.float32), jnp.zeros((B, H), jnp.float32))
    _, hs = lax.scan(step, init, x_tbf)
    return hs


def model_ref(x_btf, params):
    x_tbf = jnp.transpose(x_btf, (1, 0, 2))
    h1 = lstm_layer_ref(x_tbf, params["w_ih1"], params["w_hh1"], params["b1"])
    h2 = lstm_layer_ref(h1, params["w_ih2"], params["w_hh2"], params["b2"])
    return h2[-1] @ params["w_out"] + params["b_out"]


# --------------------------------- Main --------------------------------------

def init_params(key, n_features, embed_dim):
    hidden_dim = 2 * embed_dim
    ks = jax.random.split(key, 11)

    def u(k, shape, scale):
        return jax.random.uniform(k, shape, jnp.float32, -scale, scale)

    s1 = 1.0 / np.sqrt(hidden_dim)
    s2 = 1.0 / np.sqrt(embed_dim)
    return {
        # lstm1: n_features -> hidden_dim (= 2*embed_dim)
        "w_ih1": u(ks[0], (n_features, 4 * hidden_dim), s1),
        "w_hh1": u(ks[1], (hidden_dim, 4 * hidden_dim), s1),
        "b1": u(ks[2], (4 * hidden_dim,), s1) + u(ks[3], (4 * hidden_dim,), s1),
        # lstm2: hidden_dim -> embed_dim
        "w_ih2": u(ks[4], (hidden_dim, 4 * embed_dim), s2),
        "w_hh2": u(ks[5], (embed_dim, 4 * embed_dim), s2),
        "b2": u(ks[6], (4 * embed_dim,), s2) + u(ks[7], (4 * embed_dim,), s2),
        # output_layer: embed_dim -> 1
        "w_out": u(ks[8], (embed_dim, 1), s2),
        "b_out": u(ks[9], (1, 1), s2),
    }


if __name__ == "__main__":
    batch, seq_len, n_features, embed_dim = 2, 8, 4, 32

    key = jax.random.PRNGKey(0)
    k_x, k_p = jax.random.split(key)
    x = jax.random.normal(k_x, (batch, seq_len, n_features), jnp.float32)
    params = init_params(k_p, n_features, embed_dim)

    # One-time weight re-layout (outside the per-call jitted path).
    prepped = prepare_params(params)

    out = jax.block_until_ready(lstm_model_forward(x, prepped))
    ref = jax.block_until_ready(model_ref(x, params))

    assert out.shape == (batch, 1)
    # bf16 MXU operands (f32 accumulation) -> loosened tolerance vs. f32 ref.
    np.testing.assert_allclose(np.asarray(out), np.asarray(ref),
                               rtol=3e-2, atol=3e-2)

    print("KERNEL_OK")
</pallas_src>

<mosaic_0001>
module attributes {stable_mosaic.version = 11 : i64} {
  func.func @fused_lstm_kernel(%arg0: memref<64x4xbf16, #tpu.memory_space<vmem>>, %arg1: memref<4x512xbf16, #tpu.memory_space<vmem>>, %arg2: memref<1x512xf32, #tpu.memory_space<vmem>>, %arg3: memref<128x1024xbf16, #tpu.memory_space<vmem>>, %arg4: memref<1x512xf32, #tpu.memory_space<vmem>>, %arg5: memref<1x128xf32, #tpu.memory_space<vmem>>, %arg6: memref<1x1xf32, #tpu.memory_space<vmem>>, %arg7: memref<128x512xbf16, #tpu.memory_space<any>>, %arg8: memref<2x1xf32, #tpu.memory_space<vmem>>, %arg9: memref<128x512xbf16, #tpu.memory_space<vmem>>, %arg10: memref<!tpu.dma_semaphore, #tpu.memory_space<semaphore_mem>>) attributes {dimension_semantics = [], scalar_prefetch = 0 : i64, scratch_operands = 2 : i64, tpu.core_type = #tpu.core_type<tc>} {
    tpu.enqueue_dma source(%arg7 : memref<128x512xbf16, #tpu.memory_space<any>>) target(%arg9 : memref<128x512xbf16, #tpu.memory_space<vmem>>) target_semaphore(%arg10 : memref<!tpu.dma_semaphore, #tpu.memory_space<semaphore_mem>>)
    %c0 = arith.constant 0 : index
    %c0_0 = arith.constant 0 : index
    %0 = vector.load %arg0[%c0, %c0_0] : memref<64x4xbf16, #tpu.memory_space<vmem>>, vector<64x4xbf16>
    %c0_1 = arith.constant 0 : index
    %c0_2 = arith.constant 0 : index
    %1 = vector.load %arg1[%c0_1, %c0_2] : memref<4x512xbf16, #tpu.memory_space<vmem>>, vector<4x512xbf16>
    %cst = arith.constant dense<0.000000e+00> : vector<64x512xf32>
    %2 = tpu.matmul %0, %1, %cst {dimension_numbers = #tpu.dot_dimension_numbers<[1], [0], [0], [1], [0, 0, 1, 1], [], []>} : vector<64x4xbf16>, vector<4x512xbf16>, vector<64x512xf32> -> vector<64x512xf32>
    %c0_3 = arith.constant 0 : index
    %c0_4 = arith.constant 0 : index
    %3 = vector.load %arg2[%c0_3, %c0_4] : memref<1x512xf32, #tpu.memory_space<vmem>>, vector<1x512xf32>
    %4 = vector.broadcast %3 : vector<1x512xf32> to vector<64x512xf32>
    %5 = arith.addf %2, %4 : vector<64x512xf32>
    %c0_5 = arith.constant 0 : index
    %c0_6 = arith.constant 0 : index
    %6 = vector.load %arg3[%c0_5, %c0_6] : memref<128x1024xbf16, #tpu.memory_space<vmem>>, vector<128x1024xbf16>
    %c0_7 = arith.constant 0 : index
    %c0_8 = arith.constant 0 : index
    %7 = vector.load %arg4[%c0_7, %c0_8] : memref<1x512xf32, #tpu.memory_space<vmem>>, vector<1x512xf32>
    %cst_9 = arith.constant 0.000000e+00 : f32
    %8 = vector.broadcast %cst_9 : f32 to vector<8x128xf32>
    %cst_10 = arith.constant 0.000000e+00 : f32
    %9 = vector.broadcast %cst_10 : f32 to vector<8x128xf32>
    %cst_11 = arith.constant 0.000000e+00 : f32
    %10 = vector.broadcast %cst_11 : f32 to vector<8x1024xf32>
    %cst_12 = arith.constant 0.000000e+00 : f32
    %11 = vector.broadcast %cst_12 : f32 to vector<8x512xf32>
    %12 = vector.extract_strided_slice %5 {offsets = [0, 0], sizes = [8, 512], strides = [1, 1]} : vector<64x512xf32> to vector<8x512xf32>
    %13 = vector.extract_strided_slice %10 {offsets = [0, 0], sizes = [8, 512], strides = [1, 1]} : vector<8x1024xf32> to vector<8x512xf32>
    %14 = arith.addf %12, %13 : vector<8x512xf32>
    %15 = vector.extract_strided_slice %14 {offsets = [0, 0], sizes = [8, 128], strides = [1, 1]} : vector<8x512xf32> to vector<8x128xf32>
    %cst_13 = arith.constant 5.000000e-01 : f32
    %16 = vector.broadcast %cst_13 : f32 to vector<8x128xf32>
    %17 = arith.mulf %16, %15 : vector<8x128xf32>
    %18 = math.tanh %17 : vector<8x128xf32>
    %cst_14 = arith.constant 1.000000e+00 : f32
    %19 = vector.broadcast %cst_14 : f32 to vector<8x128xf32>
    %20 = arith.addf %18, %19 : vector<8x128xf32>
    %cst_15 = arith.constant 5.000000e-01 : f32
    %21 = vector.broadcast %cst_15 : f32 to vector<8x128xf32>
    %22 = arith.mulf %21, %20 : vector<8x128xf32>
    %23 = vector.extract_strided_slice %14 {offsets = [0, 128], sizes = [8, 128], strides = [1, 1]} : vector<8x512xf32> to vector<8x128xf32>
    %cst_16 = arith.constant 5.000000e-01 : f32
    %24 = vector.broadcast %cst_16 : f32 to vector<8x128xf32>
    %25 = arith.mulf %24, %23 : vector<8x128xf32>
    %26 = math.tanh %25 : vector<8x128xf32>
    %cst_17 = arith.constant 1.000000e+00 : f32
    %27 = vector.broadcast %cst_17 : f32 to vector<8x128xf32>
    %28 = arith.addf %26, %27 : vector<8x128xf32>
    %cst_18 = arith.constant 5.000000e-01 : f32
    %29 = vector.broadcast %cst_18 : f32 to vector<8x128xf32>
    %30 = arith.mulf %29, %28 : vector<8x128xf32>
    %31 = vector.extract_strided_slice %14 {offsets = [0, 256], sizes = [8, 128], strides = [1, 1]} : vector<8x512xf32> to vector<8x128xf32>
    %32 = math.tanh %31 : vector<8x128xf32>
    %33 = vector.extract_strided_slice %14 {offsets = [0, 384], sizes = [8, 128], strides = [1, 1]} : vector<8x512xf32> to vector<8x128xf32>
    %cst_19 = arith.constant 5.000000e-01 : f32
    %34 = vector.broadcast %cst_19 : f32 to vector<8x128xf32>
    %35 = arith.mulf %34, %33 : vector<8x128xf32>
    %36 = math.tanh %35 : vector<8x128xf32>
    %cst_20 = arith.constant 1.000000e+00 : f32
    %37 = vector.broadcast %cst_20 : f32 to vector<8x128xf32>
    %38 = arith.addf %36, %37 : vector<8x128xf32>
    %cst_21 = arith.constant 5.000000e-01 : f32
    %39 = vector.broadcast %cst_21 : f32 to vector<8x128xf32>
    %40 = arith.mulf %39, %38 : vector<8x128xf32>
    %41 = arith.mulf %30, %8 : vector<8x128xf32>
    %42 = arith.mulf %22, %32 : vector<8x128xf32>
    %43 = arith.addf %41, %42 : vector<8x128xf32>
    %44 = math.tanh %43 : vector<8x128xf32>
    %45 = arith.mulf %40, %44 : vector<8x128xf32>
    %46 = arith.truncf %45 : vector<8x128xf32> to vector<8x128xbf16>
    %cst_22 = arith.constant dense<0.000000e+00> : vector<8x1024xf32>
    %47 = tpu.matmul %46, %6, %cst_22 {dimension_numbers = #tpu.dot_dimension_numbers<[1], [0], [0], [1], [0, 0, 1, 1], [], []>} : vector<8x128xbf16>, vector<128x1024xbf16>, vector<8x1024xf32> -> vector<8x1024xf32>
    %48 = vector.extract_strided_slice %47 {offsets = [0, 512], sizes = [8, 512], strides = [1, 1]} : vector<8x1024xf32> to vector<8x512xf32>
    %49 = arith.addf %48, %11 : vector<8x512xf32>
    %50 = vector.broadcast %7 : vector<1x512xf32> to vector<8x512xf32>
    %51 = arith.addf %49, %50 : vector<8x512xf32>
    %52 = vector.extract_strided_slice %51 {offsets = [0, 0], sizes = [8, 128], strides = [1, 1]} : vector<8x512xf32> to vector<8x128xf32>
    %cst_23 = arith.constant 5.000000e-01 : f32
    %53 = vector.broadcast %cst_23 : f32 to vector<8x128xf32>
    %54 = arith.mulf %53, %52 : vector<8x128xf32>
    %55 = math.tanh %54 : vector<8x128xf32>
    %cst_24 = arith.constant 1.000000e+00 : f32
    %56 = vector.broadcast %cst_24 : f32 to vector<8x128xf32>
    %57 = arith.addf %55, %56 : vector<8x128xf32>
    %cst_25 = arith.constant 5.000000e-01 : f32
    %58 = vector.broadcast %cst_25 : f32 to vector<8x128xf32>
    %59 = arith.mulf %58, %57 : vector<8x128xf32>
    %60 = vector.extract_strided_slice %51 {offsets = [0, 128], sizes = [8, 128], strides = [1, 1]} : vector<8x512xf32> to vector<8x128xf32>
    %cst_26 = arith.constant 5.000000e-01 : f32
    %61 = vector.broadcast %cst_26 : f32 to vector<8x128xf32>
    %62 = arith.mulf %61, %60 : vector<8x128xf32>
    %63 = math.tanh %62 : vector<8x128xf32>
    %cst_27 = arith.constant 1.000000e+00 : f32
    %64 = vector.broadcast %cst_27 : f32 to vector<8x128xf32>
    %65 = arith.addf %63, %64 : vector<8x128xf32>
    %cst_28 = arith.constant 5.000000e-01 : f32
    %66 = vector.broadcast %cst_28 : f32 to vector<8x128xf32>
    %67 = arith.mulf %66, %65 : vector<8x128xf32>
    %68 = vector.extract_strided_slice %51 {offsets = [0, 256], sizes = [8, 128], strides = [1, 1]} : vector<8x512xf32> to vector<8x128xf32>
    %69 = math.tanh %68 : vector<8x128xf32>
    %70 = vector.extract_strided_slice %51 {offsets = [0, 384], sizes = [8, 128], strides = [1, 1]} : vector<8x512xf32> to vector<8x128xf32>
    %cst_29 = arith.constant 5.000000e-01 : f32
    %71 = vector.broadcast %cst_29 : f32 to vector<8x128xf32>
    %72 = arith.mulf %71, %70 : vector<8x128xf32>
    %73 = math.tanh %72 : vector<8x128xf32>
    %cst_30 = arith.constant 1.000000e+00 : f32
    %74 = vector.broadcast %cst_30 : f32 to vector<8x128xf32>
    %75 = arith.addf %73, %74 : vector<8x128xf32>
    %cst_31 = arith.constant 5.000000e-01 : f32
    %76 = vector.broadcast %cst_31 : f32 to vector<8x128xf32>
    %77 = arith.mulf %76, %75 : vector<8x128xf32>
    %78 = arith.mulf %67, %9 : vector<8x128xf32>
    %79 = arith.mulf %59, %69 : vector<8x128xf32>
    %80 = arith.addf %78, %79 : vector<8x128xf32>
    %81 = math.tanh %80 : vector<8x128xf32>
    %82 = arith.mulf %77, %81 : vector<8x128xf32>
    tpu.wait_dma2 semaphore(%arg10 : memref<!tpu.dma_semaphore, #tpu.memory_space<semaphore_mem>>) src(%arg7 : memref<128x512xbf16, #tpu.memory_space<any>>) dst(%arg9 : memref<128x512xbf16, #tpu.memory_space<vmem>>)
    %c0_32 = arith.constant 0 : index
    %c0_33 = arith.constant 0 : index
    %83 = vector.load %arg9[%c0_32, %c0_33] : memref<128x512xbf16, #tpu.memory_space<vmem>>, vector<128x512xbf16>
    %84 = arith.truncf %82 : vector<8x128xf32> to vector<8x128xbf16>
    %cst_34 = arith.constant dense<0.000000e+00> : vector<8x512xf32>
    %85 = tpu.matmul %84, %83, %cst_34 {dimension_numbers = #tpu.dot_dimension_numbers<[1], [0], [0], [1], [0, 0, 1, 1], [], []>} : vector<8x128xbf16>, vector<128x512xbf16>, vector<8x512xf32> -> vector<8x512xf32>
    %86 = vector.extract_strided_slice %5 {offsets = [8, 0], sizes = [8, 512], strides = [1, 1]} : vector<64x512xf32> to vector<8x512xf32>
    %87 = vector.extract_strided_slice %47 {offsets = [0, 0], sizes = [8, 512], strides = [1, 1]} : vector<8x1024xf32> to vector<8x512xf32>
    %88 = arith.addf %86, %87 : vector<8x512xf32>
    %89 = vector.extract_strided_slice %88 {offsets = [0, 0], sizes = [8, 128], strides = [1, 1]} : vector<8x512xf32> to vector<8x128xf32>
    %cst_35 = arith.constant 5.000000e-01 : f32
    %90 = vector.broadcast %cst_35 : f32 to vector<8x128xf32>
    %91 = arith.mulf %90, %89 : vector<8x128xf32>
    %92 = math.tanh %91 : vector<8x128xf32>
    %cst_36 = arith.constant 1.000000e+00 : f32
    %93 = vector.broadcast %cst_36 : f32 to vector<8x128xf32>
    %94 = arith.addf %92, %93 : vector<8x128xf32>
    %cst_37 = arith.constant 5.000000e-01 : f32
    %95 = vector.broadcast %cst_37 : f32 to vector<8x128xf32>
    %96 = arith.mulf %95, %94 : vector<8x128xf32>
    %97 = vector.extract_strided_slice %88 {offsets = [0, 128], sizes = [8, 128], strides = [1, 1]} : vector<8x512xf32> to vector<8x128xf32>
    %cst_38 = arith.constant 5.000000e-01 : f32
    %98 = vector.broadcast %cst_38 : f32 to vector<8x128xf32>
    %99 = arith.mulf %98, %97 : vector<8x128xf32>
    %100 = math.tanh %99 : vector<8x128xf32>
    %cst_39 = arith.constant 1.000000e+00 : f32
    %101 = vector.broadcast %cst_39 : f32 to vector<8x128xf32>
    %102 = arith.addf %100, %101 : vector<8x128xf32>
    %cst_40 = arith.constant 5.000000e-01 : f32
    %103 = vector.broadcast %cst_40 : f32 to vector<8x128xf32>
    %104 = arith.mulf %103, %102 : vector<8x128xf32>
    %105 = vector.extract_strided_slice %88 {offsets = [0, 256], sizes = [8, 128], strides = [1, 1]} : vector<8x512xf32> to vector<8x128xf32>
    %106 = math.tanh %105 : vector<8x128xf32>
    %107 = vector.extract_strided_slice %88 {offsets = [0, 384], sizes = [8, 128], strides = [1, 1]} : vector<8x512xf32> to vector<8x128xf32>
    %cst_41 = arith.constant 5.000000e-01 : f32
    %108 = vector.broadcast %cst_41 : f32 to vector<8x128xf32>
    %109 = arith.mulf %108, %107 : vector<8x128xf32>
    %110 = math.tanh %109 : vector<8x128xf32>
    %cst_42 = arith.constant 1.000000e+00 : f32
    %111 = vector.broadcast %cst_42 : f32 to vector<8x128xf32>
    %112 = arith.addf %110, %111 : vector<8x128xf32>
    %cst_43 = arith.constant 5.000000e-01 : f32
    %113 = vector.broadcast %cst_43 : f32 to vector<8x128xf32>
    %114 = arith.mulf %113, %112 : vector<8x128xf32>
    %115 = arith.mulf %104, %43 : vector<8x128xf32>
    %116 = arith.mulf %96, %106 : vector<8x128xf32>
    %117 = arith.addf %115, %116 : vector<8x128xf32>
    %118 = math.tanh %117 : vector<8x128xf32>
    %119 = arith.mulf %114, %118 : vector<8x128xf32>
    %120 = arith.truncf %119 : vector<8x128xf32> to vector<8x128xbf16>
    %cst_44 = arith.constant dense<0.000000e+00> : vector<8x1024xf32>
    %121 = tpu.matmul %120, %6, %cst_44 {dimension_numbers = #tpu.dot_dimension_numbers<[1], [0], [0], [1], [0, 0, 1, 1], [], []>} : vector<8x128xbf16>, vector<128x1024xbf16>, vector<8x1024xf32> -> vector<8x1024xf32>
    %122 = vector.extract_strided_slice %121 {offsets = [0, 512], sizes = [8, 512], strides = [1, 1]} : vector<8x1024xf32> to vector<8x512xf32>
    %123 = arith.addf %122, %85 : vector<8x512xf32>
    %124 = vector.broadcast %7 : vector<1x512xf32> to vector<8x512xf32>
    %125 = arith.addf %123, %124 : vector<8x512xf32>
    %126 = vector.extract_strided_slice %125 {offsets = [0, 0], sizes = [8, 128], strides = [1, 1]} : vector<8x512xf32> to vector<8x128xf32>
    %cst_45 = arith.constant 5.000000e-01 : f32
    %127 = vector.broadcast %cst_45 : f32 to vector<8x128xf32>
    %128 = arith.mulf %127, %126 : vector<8x128xf32>
    %129 = math.tanh %128 : vector<8x128xf32>
    %cst_46 = arith.constant 1.000000e+00 : f32
    %130 = vector.broadcast %cst_46 : f32 to vector<8x128xf32>
    %131 = arith.addf %129, %130 : vector<8x128xf32>
    %cst_47 = arith.constant 5.000000e-01 : f32
    %132 = vector.broadcast %cst_47 : f32 to vector<8x128xf32>
    %133 = arith.mulf %132, %131 : vector<8x128xf32>
    %134 = vector.extract_strided_slice %125 {offsets = [0, 128], sizes = [8, 128], strides = [1, 1]} : vector<8x512xf32> to vector<8x128xf32>
    %cst_48 = arith.constant 5.000000e-01 : f32
    %135 = vector.broadcast %cst_48 : f32 to vector<8x128xf32>
    %136 = arith.mulf %135, %134 : vector<8x128xf32>
    %137 = math.tanh %136 : vector<8x128xf32>
    %cst_49 = arith.constant 1.000000e+00 : f32
    %138 = vector.broadcast %cst_49 : f32 to vector<8x128xf32>
    %139 = arith.addf %137, %138 : vector<8x128xf32>
    %cst_50 = arith.constant 5.000000e-01 : f32
    %140 = vector.broadcast %cst_50 : f32 to vector<8x128xf32>
    %141 = arith.mulf %140, %139 : vector<8x128xf32>
    %142 = vector.extract_strided_slice %125 {offsets = [0, 256], sizes = [8, 128], strides = [1, 1]} : vector<8x512xf32> to vector<8x128xf32>
    %143 = math.tanh %142 : vector<8x128xf32>
    %144 = vector.extract_strided_slice %125 {offsets = [0, 384], sizes = [8, 128], strides = [1, 1]} : vector<8x512xf32> to vector<8x128xf32>
    %cst_51 = arith.constant 5.000000e-01 : f32
    %145 = vector.broadcast %cst_51 : f32 to vector<8x128xf32>
    %146 = arith.mulf %145, %144 : vector<8x128xf32>
    %147 = math.tanh %146 : vector<8x128xf32>
    %cst_52 = arith.constant 1.000000e+00 : f32
    %148 = vector.broadcast %cst_52 : f32 to vector<8x128xf32>
    %149 = arith.addf %147, %148 : vector<8x128xf32>
    %cst_53 = arith.constant 5.000000e-01 : f32
    %150 = vector.broadcast %cst_53 : f32 to vector<8x128xf32>
    %151 = arith.mulf %150, %149 : vector<8x128xf32>
    %152 = arith.mulf %141, %80 : vector<8x128xf32>
    %153 = arith.mulf %133, %143 : vector<8x128xf32>
    %154 = arith.addf %152, %153 : vector<8x128xf32>
    %155 = math.tanh %154 : vector<8x128xf32>
    %156 = arith.mulf %151, %155 : vector<8x128xf32>
    %157 = arith.truncf %156 : vector<8x128xf32> to vector<8x128xbf16>
    %cst_54 = arith.constant dense<0.000000e+00> : vector<8x512xf32>
    %158 = tpu.matmul %157, %83, %cst_54 {dimension_numbers = #tpu.dot_dimension_numbers<[1], [0], [0], [1], [0, 0, 1, 1], [], []>} : vector<8x128xbf16>, vector<128x512xbf16>, vector<8x512xf32> -> vector<8x512xf32>
    %159 = vector.extract_strided_slice %5 {offsets = [16, 0], sizes = [8, 512], strides = [1, 1]} : vector<64x512xf32> to vector<8x512xf32>
    %160 = vector.extract_strided_slice %121 {offsets = [0, 0], sizes = [8, 512], strides = [1, 1]} : vector<8x1024xf32> to vector<8x512xf32>
    %161 = arith.addf %159, %160 : vector<8x512xf32>
    %162 = vector.extract_strided_slice %161 {offsets = [0, 0], sizes = [8, 128], strides = [1, 1]} : vector<8x512xf32> to vector<8x128xf32>
    %cst_55 = arith.constant 5.000000e-01 : f32
    %163 = vector.broadcast %cst_55 : f32 to vector<8x128xf32>
    %164 = arith.mulf %163, %162 : vector<8x128xf32>
    %165 = math.tanh %164 : vector<8x128xf32>
    %cst_56 = arith.constant 1.000000e+00 : f32
    %166 = vector.broadcast %cst_56 : f32 to vector<8x128xf32>
    %167 = arith.addf %165, %166 : vector<8x128xf32>
    %cst_57 = arith.constant 5.000000e-01 : f32
    %168 = vector.broadcast %cst_57 : f32 to vector<8x128xf32>
    %169 = arith.mulf %168, %167 : vector<8x128xf32>
    %170 = vector.extract_strided_slice %161 {offsets = [0, 128], sizes = [8, 128], strides = [1, 1]} : vector<8x512xf32> to vector<8x128xf32>
    %cst_58 = arith.constant 5.000000e-01 : f32
    %171 = vector.broadcast %cst_58 : f32 to vector<8x128xf32>
    %172 = arith.mulf %171, %170 : vector<8x128xf32>
    %173 = math.tanh %172 : vector<8x128xf32>
    %cst_59 = arith.constant 1.000000e+00 : f32
    %174 = vector.broadcast %cst_59 : f32 to vector<8x128xf32>
    %175 = arith.addf %173, %174 : vector<8x128xf32>
    %cst_60 = arith.constant 5.000000e-01 : f32
    %176 = vector.broadcast %cst_60 : f32 to vector<8x128xf32>
    %177 = arith.mulf %176, %175 : vector<8x128xf32>
    %178 = vector.extract_strided_slice %161 {offsets = [0, 256], sizes = [8, 128], strides = [1, 1]} : vector<8x512xf32> to vector<8x128xf32>
    %179 = math.tanh %178 : vector<8x128xf32>
    %180 = vector.extract_strided_slice %161 {offsets = [0, 384], sizes = [8, 128], strides = [1, 1]} : vector<8x512xf32> to vector<8x128xf32>
    %cst_61 = arith.constant 5.000000e-01 : f32
    %181 = vector.broadcast %cst_61 : f32 to vector<8x128xf32>
    %182 = arith.mulf %181, %180 : vector<8x128xf32>
    %183 = math.tanh %182 : vector<8x128xf32>
    %cst_62 = arith.constant 1.000000e+00 : f32
    %184 = vector.broadcast %cst_62 : f32 to vector<8x128xf32>
    %185 = arith.addf %183, %184 : vector<8x128xf32>
    %cst_63 = arith.constant 5.000000e-01 : f32
    %186 = vector.broadcast %cst_63 : f32 to vector<8x128xf32>
    %187 = arith.mulf %186, %185 : vector<8x128xf32>
    %188 = arith.mulf %177, %117 : vector<8x128xf32>
    %189 = arith.mulf %169, %179 : vector<8x128xf32>
    %190 = arith.addf %188, %189 : vector<8x128xf32>
    %191 = math.tanh %190 : vector<8x128xf32>
    %192 = arith.mulf %187, %191 : vector<8x128xf32>
    %193 = arith.truncf %192 : vector<8x128xf32> to vector<8x128xbf16>
    %cst_64 = arith.constant dense<0.000000e+00> : vector<8x1024xf32>
    %194 = tpu.matmul %193, %6, %cst_64 {dimension_numbers = #tpu.dot_dimension_numbers<[1], [0], [0], [1], [0, 0, 1, 1], [], []>} : vector<8x128xbf16>, vector<128x1024xbf16>, vector<8x1024xf32> -> vector<8x1024xf32>
    %195 = vector.extract_strided_slice %194 {offsets = [0, 512], sizes = [8, 512], strides = [1, 1]} : vector<8x1024xf32> to vector<8x512xf32>
    %196 = arith.addf %195, %158 : vector<8x512xf32>
    %197 = vector.broadcast %7 : vector<1x512xf32> to vector<8x512xf32>
    %198 = arith.addf %196, %197 : vector<8x512xf32>
    %199 = vector.extract_strided_slice %198 {offsets = [0, 0], sizes = [8, 128], strides = [1, 1]} : vector<8x512xf32> to vector<8x128xf32>
    %cst_65 = arith.constant 5.000000e-01 : f32
    %200 = vector.broadcast %cst_65 : f32 to vector<8x128xf32>
    %201 = arith.mulf %200, %199 : vector<8x128xf32>
    %202 = math.tanh %201 : vector<8x128xf32>
    %cst_66 = arith.constant 1.000000e+00 : f32
    %203 = vector.broadcast %cst_66 : f32 to vector<8x128xf32>
    %204 = arith.addf %202, %203 : vector<8x128xf32>
    %cst_67 = arith.constant 5.000000e-01 : f32
    %205 = vector.broadcast %cst_67 : f32 to vector<8x128xf32>
    %206 = arith.mulf %205, %204 : vector<8x128xf32>
    %207 = vector.extract_strided_slice %198 {offsets = [0, 128], sizes = [8, 128], strides = [1, 1]} : vector<8x512xf32> to vector<8x128xf32>
    %cst_68 = arith.constant 5.000000e-01 : f32
    %208 = vector.broadcast %cst_68 : f32 to vector<8x128xf32>
    %209 = arith.mulf %208, %207 : vector<8x128xf32>
    %210 = math.tanh %209 : vector<8x128xf32>
    %cst_69 = arith.constant 1.000000e+00 : f32
    %211 = vector.broadcast %cst_69 : f32 to vector<8x128xf32>
    %212 = arith.addf %210, %211 : vector<8x128xf32>
    %cst_70 = arith.constant 5.000000e-01 : f32
    %213 = vector.broadcast %cst_70 : f32 to vector<8x128xf32>
    %214 = arith.mulf %213, %212 : vector<8x128xf32>
    %215 = vector.extract_strided_slice %198 {offsets = [0, 256], sizes = [8, 128], strides = [1, 1]} : vector<8x512xf32> to vector<8x128xf32>
    %216 = math.tanh %215 : vector<8x128xf32>
    %217 = vector.extract_strided_slice %198 {offsets = [0, 384], sizes = [8, 128], strides = [1, 1]} : vector<8x512xf32> to vector<8x128xf32>
    %cst_71 = arith.constant 5.000000e-01 : f32
    %218 = vector.broadcast %cst_71 : f32 to vector<8x128xf32>
    %219 = arith.mulf %218, %217 : vector<8x128xf32>
    %220 = math.tanh %219 : vector<8x128xf32>
    %cst_72 = arith.constant 1.000000e+00 : f32
    %221 = vector.broadcast %cst_72 : f32 to vector<8x128xf32>
    %222 = arith.addf %220, %221 : vector<8x128xf32>
    %cst_73 = arith.constant 5.000000e-01 : f32
    %223 = vector.broadcast %cst_73 : f32 to vector<8x128xf32>
    %224 = arith.mulf %223, %222 : vector<8x128xf32>
    %225 = arith.mulf %214, %154 : vector<8x128xf32>
    %226 = arith.mulf %206, %216 : vector<8x128xf32>
    %227 = arith.addf %225, %226 : vector<8x128xf32>
    %228 = math.tanh %227 : vector<8x128xf32>
    %229 = arith.mulf %224, %228 : vector<8x128xf32>
    %230 = arith.truncf %229 : vector<8x128xf32> to vector<8x128xbf16>
    %cst_74 = arith.constant dense<0.000000e+00> : vector<8x512xf32>
    %231 = tpu.matmul %230, %83, %cst_74 {dimension_numbers = #tpu.dot_dimension_numbers<[1], [0], [0], [1], [0, 0, 1, 1], [], []>} : vector<8x128xbf16>, vector<128x512xbf16>, vector<8x512xf32> -> vector<8x512xf32>
    %232 = vector.extract_strided_slice %5 {offsets = [24, 0], sizes = [8, 512], strides = [1, 1]} : vector<64x512xf32> to vector<8x512xf32>
    %233 = vector.extract_strided_slice %194 {offsets = [0, 0], sizes = [8, 512], strides = [1, 1]} : vector<8x1024xf32> to vector<8x512xf32>
    %234 = arith.addf %232, %233 : vector<8x512xf32>
    %235 = vector.extract_strided_slice %234 {offsets = [0, 0], sizes = [8, 128], strides = [1, 1]} : vector<8x512xf32> to vector<8x128xf32>
    %cst_75 = arith.constant 5.000000e-01 : f32
    %236 = vector.broadcast %cst_75 : f32 to vector<8x128xf32>
    %237 = arith.mulf %236, %235 : vector<8x128xf32>
    %238 = math.tanh %237 : vector<8x128xf32>
    %cst_76 = arith.constant 1.000000e+00 : f32
    %239 = vector.broadcast %cst_76 : f32 to vector<8x128xf32>
    %240 = arith.addf %238, %239 : vector<8x128xf32>
    %cst_77 = arith.constant 5.000000e-01 : f32
    %241 = vector.broadcast %cst_77 : f32 to vector<8x128xf32>
    %242 = arith.mulf %241, %240 : vector<8x128xf32>
    %243 = vector.extract_strided_slice %234 {offsets = [0, 128], sizes = [8, 128], strides = [1, 1]} : vector<8x512xf32> to vector<8x128xf32>
    %cst_78 = arith.constant 5.000000e-01 : f32
    %244 = vector.broadcast %cst_78 : f32 to vector<8x128xf32>
    %245 = arith.mulf %244, %243 : vector<8x128xf32>
    %246 = math.tanh %245 : vector<8x128xf32>
    %cst_79 = arith.constant 1.000000e+00 : f32
    %247 = vector.broadcast %cst_79 : f32 to vector<8x128xf32>
    %248 = arith.addf %246, %247 : vector<8x128xf32>
    %cst_80 = arith.constant 5.000000e-01 : f32
    %249 = vector.broadcast %cst_80 : f32 to vector<8x128xf32>
    %250 = arith.mulf %249, %248 : vector<8x128xf32>
    %251 = vector.extract_strided_slice %234 {offsets = [0, 256], sizes = [8, 128], strides = [1, 1]} : vector<8x512xf32> to vector<8x128xf32>
    %252 = math.tanh %251 : vector<8x128xf32>
    %253 = vector.extract_strided_slice %234 {offsets = [0, 384], sizes = [8, 128], strides = [1, 1]} : vector<8x512xf32> to vector<8x128xf32>
    %cst_81 = arith.constant 5.000000e-01 : f32
    %254 = vector.broadcast %cst_81 : f32 to vector<8x128xf32>
    %255 = arith.mulf %254, %253 : vector<8x128xf32>
    %256 = math.tanh %255 : vector<8x128xf32>
    %cst_82 = arith.constant 1.000000e+00 : f32
    %257 = vector.broadcast %cst_82 : f32 to vector<8x128xf32>
    %258 = arith.addf %256, %257 : vector<8x128xf32>
    %cst_83 = arith.constant 5.000000e-01 : f32
    %259 = vector.broadcast %cst_83 : f32 to vector<8x128xf32>
    %260 = arith.mulf %259, %258 : vector<8x128xf32>
    %261 = arith.mulf %250, %190 : vector<8x128xf32>
    %262 = arith.mulf %242, %252 : vector<8x128xf32>
    %263 = arith.addf %261, %262 : vector<8x128xf32>
    %264 = math.tanh %263 : vector<8x128xf32>
    %265 = arith.mulf %260, %264 : vector<8x128xf32>
    %266 = arith.truncf %265 : vector<8x128xf32> to vector<8x128xbf16>
    %cst_84 = arith.constant dense<0.000000e+00> : vector<8x1024xf32>
    %267 = tpu.matmul %266, %6, %cst_84 {dimension_numbers = #tpu.dot_dimension_numbers<[1], [0], [0], [1], [0, 0, 1, 1], [], []>} : vector<8x128xbf16>, vector<128x1024xbf16>, vector<8x1024xf32> -> vector<8x1024xf32>
    %268 = vector.extract_strided_slice %267 {offsets = [0, 512], sizes = [8, 512], strides = [1, 1]} : vector<8x1024xf32> to vector<8x512xf32>
    %269 = arith.addf %268, %231 : vector<8x512xf32>
    %270 = vector.broadcast %7 : vector<1x512xf32> to vector<8x512xf32>
    %271 = arith.addf %269, %270 : vector<8x512xf32>
    %272 = vector.extract_strided_slice %271 {offsets = [0, 0], sizes = [8, 128], strides = [1, 1]} : vector<8x512xf32> to vector<8x128xf32>
    %cst_85 = arith.constant 5.000000e-01 : f32
    %273 = vector.broadcast %cst_85 : f32 to vector<8x128xf32>
    %274 = arith.mulf %273, %272 : vector<8x128xf32>
    %275 = math.tanh %274 : vector<8x128xf32>
    %cst_86 = arith.constant 1.000000e+00 : f32
    %276 = vector.broadcast %cst_86 : f32 to vector<8x128xf32>
    %277 = arith.addf %275, %276 : vector<8x128xf32>
    %cst_87 = arith.constant 5.000000e-01 : f32
    %278 = vector.broadcast %cst_87 : f32 to vector<8x128xf32>
    %279 = arith.mulf %278, %277 : vector<8x128xf32>
    %280 = vector.extract_strided_slice %271 {offsets = [0, 128], sizes = [8, 128], strides = [1, 1]} : vector<8x512xf32> to vector<8x128xf32>
    %cst_88 = arith.constant 5.000000e-01 : f32
    %281 = vector.broadcast %cst_88 : f32 to vector<8x128xf32>
    %282 = arith.mulf %281, %280 : vector<8x128xf32>
    %283 = math.tanh %282 : vector<8x128xf32>
    %cst_89 = arith.constant 1.000000e+00 : f32
    %284 = vector.broadcast %cst_89 : f32 to vector<8x128xf32>
    %285 = arith.addf %283, %284 : vector<8x128xf32>
    %cst_90 = arith.constant 5.000000e-01 : f32
    %286 = vector.broadcast %cst_90 : f32 to vector<8x128xf32>
    %287 = arith.mulf %286, %285 : vector<8x128xf32>
    %288 = vector.extract_strided_slice %271 {offsets = [0, 256], sizes = [8, 128], strides = [1, 1]} : vector<8x512xf32> to vector<8x128xf32>
    %289 = math.tanh %288 : vector<8x128xf32>
    %290 = vector.extract_strided_slice %271 {offsets = [0, 384], sizes = [8, 128], strides = [1, 1]} : vector<8x512xf32> to vector<8x128xf32>
    %cst_91 = arith.constant 5.000000e-01 : f32
    %291 = vector.broadcast %cst_91 : f32 to vector<8x128xf32>
    %292 = arith.mulf %291, %290 : vector<8x128xf32>
    %293 = math.tanh %292 : vector<8x128xf32>
    %cst_92 = arith.constant 1.000000e+00 : f32
    %294 = vector.broadcast %cst_92 : f32 to vector<8x128xf32>
    %295 = arith.addf %293, %294 : vector<8x128xf32>
    %cst_93 = arith.constant 5.000000e-01 : f32
    %296 = vector.broadcast %cst_93 : f32 to vector<8x128xf32>
    %297 = arith.mulf %296, %295 : vector<8x128xf32>
    %298 = arith.mulf %287, %227 : vector<8x128xf32>
    %299 = arith.mulf %279, %289 : vector<8x128xf32>
    %300 = arith.addf %298, %299 : vector<8x128xf32>
    %301 = math.tanh %300 : vector<8x128xf32>
    %302 = arith.mulf %297, %301 : vector<8x128xf32>
    %303 = arith.truncf %302 : vector<8x128xf32> to vector<8x128xbf16>
    %cst_94 = arith.constant dense<0.000000e+00> : vector<8x512xf32>
    %304 = tpu.matmul %303, %83, %cst_94 {dimension_numbers = #tpu.dot_dimension_numbers<[1], [0], [0], [1], [0, 0, 1, 1], [], []>} : vector<8x128xbf16>, vector<128x512xbf16>, vector<8x512xf32> -> vector<8x512xf32>
    %305 = vector.extract_strided_slice %5 {offsets = [32, 0], sizes = [8, 512], strides = [1, 1]} : vector<64x512xf32> to vector<8x512xf32>
    %306 = vector.extract_strided_slice %267 {offsets = [0, 0], sizes = [8, 512], strides = [1, 1]} : vector<8x1024xf32> to vector<8x512xf32>
    %307 = arith.addf %305, %306 : vector<8x512xf32>
    %308 = vector.extract_strided_slice %307 {offsets = [0, 0], sizes = [8, 128], strides = [1, 1]} : vector<8x512xf32> to vector<8x128xf32>
    %cst_95 = arith.constant 5.000000e-01 : f32
    %309 = vector.broadcast %cst_95 : f32 to vector<8x128xf32>
    %310 = arith.mulf %309, %308 : vector<8x128xf32>
    %311 = math.tanh %310 : vector<8x128xf32>
    %cst_96 = arith.constant 1.000000e+00 : f32
    %312 = vector.broadcast %cst_96 : f32 to vector<8x128xf32>
    %313 = arith.addf %311, %312 : vector<8x128xf32>
    %cst_97 = arith.constant 5.000000e-01 : f32
    %314 = vector.broadcast %cst_97 : f32 to vector<8x128xf32>
    %315 = arith.mulf %314, %313 : vector<8x128xf32>
    %316 = vector.extract_strided_slice %307 {offsets = [0, 128], sizes = [8, 128], strides = [1, 1]} : vector<8x512xf32> to vector<8x128xf32>
    %cst_98 = arith.constant 5.000000e-01 : f32
    %317 = vector.broadcast %cst_98 : f32 to vector<8x128xf32>
    %318 = arith.mulf %317, %316 : vector<8x128xf32>
    %319 = math.tanh %318 : vector<8x128xf32>
    %cst_99 = arith.constant 1.000000e+00 : f32
    %320 = vector.broadcast %cst_99 : f32 to vector<8x128xf32>
    %321 = arith.addf %319, %320 : vector<8x128xf32>
    %cst_100 = arith.constant 5.000000e-01 : f32
    %322 = vector.broadcast %cst_100 : f32 to vector<8x128xf32>
    %323 = arith.mulf %322, %321 : vector<8x128xf32>
    %324 = vector.extract_strided_slice %307 {offsets = [0, 256], sizes = [8, 128], strides = [1, 1]} : vector<8x512xf32> to vector<8x128xf32>
    %325 = math.tanh %324 : vector<8x128xf32>
    %326 = vector.extract_strided_slice %307 {offsets = [0, 384], sizes = [8, 128], strides = [1, 1]} : vector<8x512xf32> to vector<8x128xf32>
    %cst_101 = arith.constant 5.000000e-01 : f32
    %327 = vector.broadcast %cst_101 : f32 to vector<8x128xf32>
    %328 = arith.mulf %327, %326 : vector<8x128xf32>
    %329 = math.tanh %328 : vector<8x128xf32>
    %cst_102 = arith.constant 1.000000e+00 : f32
    %330 = vector.broadcast %cst_102 : f32 to vector<8x128xf32>
    %331 = arith.addf %329, %330 : vector<8x128xf32>
    %cst_103 = arith.constant 5.000000e-01 : f32
    %332 = vector.broadcast %cst_103 : f32 to vector<8x128xf32>
    %333 = arith.mulf %332, %331 : vector<8x128xf32>
    %334 = arith.mulf %323, %263 : vector<8x128xf32>
    %335 = arith.mulf %315, %325 : vector<8x128xf32>
    %336 = arith.addf %334, %335 : vector<8x128xf32>
    %337 = math.tanh %336 : vector<8x128xf32>
    %338 = arith.mulf %333, %337 : vector<8x128xf32>
    %339 = arith.truncf %338 : vector<8x128xf32> to vector<8x128xbf16>
    %cst_104 = arith.constant dense<0.000000e+00> : vector<8x1024xf32>
    %340 = tpu.matmul %339, %6, %cst_104 {dimension_numbers = #tpu.dot_dimension_numbers<[1], [0], [0], [1], [0, 0, 1, 1], [], []>} : vector<8x128xbf16>, vector<128x1024xbf16>, vector<8x1024xf32> -> vector<8x1024xf32>
    %341 = vector.extract_strided_slice %340 {offsets = [0, 512], sizes = [8, 512], strides = [1, 1]} : vector<8x1024xf32> to vector<8x512xf32>
    %342 = arith.addf %341, %304 : vector<8x512xf32>
    %343 = vector.broadcast %7 : vector<1x512xf32> to vector<8x512xf32>
    %344 = arith.addf %342, %343 : vector<8x512xf32>
    %345 = vector.extract_strided_slice %344 {offsets = [0, 0], sizes = [8, 128], strides = [1, 1]} : vector<8x512xf32> to vector<8x128xf32>
    %cst_105 = arith.constant 5.000000e-01 : f32
    %346 = vector.broadcast %cst_105 : f32 to vector<8x128xf32>
    %347 = arith.mulf %346, %345 : vector<8x128xf32>
    %348 = math.tanh %347 : vector<8x128xf32>
    %cst_106 = arith.constant 1.000000e+00 : f32
    %349 = vector.broadcast %cst_106 : f32 to vector<8x128xf32>
    %350 = arith.addf %348, %349 : vector<8x128xf32>
    %cst_107 = arith.constant 5.000000e-01 : f32
    %351 = vector.broadcast %cst_107 : f32 to vector<8x128xf32>
    %352 = arith.mulf %351, %350 : vector<8x128xf32>
    %353 = vector.extract_strided_slice %344 {offsets = [0, 128], sizes = [8, 128], strides = [1, 1]} : vector<8x512xf32> to vector<8x128xf32>
    %cst_108 = arith.constant 5.000000e-01 : f32
    %354 = vector.broadcast %cst_108 : f32 to vector<8x128xf32>
    %355 = arith.mulf %354, %353 : vector<8x128xf32>
    %356 = math.tanh %355 : vector<8x128xf32>
    %cst_109 = arith.constant 1.000000e+00 : f32
    %357 = vector.broadcast %cst_109 : f32 to vector<8x128xf32>
    %358 = arith.addf %356, %357 : vector<8x128xf32>
    %cst_110 = arith.constant 5.000000e-01 : f32
    %359 = vector.broadcast %cst_110 : f32 to vector<8x128xf32>
    %360 = arith.mulf %359, %358 : vector<8x128xf32>
    %361 = vector.extract_strided_slice %344 {offsets = [0, 256], sizes = [8, 128], strides = [1, 1]} : vector<8x512xf32> to vector<8x128xf32>
    %362 = math.tanh %361 : vector<8x128xf32>
    %363 = vector.extract_strided_slice %344 {offsets = [0, 384], sizes = [8, 128], strides = [1, 1]} : vector<8x512xf32> to vector<8x128xf32>
    %cst_111 = arith.constant 5.000000e-01 : f32
    %364 = vector.broadcast %cst_111 : f32 to vector<8x128xf32>
    %365 = arith.mulf %364, %363 : vector<8x128xf32>
    %366 = math.tanh %365 : vector<8x128xf32>
    %cst_112 = arith.constant 1.000000e+00 : f32
    %367 = vector.broadcast %cst_112 : f32 to vector<8x128xf32>
    %368 = arith.addf %366, %367 : vector<8x128xf32>
    %cst_113 = arith.constant 5.000000e-01 : f32
    %369 = vector.broadcast %cst_113 : f32 to vector<8x128xf32>
    %370 = arith.mulf %369, %368 : vector<8x128xf32>
    %371 = arith.mulf %360, %300 : vector<8x128xf32>
    %372 = arith.mulf %352, %362 : vector<8x128xf32>
    %373 = arith.addf %371, %372 : vector<8x128xf32>
    %374 = math.tanh %373 : vector<8x128xf32>
    %375 = arith.mulf %370, %374 : vector<8x128xf32>
    %376 = arith.truncf %375 : vector<8x128xf32> to vector<8x128xbf16>
    %cst_114 = arith.constant dense<0.000000e+00> : vector<8x512xf32>
    %377 = tpu.matmul %376, %83, %cst_114 {dimension_numbers = #tpu.dot_dimension_numbers<[1], [0], [0], [1], [0, 0, 1, 1], [], []>} : vector<8x128xbf16>, vector<128x512xbf16>, vector<8x512xf32> -> vector<8x512xf32>
    %378 = vector.extract_strided_slice %5 {offsets = [40, 0], sizes = [8, 512], strides = [1, 1]} : vector<64x512xf32> to vector<8x512xf32>
    %379 = vector.extract_strided_slice %340 {offsets = [0, 0], sizes = [8, 512], strides = [1, 1]} : vector<8x1024xf32> to vector<8x512xf32>
    %380 = arith.addf %378, %379 : vector<8x512xf32>
    %381 = vector.extract_strided_slice %380 {offsets = [0, 0], sizes = [8, 128], strides = [1, 1]} : vector<8x512xf32> to vector<8x128xf32>
    %cst_115 = arith.constant 5.000000e-01 : f32
    %382 = vector.broadcast %cst_115 : f32 to vector<8x128xf32>
    %383 = arith.mulf %382, %381 : vector<8x128xf32>
    %384 = math.tanh %383 : vector<8x128xf32>
    %cst_116 = arith.constant 1.000000e+00 : f32
    %385 = vector.broadcast %cst_116 : f32 to vector<8x128xf32>
    %386 = arith.addf %384, %385 : vector<8x128xf32>
    %cst_117 = arith.constant 5.000000e-01 : f32
    %387 = vector.broadcast %cst_117 : f32 to vector<8x128xf32>
    %388 = arith.mulf %387, %386 : vector<8x128xf32>
    %389 = vector.extract_strided_slice %380 {offsets = [0, 128], sizes = [8, 128], strides = [1, 1]} : vector<8x512xf32> to vector<8x128xf32>
    %cst_118 = arith.constant 5.000000e-01 : f32
    %390 = vector.broadcast %cst_118 : f32 to vector<8x128xf32>
    %391 = arith.mulf %390, %389 : vector<8x128xf32>
    %392 = math.tanh %391 : vector<8x128xf32>
    %cst_119 = arith.constant 1.000000e+00 : f32
    %393 = vector.broadcast %cst_119 : f32 to vector<8x128xf32>
    %394 = arith.addf %392, %393 : vector<8x128xf32>
    %cst_120 = arith.constant 5.000000e-01 : f32
    %395 = vector.broadcast %cst_120 : f32 to vector<8x128xf32>
    %396 = arith.mulf %395, %394 : vector<8x128xf32>
    %397 = vector.extract_strided_slice %380 {offsets = [0, 256], sizes = [8, 128], strides = [1, 1]} : vector<8x512xf32> to vector<8x128xf32>
    %398 = math.tanh %397 : vector<8x128xf32>
    %399 = vector.extract_strided_slice %380 {offsets = [0, 384], sizes = [8, 128], strides = [1, 1]} : vector<8x512xf32> to vector<8x128xf32>
    %cst_121 = arith.constant 5.000000e-01 : f32
    %400 = vector.broadcast %cst_121 : f32 to vector<8x128xf32>
    %401 = arith.mulf %400, %399 : vector<8x128xf32>
    %402 = math.tanh %401 : vector<8x128xf32>
    %cst_122 = arith.constant 1.000000e+00 : f32
    %403 = vector.broadcast %cst_122 : f32 to vector<8x128xf32>
    %404 = arith.addf %402, %403 : vector<8x128xf32>
    %cst_123 = arith.constant 5.000000e-01 : f32
    %405 = vector.broadcast %cst_123 : f32 to vector<8x128xf32>
    %406 = arith.mulf %405, %404 : vector<8x128xf32>
    %407 = arith.mulf %396, %336 : vector<8x128xf32>
    %408 = arith.mulf %388, %398 : vector<8x128xf32>
    %409 = arith.addf %407, %408 : vector<8x128xf32>
    %410 = math.tanh %409 : vector<8x128xf32>
    %411 = arith.mulf %406, %410 : vector<8x128xf32>
    %412 = arith.truncf %411 : vector<8x128xf32> to vector<8x128xbf16>
    %cst_124 = arith.constant dense<0.000000e+00> : vector<8x1024xf32>
    %413 = tpu.matmul %412, %6, %cst_124 {dimension_numbers = #tpu.dot_dimension_numbers<[1], [0], [0], [1], [0, 0, 1, 1], [], []>} : vector<8x128xbf16>, vector<128x1024xbf16>, vector<8x1024xf32> -> vector<8x1024xf32>
    %414 = vector.extract_strided_slice %413 {offsets = [0, 512], sizes = [8, 512], strides = [1, 1]} : vector<8x1024xf32> to vector<8x512xf32>
    %415 = arith.addf %414, %377 : vector<8x512xf32>
    %416 = vector.broadcast %7 : vector<1x512xf32> to vector<8x512xf32>
    %417 = arith.addf %415, %416 : vector<8x512xf32>
    %418 = vector.extract_strided_slice %417 {offsets = [0, 0], sizes = [8, 128], strides = [1, 1]} : vector<8x512xf32> to vector<8x128xf32>
    %cst_125 = arith.constant 5.000000e-01 : f32
    %419 = vector.broadcast %cst_125 : f32 to vector<8x128xf32>
    %420 = arith.mulf %419, %418 : vector<8x128xf32>
    %421 = math.tanh %420 : vector<8x128xf32>
    %cst_126 = arith.constant 1.000000e+00 : f32
    %422 = vector.broadcast %cst_126 : f32 to vector<8x128xf32>
    %423 = arith.addf %421, %422 : vector<8x128xf32>
    %cst_127 = arith.constant 5.000000e-01 : f32
    %424 = vector.broadcast %cst_127 : f32 to vector<8x128xf32>
    %425 = arith.mulf %424, %423 : vector<8x128xf32>
    %426 = vector.extract_strided_slice %417 {offsets = [0, 128], sizes = [8, 128], strides = [1, 1]} : vector<8x512xf32> to vector<8x128xf32>
    %cst_128 = arith.constant 5.000000e-01 : f32
    %427 = vector.broadcast %cst_128 : f32 to vector<8x128xf32>
    %428 = arith.mulf %427, %426 : vector<8x128xf32>
    %429 = math.tanh %428 : vector<8x128xf32>
    %cst_129 = arith.constant 1.000000e+00 : f32
    %430 = vector.broadcast %cst_129 : f32 to vector<8x128xf32>
    %431 = arith.addf %429, %430 : vector<8x128xf32>
    %cst_130 = arith.constant 5.000000e-01 : f32
    %432 = vector.broadcast %cst_130 : f32 to vector<8x128xf32>
    %433 = arith.mulf %432, %431 : vector<8x128xf32>
    %434 = vector.extract_strided_slice %417 {offsets = [0, 256], sizes = [8, 128], strides = [1, 1]} : vector<8x512xf32> to vector<8x128xf32>
    %435 = math.tanh %434 : vector<8x128xf32>
    %436 = vector.extract_strided_slice %417 {offsets = [0, 384], sizes = [8, 128], strides = [1, 1]} : vector<8x512xf32> to vector<8x128xf32>
    %cst_131 = arith.constant 5.000000e-01 : f32
    %437 = vector.broadcast %cst_131 : f32 to vector<8x128xf32>
    %438 = arith.mulf %437, %436 : vector<8x128xf32>
    %439 = math.tanh %438 : vector<8x128xf32>
    %cst_132 = arith.constant 1.000000e+00 : f32
    %440 = vector.broadcast %cst_132 : f32 to vector<8x128xf32>
    %441 = arith.addf %439, %440 : vector<8x128xf32>
    %cst_133 = arith.constant 5.000000e-01 : f32
    %442 = vector.broadcast %cst_133 : f32 to vector<8x128xf32>
    %443 = arith.mulf %442, %441 : vector<8x128xf32>
    %444 = arith.mulf %433, %373 : vector<8x128xf32>
    %445 = arith.mulf %425, %435 : vector<8x128xf32>
    %446 = arith.addf %444, %445 : vector<8x128xf32>
    %447 = math.tanh %446 : vector<8x128xf32>
    %448 = arith.mulf %443, %447 : vector<8x128xf32>
    %449 = arith.truncf %448 : vector<8x128xf32> to vector<8x128xbf16>
    %cst_134 = arith.constant dense<0.000000e+00> : vector<8x512xf32>
    %450 = tpu.matmul %449, %83, %cst_134 {dimension_numbers = #tpu.dot_dimension_numbers<[1], [0], [0], [1], [0, 0, 1, 1], [], []>} : vector<8x128xbf16>, vector<128x512xbf16>, vector<8x512xf32> -> vector<8x512xf32>
    %451 = vector.extract_strided_slice %5 {offsets = [48, 0], sizes = [8, 512], strides = [1, 1]} : vector<64x512xf32> to vector<8x512xf32>
    %452 = vector.extract_strided_slice %413 {offsets = [0, 0], sizes = [8, 512], strides = [1, 1]} : vector<8x1024xf32> to vector<8x512xf32>
    %453 = arith.addf %451, %452 : vector<8x512xf32>
    %454 = vector.extract_strided_slice %453 {offsets = [0, 0], sizes = [8, 128], strides = [1, 1]} : vector<8x512xf32> to vector<8x128xf32>
    %cst_135 = arith.constant 5.000000e-01 : f32
    %455 = vector.broadcast %cst_135 : f32 to vector<8x128xf32>
    %456 = arith.mulf %455, %454 : vector<8x128xf32>
    %457 = math.tanh %456 : vector<8x128xf32>
    %cst_136 = arith.constant 1.000000e+00 : f32
    %458 = vector.broadcast %cst_136 : f32 to vector<8x128xf32>
    %459 = arith.addf %457, %458 : vector<8x128xf32>
    %cst_137 = arith.constant 5.000000e-01 : f32
    %460 = vector.broadcast %cst_137 : f32 to vector<8x128xf32>
    %461 = arith.mulf %460, %459 : vector<8x128xf32>
    %462 = vector.extract_strided_slice %453 {offsets = [0, 128], sizes = [8, 128], strides = [1, 1]} : vector<8x512xf32> to vector<8x128xf32>
    %cst_138 = arith.constant 5.000000e-01 : f32
    %463 = vector.broadcast %cst_138 : f32 to vector<8x128xf32>
    %464 = arith.mulf %463, %462 : vector<8x128xf32>
    %465 = math.tanh %464 : vector<8x128xf32>
    %cst_139 = arith.constant 1.000000e+00 : f32
    %466 = vector.broadcast %cst_139 : f32 to vector<8x128xf32>
    %467 = arith.addf %465, %466 : vector<8x128xf32>
    %cst_140 = arith.constant 5.000000e-01 : f32
    %468 = vector.broadcast %cst_140 : f32 to vector<8x128xf32>
    %469 = arith.mulf %468, %467 : vector<8x128xf32>
    %470 = vector.extract_strided_slice %453 {offsets = [0, 256], sizes = [8, 128], strides = [1, 1]} : vector<8x512xf32> to vector<8x128xf32>
    %471 = math.tanh %470 : vector<8x128xf32>
    %472 = vector.extract_strided_slice %453 {offsets = [0, 384], sizes = [8, 128], strides = [1, 1]} : vector<8x512xf32> to vector<8x128xf32>
    %cst_141 = arith.constant 5.000000e-01 : f32
    %473 = vector.broadcast %cst_141 : f32 to vector<8x128xf32>
    %474 = arith.mulf %473, %472 : vector<8x128xf32>
    %475 = math.tanh %474 : vector<8x128xf32>
    %cst_142 = arith.constant 1.000000e+00 : f32
    %476 = vector.broadcast %cst_142 : f32 to vector<8x128xf32>
    %477 = arith.addf %475, %476 : vector<8x128xf32>
    %cst_143 = arith.constant 5.000000e-01 : f32
    %478 = vector.broadcast %cst_143 : f32 to vector<8x128xf32>
    %479 = arith.mulf %478, %477 : vector<8x128xf32>
    %480 = arith.mulf %469, %409 : vector<8x128xf32>
    %481 = arith.mulf %461, %471 : vector<8x128xf32>
    %482 = arith.addf %480, %481 : vector<8x128xf32>
    %483 = math.tanh %482 : vector<8x128xf32>
    %484 = arith.mulf %479, %483 : vector<8x128xf32>
    %485 = arith.truncf %484 : vector<8x128xf32> to vector<8x128xbf16>
    %cst_144 = arith.constant dense<0.000000e+00> : vector<8x1024xf32>
    %486 = tpu.matmul %485, %6, %cst_144 {dimension_numbers = #tpu.dot_dimension_numbers<[1], [0], [0], [1], [0, 0, 1, 1], [], []>} : vector<8x128xbf16>, vector<128x1024xbf16>, vector<8x1024xf32> -> vector<8x1024xf32>
    %487 = vector.extract_strided_slice %486 {offsets = [0, 512], sizes = [8, 512], strides = [1, 1]} : vector<8x1024xf32> to vector<8x512xf32>
    %488 = arith.addf %487, %450 : vector<8x512xf32>
    %489 = vector.broadcast %7 : vector<1x512xf32> to vector<8x512xf32>
    %490 = arith.addf %488, %489 : vector<8x512xf32>
    %491 = vector.extract_strided_slice %490 {offsets = [0, 0], sizes = [8, 128], strides = [1, 1]} : vector<8x512xf32> to vector<8x128xf32>
    %cst_145 = arith.constant 5.000000e-01 : f32
    %492 = vector.broadcast %cst_145 : f32 to vector<8x128xf32>
    %493 = arith.mulf %492, %491 : vector<8x128xf32>
    %494 = math.tanh %493 : vector<8x128xf32>
    %cst_146 = arith.constant 1.000000e+00 : f32
    %495 = vector.broadcast %cst_146 : f32 to vector<8x128xf32>
    %496 = arith.addf %494, %495 : vector<8x128xf32>
    %cst_147 = arith.constant 5.000000e-01 : f32
    %497 = vector.broadcast %cst_147 : f32 to vector<8x128xf32>
    %498 = arith.mulf %497, %496 : vector<8x128xf32>
    %499 = vector.extract_strided_slice %490 {offsets = [0, 128], sizes = [8, 128], strides = [1, 1]} : vector<8x512xf32> to vector<8x128xf32>
    %cst_148 = arith.constant 5.000000e-01 : f32
    %500 = vector.broadcast %cst_148 : f32 to vector<8x128xf32>
    %501 = arith.mulf %500, %499 : vector<8x128xf32>
    %502 = math.tanh %501 : vector<8x128xf32>
    %cst_149 = arith.constant 1.000000e+00 : f32
    %503 = vector.broadcast %cst_149 : f32 to vector<8x128xf32>
    %504 = arith.addf %502, %503 : vector<8x128xf32>
    %cst_150 = arith.constant 5.000000e-01 : f32
    %505 = vector.broadcast %cst_150 : f32 to vector<8x128xf32>
    %506 = arith.mulf %505, %504 : vector<8x128xf32>
    %507 = vector.extract_strided_slice %490 {offsets = [0, 256], sizes = [8, 128], strides = [1, 1]} : vector<8x512xf32> to vector<8x128xf32>
    %508 = math.tanh %507 : vector<8x128xf32>
    %509 = vector.extract_strided_slice %490 {offsets = [0, 384], sizes = [8, 128], strides = [1, 1]} : vector<8x512xf32> to vector<8x128xf32>
    %cst_151 = arith.constant 5.000000e-01 : f32
    %510 = vector.broadcast %cst_151 : f32 to vector<8x128xf32>
    %511 = arith.mulf %510, %509 : vector<8x128xf32>
    %512 = math.tanh %511 : vector<8x128xf32>
    %cst_152 = arith.constant 1.000000e+00 : f32
    %513 = vector.broadcast %cst_152 : f32 to vector<8x128xf32>
    %514 = arith.addf %512, %513 : vector<8x128xf32>
    %cst_153 = arith.constant 5.000000e-01 : f32
    %515 = vector.broadcast %cst_153 : f32 to vector<8x128xf32>
    %516 = arith.mulf %515, %514 : vector<8x128xf32>
    %517 = arith.mulf %506, %446 : vector<8x128xf32>
    %518 = arith.mulf %498, %508 : vector<8x128xf32>
    %519 = arith.addf %517, %518 : vector<8x128xf32>
    %520 = math.tanh %519 : vector<8x128xf32>
    %521 = arith.mulf %516, %520 : vector<8x128xf32>
    %522 = arith.truncf %521 : vector<8x128xf32> to vector<8x128xbf16>
    %cst_154 = arith.constant dense<0.000000e+00> : vector<8x512xf32>
    %523 = tpu.matmul %522, %83, %cst_154 {dimension_numbers = #tpu.dot_dimension_numbers<[1], [0], [0], [1], [0, 0, 1, 1], [], []>} : vector<8x128xbf16>, vector<128x512xbf16>, vector<8x512xf32> -> vector<8x512xf32>
    %524 = vector.extract_strided_slice %5 {offsets = [56, 0], sizes = [8, 512], strides = [1, 1]} : vector<64x512xf32> to vector<8x512xf32>
    %525 = vector.extract_strided_slice %486 {offsets = [0, 0], sizes = [8, 512], strides = [1, 1]} : vector<8x1024xf32> to vector<8x512xf32>
    %526 = arith.addf %524, %525 : vector<8x512xf32>
    %527 = vector.extract_strided_slice %526 {offsets = [0, 0], sizes = [8, 128], strides = [1, 1]} : vector<8x512xf32> to vector<8x128xf32>
    %cst_155 = arith.constant 5.000000e-01 : f32
    %528 = vector.broadcast %cst_155 : f32 to vector<8x128xf32>
    %529 = arith.mulf %528, %527 : vector<8x128xf32>
    %530 = math.tanh %529 : vector<8x128xf32>
    %cst_156 = arith.constant 1.000000e+00 : f32
    %531 = vector.broadcast %cst_156 : f32 to vector<8x128xf32>
    %532 = arith.addf %530, %531 : vector<8x128xf32>
    %cst_157 = arith.constant 5.000000e-01 : f32
    %533 = vector.broadcast %cst_157 : f32 to vector<8x128xf32>
    %534 = arith.mulf %533, %532 : vector<8x128xf32>
    %535 = vector.extract_strided_slice %526 {offsets = [0, 128], sizes = [8, 128], strides = [1, 1]} : vector<8x512xf32> to vector<8x128xf32>
    %cst_158 = arith.constant 5.000000e-01 : f32
    %536 = vector.broadcast %cst_158 : f32 to vector<8x128xf32>
    %537 = arith.mulf %536, %535 : vector<8x128xf32>
    %538 = math.tanh %537 : vector<8x128xf32>
    %cst_159 = arith.constant 1.000000e+00 : f32
    %539 = vector.broadcast %cst_159 : f32 to vector<8x128xf32>
    %540 = arith.addf %538, %539 : vector<8x128xf32>
    %cst_160 = arith.constant 5.000000e-01 : f32
    %541 = vector.broadcast %cst_160 : f32 to vector<8x128xf32>
    %542 = arith.mulf %541, %540 : vector<8x128xf32>
    %543 = vector.extract_strided_slice %526 {offsets = [0, 256], sizes = [8, 128], strides = [1, 1]} : vector<8x512xf32> to vector<8x128xf32>
    %544 = math.tanh %543 : vector<8x128xf32>
    %545 = vector.extract_strided_slice %526 {offsets = [0, 384], sizes = [8, 128], strides = [1, 1]} : vector<8x512xf32> to vector<8x128xf32>
    %cst_161 = arith.constant 5.000000e-01 : f32
    %546 = vector.broadcast %cst_161 : f32 to vector<8x128xf32>
    %547 = arith.mulf %546, %545 : vector<8x128xf32>
    %548 = math.tanh %547 : vector<8x128xf32>
    %cst_162 = arith.constant 1.000000e+00 : f32
    %549 = vector.broadcast %cst_162 : f32 to vector<8x128xf32>
    %550 = arith.addf %548, %549 : vector<8x128xf32>
    %cst_163 = arith.constant 5.000000e-01 : f32
    %551 = vector.broadcast %cst_163 : f32 to vector<8x128xf32>
    %552 = arith.mulf %551, %550 : vector<8x128xf32>
    %553 = arith.mulf %542, %482 : vector<8x128xf32>
    %554 = arith.mulf %534, %544 : vector<8x128xf32>
    %555 = arith.addf %553, %554 : vector<8x128xf32>
    %556 = math.tanh %555 : vector<8x128xf32>
    %557 = arith.mulf %552, %556 : vector<8x128xf32>
    %558 = arith.truncf %557 : vector<8x128xf32> to vector<8x128xbf16>
    %cst_164 = arith.constant dense<0.000000e+00> : vector<8x1024xf32>
    %559 = tpu.matmul %558, %6, %cst_164 {dimension_numbers = #tpu.dot_dimension_numbers<[1], [0], [0], [1], [0, 0, 1, 1], [], []>} : vector<8x128xbf16>, vector<128x1024xbf16>, vector<8x1024xf32> -> vector<8x1024xf32>
    %560 = vector.extract_strided_slice %559 {offsets = [0, 512], sizes = [8, 512], strides = [1, 1]} : vector<8x1024xf32> to vector<8x512xf32>
    %561 = arith.addf %560, %523 : vector<8x512xf32>
    %562 = vector.broadcast %7 : vector<1x512xf32> to vector<8x512xf32>
    %563 = arith.addf %561, %562 : vector<8x512xf32>
    %564 = vector.extract_strided_slice %563 {offsets = [0, 0], sizes = [8, 128], strides = [1, 1]} : vector<8x512xf32> to vector<8x128xf32>
    %cst_165 = arith.constant 5.000000e-01 : f32
    %565 = vector.broadcast %cst_165 : f32 to vector<8x128xf32>
    %566 = arith.mulf %565, %564 : vector<8x128xf32>
    %567 = math.tanh %566 : vector<8x128xf32>
    %cst_166 = arith.constant 1.000000e+00 : f32
    %568 = vector.broadcast %cst_166 : f32 to vector<8x128xf32>
    %569 = arith.addf %567, %568 : vector<8x128xf32>
    %cst_167 = arith.constant 5.000000e-01 : f32
    %570 = vector.broadcast %cst_167 : f32 to vector<8x128xf32>
    %571 = arith.mulf %570, %569 : vector<8x128xf32>
    %572 = vector.extract_strided_slice %563 {offsets = [0, 128], sizes = [8, 128], strides = [1, 1]} : vector<8x512xf32> to vector<8x128xf32>
    %cst_168 = arith.constant 5.000000e-01 : f32
    %573 = vector.broadcast %cst_168 : f32 to vector<8x128xf32>
    %574 = arith.mulf %573, %572 : vector<8x128xf32>
    %575 = math.tanh %574 : vector<8x128xf32>
    %cst_169 = arith.constant 1.000000e+00 : f32
    %576 = vector.broadcast %cst_169 : f32 to vector<8x128xf32>
    %577 = arith.addf %575, %576 : vector<8x128xf32>
    %cst_170 = arith.constant 5.000000e-01 : f32
    %578 = vector.broadcast %cst_170 : f32 to vector<8x128xf32>
    %579 = arith.mulf %578, %577 : vector<8x128xf32>
    %580 = vector.extract_strided_slice %563 {offsets = [0, 256], sizes = [8, 128], strides = [1, 1]} : vector<8x512xf32> to vector<8x128xf32>
    %581 = math.tanh %580 : vector<8x128xf32>
    %582 = vector.extract_strided_slice %563 {offsets = [0, 384], sizes = [8, 128], strides = [1, 1]} : vector<8x512xf32> to vector<8x128xf32>
    %cst_171 = arith.constant 5.000000e-01 : f32
    %583 = vector.broadcast %cst_171 : f32 to vector<8x128xf32>
    %584 = arith.mulf %583, %582 : vector<8x128xf32>
    %585 = math.tanh %584 : vector<8x128xf32>
    %cst_172 = arith.constant 1.000000e+00 : f32
    %586 = vector.broadcast %cst_172 : f32 to vector<8x128xf32>
    %587 = arith.addf %585, %586 : vector<8x128xf32>
    %cst_173 = arith.constant 5.000000e-01 : f32
    %588 = vector.broadcast %cst_173 : f32 to vector<8x128xf32>
    %589 = arith.mulf %588, %587 : vector<8x128xf32>
    %590 = arith.mulf %579, %519 : vector<8x128xf32>
    %591 = arith.mulf %571, %581 : vector<8x128xf32>
    %592 = arith.addf %590, %591 : vector<8x128xf32>
    %593 = math.tanh %592 : vector<8x128xf32>
    %594 = arith.mulf %589, %593 : vector<8x128xf32>
    %c0_174 = arith.constant 0 : index
    %c0_175 = arith.constant 0 : index
    %595 = vector.load %arg5[%c0_174, %c0_175] : memref<1x128xf32, #tpu.memory_space<vmem>>, vector<1x128xf32>
    %596 = vector.broadcast %595 : vector<1x128xf32> to vector<8x128xf32>
    %597 = arith.mulf %594, %596 : vector<8x128xf32>
    %cst_176 = arith.constant dense<0.000000e+00> : vector<8xf32>
    %598 = vector.multi_reduction <add>, %597, %cst_176 [1] : vector<8x128xf32> to vector<8xf32>
    %599 = vector.shape_cast %598 : vector<8xf32> to vector<8x1xf32>
    %c0_177 = arith.constant 0 : index
    %c0_178 = arith.constant 0 : index
    %600 = vector.load %arg6[%c0_177, %c0_178] : memref<1x1xf32, #tpu.memory_space<vmem>>, vector<1x1xf32>
    %601 = vector.broadcast %600 : vector<1x1xf32> to vector<8x1xf32>
    %602 = arith.addf %599, %601 : vector<8x1xf32>
    %603 = vector.extract_strided_slice %602 {offsets = [0, 0], sizes = [2, 1], strides = [1, 1]} : vector<8x1xf32> to vector<2x1xf32>
    %c0_179 = arith.constant 0 : index
    %c0_180 = arith.constant 0 : index
    %604 = vector.load %arg8[%c0_179, %c0_180] : memref<2x1xf32, #tpu.memory_space<vmem>>, vector<2x1xf32>
    tpu.vector_store %arg8[%c0_179, %c0_180], %603 {strides = array<i32>} : memref<2x1xf32, #tpu.memory_space<vmem>>, vector<2x1xf32>,
    return
  }
}

</mosaic_0001>

<bundles_post_ra>
// kernel: lstm_model_forward.1
= control target key start
LH: loop header
LB: loop body
LE: loop exit
PB: predicated region body
PF: predicated region fallthrough
CT: control target
= control target key end

     0   :  { %s4703_s0 = inlined_call_operand.vmem [shape: bf16[64,4], index: 0, kind: input, shape index: {}]   ;;  %s4704_s1 = inlined_call_operand.vmem [shape: bf16[4,512], index: 1, kind: input, shape index: {}]   ;;  %s4705_s2 = inlined_call_operand.vmem [shape: f32[1,512], index: 2, kind: input, shape index: {}]   ;;  %s4706_s3 = inlined_call_operand.hbm [shape: bf16[128,1024], index: 3, kind: input, shape index: {}]   ;;  %s4707_s4 = inlined_call_operand.vmem [shape: f32[1,512], index: 4, kind: input, shape index: {}]   ;;  %s4708_s5 = inlined_call_operand.vmem [shape: f32[1,128], index: 5, kind: input, shape index: {}]   ;;  %s4709_s6 = inlined_call_operand.<no memory space> [shape: f32[1,1], index: 6, kind: input, shape index: {}]   ;;  %s4710_s7 = inlined_call_operand.hbm [shape: bf16[128,512], index: 7, kind: input, shape index: {}]   ;;  %s4711_s8 = inlined_call_operand.vmem [shape: f32[2,1], index: 8, kind: output, shape index: {}]  }
   0x1   :  { %v13_v0 = vstv %s4709_s6 }
   0x2   :  { %14 = vst [vmem:[#allocation4] sm:$0x1] %v13_v0 }
   0x3   :  { %15 = vsyncpa [#allocation6], 0  ;;  %s3347_s29 = smov [#allocation5]   ;;  %s3321_s11 = scalar_lea.hbm %s4706_s3, 8192 }
   0x4   :  { %s27_s30 = sshll.u32 %s3347_s29, 4  ;;  %p3322_p0 = scmp.ne.s32.totalorder %s4706_s3, %s3321_s11  ;;  %s28_s30 = int_to_ptr.vmem [resolvable:$true] %s27_s30 }
   0x5   :  { %p3325_p1 = scmp.lt.u32.totalorder %s3321_s11, %s4706_s3 }
   0x7   :  { %p3327_p2 = pnand %p3325_p1, %p3322_p0 }
   0x9   :  { %3330 = shalt.err (!%p3327_p2)
}
   0xa   :  { %s3331_s6 = scalar_lea.vmem %s28_s30, 8192  ;;  %p3336_p4 = scmp.lt.s32.totalorder %s28_s30, %s28_s30 }
   0xb   :  { %p3332_p3 = scmp.ne.s32.totalorder %s28_s30, %s3331_s6  ;;  %p3337_p5 = scmp.lt.s32.totalorder %s3331_s6, %s3331_s6 }
   0xd   :  { %p3338_p6 = por %p3337_p5, %p3336_p4 }
   0xf   :  { %p3339_p7 = pnand %p3338_p6, %p3332_p3 }
  0x11   :  { %3342 = shalt.err (!%p3339_p7)
}
  0x12   :  { %s3348_s16 = smov 512   ;;  %s3349_s17 = smov 32  }
  0x13   :  { %33 = dma.hbm_to_vmem [thread:$0]  %s4706_s3, 8192, %s28_s30, [#allocation6], %s3348_s16, %s3348_s16, %s3349_s17  }
  0x14   :  { %3343 = dma.done.wait [#allocation6], 8192  }
  0x15   :  { %3344 = vsyncadd [#allocation6], 4294959104  ;;  %s48_s20 = sld [smem:[#allocation0]]   ;;  %60 = sst [smem:[#allocation8]] %s3348_s16  ;;  %v4716_v1 = vmov 0   ;;  %v90_v2 = vlaneseq  ;;  %vm161_vm0 = vcmask 1041408  }
  0x16   :  { %62 = sst [smem:[#allocation8 + $0x1]] %s3348_s16  ;;  %206 = vmatprep.mubr.bf16.mxu0 %v4716_v1  ;;  %279 = vmatprep.mubr.bf16.mxu1 %v4716_v1  ;;  %s3351_s21 = smov 4   ;;  %v3357_v3 = vmov 1983009808   ;;  %vm148_vm1 = vcmask 31744  }
  0x17   :  { %64 = sst [smem:[#allocation8 + $0x2]] %s3351_s21  ;;  %s3352_s22 = smov 64   ;;  %v133_v4 = vunpack.c.l.s4 %v3357_v3  ;;  %v3425_v5 = vshrl.u32 %v90_v2, 7 }
  0x18   :  { %66 = sst [smem:[#allocation8 + $0x3]] %s3352_s22  ;;  %s3353_s23 = smov 128  }
  0x19   :  { %68 = sst [smem:[#allocation8 + $0x4]] %s3353_s23  ;;  %s3354_s24 = smov 2   ;;  %v134_v6 = vunpack.c.0.s8 %v133_v4 }
  0x1a   :  { %70 = sst [smem:[#allocation8 + $0x5]] %s3354_s24  ;;  %s3355_s25 = smov [#allocation2]  }
  0x1b   :  { %s56_s3 = sshll.u32 %s3355_s25, 4  ;;  %s2996_s26 = sshll.u32 %s48_s20, 26  ;;  %v137_v7 = vsub.s32 %v134_v6, %v3425_v5  ;;  %s57_s3 = int_to_ptr.vmem [resolvable:$true] %s56_s3 }
  0x1c   :  { %s3356_s27 = smov 256   ;;  %s2997_s28 = sadd.s32 134217728, %s2996_s26 }
  0x1d   :  { %72 = sst [smem:[#allocation8 + $0x6]] %s3356_s27  ;;  %s3358_s29 = smov [#allocation3]  }
  0x1e   :  { %74 = sst [smem:[#allocation8 + $0x7]] %s3352_s22  ;;  %s3359_s30 = smov [#allocation7]  }
  0x1f   :  { %76 = sst [smem:[#allocation8 + $0x8]] %s3351_s21 }
  0x20   :  { %78 = dma.general %s4710_s7, 4096, %s57_s3, %s3358_s29, %s3359_s30, [#allocation8], %s2997_s28, 0  }
  0x21   :  { %v87_v8 = vld [vmem:[%s4704_s1] sm:$0xff]  ;;  %v321_v19 = vld [vmem:[#allocation5 + $0x8] sm:$0xff]  ;;  %v3096_v4 = vld [vmem:[%s4703_s0 + $0x18] sm:$0xff]  }
  0x22   :  { %v138_v9 = vrot.slane %v87_v8, %v137_v7  ;;  %v131_v10 = vcombine.high %v87_v8, %v87_v8  ;;  %v3092_v14 = vld [vmem:[%s4703_s0] sm:$0xff]   ;;  %v325_v21 = vld [vmem:[#allocation5 + $0x28] sm:$0xff] }
  0x23   :  { %v320_v17 = vld [vmem:[#allocation5] sm:$0xff]  ;;  %v3442_v23 = vcombine.low %v321_v19, %v325_v21  ;;  %v3444_v24 = vcombine.high %v321_v19, %v325_v21  ;;  %v329_v27 = vld [vmem:[#allocation5 + $0x48] sm:$0xff] }
  0x24   :  { %v146_v11 = vcombine.high %v138_v9, %v138_v9  ;;  %v163_v12 = vsel %vm161_vm0, %v138_v9, 0  ;;  %v145_v13 = vrot.slane %v131_v10, %v137_v7  ;;  %v324_v18 = vld [vmem:[#allocation5 + $0x20] sm:$0xff]  ;;  %v333_v29 = vld [vmem:[#allocation5 + $0x68] sm:$0xff] }
  0x25   :  { %v3438_v20 = vcombine.high %v320_v17, %v324_v18  ;;  %v3440_v22 = vcombine.low %v320_v17, %v324_v18  ;;  %4913 = vst [vmem:[#allocation12_spill] sm:$0xff] %v3444_v24  ;;  %v328_v25 = vld [vmem:[#allocation5 + $0x40] sm:$0xff]  ;;  %v3454_v31 = vcombine.low %v329_v27, %v333_v29  ;;  %v3456_v32 = vcombine.high %v329_v27, %v333_v29  ;;  %v337_v36 = vld [vmem:[#allocation5 + $0x88] sm:$0xff]  ;;  %v326_v27 = vld [vmem:[#allocation5 + $0x30] sm:$0xff] }
  0x26   :  { %3002 = vmatprep.subr.msk.bf16.mxu0 %vm161_vm0, %v146_v11  ;;  %v147_v15 = vcombine.high %v145_v13, %v145_v13  ;;  %v169_v16 = vsel %vm161_vm0, %v145_v13, 0  ;;  %v332_v26 = vld [vmem:[#allocation5 + $0x60] sm:$0xff]  ;;  %v341_v38 = vld [vmem:[#allocation5 + $0xa8] sm:$0xff]  ;;  %v323_v29 = vld [vmem:[#allocation5 + $0x18] sm:$0xff] }
  0x27   :  { %175 = vmatpush1.bf16.msra.mxu0 %v163_v12  ;;  %4912 = vst [vmem:[#allocation11_spill] sm:$0xff] %v3438_v20  ;;  %v3450_v28 = vcombine.high %v328_v25, %v332_v26  ;;  %v3452_v30 = vcombine.low %v328_v25, %v332_v26  ;;  %v3094_v33 = vld [vmem:[%s4703_s0 + $0x8] sm:$0xff]   ;;  %v3470_v40 = vcombine.low %v337_v36, %v341_v38  ;;  %v3095_v50 = vld [vmem:[%s4703_s0 + $0x10] sm:$0xff]  }
  0x28   :  { %3007 = vmatprep.subr.msk.bf16.mxu1 %vm161_vm0, %v147_v15  ;;  %728 = vmatprep.subr.bf16.mxu0 %v3438_v20  ;;  %v336_v34 = vld [vmem:[#allocation5 + $0x80] sm:$0xff]  ;;  %v3472_v41 = vcombine.high %v337_v36, %v341_v38  ;;  %v345_v44 = vld [vmem:[#allocation5 + $0xc8] sm:$0xff]  ;;  %v322_v26 = vld [vmem:[#allocation5 + $0x10] sm:$0xff] }
  0x29   :  { %248 = vmatpush1.bf16.msra.mxu1 %v169_v16  ;;  %v340_v35 = vld [vmem:[#allocation5 + $0xa0] sm:$0xff]  ;;  %v349_v46 = vld [vmem:[#allocation5 + $0xe8] sm:$0xff] }
  0x2a   :  { %3003 = vmatmul.mubr.msk.bf16.vlgmr.msra.gmra.mrb[0].mxu0 %vm148_vm1, %v3092_v14  ;;  %769 = vmatprep.subr.bf16.mxu1 %v3444_v24  ;;  %v3466_v37 = vcombine.high %v336_v34, %v340_v35  ;;  %v3468_v39 = vcombine.low %v336_v34, %v340_v35  ;;  %v344_v42 = vld [vmem:[#allocation5 + $0xc0] sm:$0xff]  ;;  %v3485_v48 = vcombine.low %v345_v44, %v349_v46  ;;  %v353_v53 = vld [vmem:[#allocation5 + $0x108] sm:$0xff]  ;;  %v327_v34 = vld [vmem:[#allocation5 + $0x38] sm:$0xff] }
  0x2b   :  { %216 = vmatprep.mubr.bf16.mxu0 %v4716_v1  ;;  %729 = vmatpush1.bf16.msra.mxu0 %v3440_v22  ;;  %v348_v43 = vld [vmem:[#allocation5 + $0xe0] sm:$0xff]  ;;  %v3487_v49 = vcombine.high %v345_v44, %v349_v46  ;;  %v357_v55 = vld [vmem:[#allocation5 + $0x128] sm:$0xff]  ;;  %v3557_v35 = vcombine.low %v322_v26, %v326_v27  ;;  %v3559_v36 = vcombine.low %v323_v29, %v327_v34  ;;  %v4713_v46 = vsub.s32 2, %v3425_v5 }
  0x2c   :  { %3008 = vmatmul.mubr.msk.bf16.vlgmr.msra.gmra.mrb[0].mxu1 %vm148_vm1, %v3092_v14  ;;  %730 = vmatprep.subr.bf16.mxu0 %v3450_v28  ;;  %v3481_v45 = vcombine.high %v344_v42, %v348_v43  ;;  %v3483_v47 = vcombine.low %v344_v42, %v348_v43  ;;  %v352_v51 = vld [vmem:[#allocation5 + $0x100] sm:$0xff]  ;;  %v3501_v57 = vcombine.low %v353_v53, %v357_v55  ;;  %v361_v61 = vld [vmem:[#allocation5 + $0x148] sm:$0xff]  ;;  %v4715_v42 = vsub.s32 0, %v3425_v5 }
  0x2d   :  { %289 = vmatprep.mubr.bf16.mxu1 %v4716_v1  ;;  %770 = vmatpush1.bf16.msra.mxu1 %v3442_v23  ;;  %v356_v52 = vld [vmem:[#allocation5 + $0x120] sm:$0xff]  ;;  %v3503_v58 = vcombine.high %v353_v53, %v357_v55  ;;  %v365_v63 = vld [vmem:[#allocation5 + $0x168] sm:$0xff]  ;;  %4915 = vst [vmem:[#allocation14_spill] sm:$0xff] %v3557_v35  ;;  %4916 = vst [vmem:[#allocation15_spill] sm:$0xff] %v3559_v36  ;;  %v3561_v38 = vcombine.high %v323_v29, %v327_v34  ;;  %v4714_v43 = vsub.s32 1, %v3425_v5 }
  0x2e   :  { %771 = vmatprep.subr.bf16.mxu1 %v3456_v32  ;;  %v3497_v54 = vcombine.high %v352_v51, %v356_v52  ;;  %v3499_v56 = vcombine.low %v352_v51, %v356_v52  ;;  %v360_v59 = vld [vmem:[#allocation5 + $0x140] sm:$0xff]  ;;  %v3516_v2 = vcombine.low %v361_v61, %v365_v63  ;;  %v3518_v3 = vcombine.high %v361_v61, %v365_v63  ;;  %v369_v8 = vld [vmem:[#allocation5 + $0x188] sm:$0xff] }
  0x2f   :  { %731 = vmatpush1.bf16.msra.mxu0 %v3452_v30  ;;  %v364_v60 = vld [vmem:[#allocation5 + $0x160] sm:$0xff]  ;;  %v373_v10 = vld [vmem:[#allocation5 + $0x1a8] sm:$0xff]  ;;  %4917 = vst [vmem:[#allocation16_spill] sm:$0xff] %v3561_v38  ;;  %v4712_v51 = vsub.s32 3, %v3425_v5 }
  0x30   :  { %732 = vmatprep.subr.bf16.mxu0 %v3466_v37  ;;  %v3512_v62 = vcombine.high %v360_v59, %v364_v60  ;;  %v3514_v0 = vcombine.low %v360_v59, %v364_v60  ;;  %v368_v6 = vld [vmem:[#allocation5 + $0x180] sm:$0xff]  ;;  %v3532_v12 = vcombine.low %v369_v8, %v373_v10  ;;  %v3534_v13 = vcombine.high %v369_v8, %v373_v10  ;;  %v377_v16 = vld [vmem:[#allocation5 + $0x1c8] sm:$0xff] }
  0x31   :  { %772 = vmatpush1.bf16.msra.mxu1 %v3454_v31  ;;  %v372_v7 = vld [vmem:[#allocation5 + $0x1a0] sm:$0xff]  ;;  %v381_v18 = vld [vmem:[#allocation5 + $0x1e8] sm:$0xff] }
  0x32   :  { %3004 = vmatmul.mubr.msk.bf16.gmra.mrb[4].mxu0 %vm148_vm1, %v3094_v33  ;;  %773 = vmatprep.subr.bf16.mxu1 %v3472_v41  ;;  %v3528_v9 = vcombine.high %v368_v6, %v372_v7  ;;  %v3530_v11 = vcombine.low %v368_v6, %v372_v7  ;;  %v376_v14 = vld [vmem:[#allocation5 + $0x1c0] sm:$0xff]  ;;  %v3547_v21 = vcombine.low %v377_v16, %v381_v18 }
  0x33   :  { %226 = vmatprep.mubr.bf16.mxu0 %v4716_v1  ;;  %733 = vmatpush1.bf16.msra.mxu0 %v3468_v39  ;;  %v380_v15 = vld [vmem:[#allocation5 + $0x1e0] sm:$0xff]  ;;  %v3549_v25 = vcombine.high %v377_v16, %v381_v18 }
  0x34   :  { %3009 = vmatmul.mubr.msk.bf16.gmra.mrb[4].mxu1 %vm148_vm1, %v3094_v33  ;;  %734 = vmatprep.subr.bf16.mxu0 %v3481_v45  ;;  %v3543_v17 = vcombine.high %v376_v14, %v380_v15  ;;  %v3545_v19 = vcombine.low %v376_v14, %v380_v15  ;;  %v3555_v33 = vcombine.high %v322_v26, %v326_v27  ;;  %v88_v44 = vld [vmem:[%s4705_s2] sm:$0xf] }
  0x35   :  { %299 = vmatprep.mubr.bf16.mxu1 %v4716_v1  ;;  %774 = vmatpush1.bf16.msra.mxu1 %v3470_v40  ;;  %v3578_v52 = vrot.slane %v88_v44, %v4714_v43  ;;  %v3582_v53 = vrot.slane %v88_v44, %v4713_v46  ;;  %v3588_v6 = vrot.slane %v88_v44, %v4712_v51  ;;  %v330_v43 = vld [vmem:[#allocation5 + $0x50] sm:$0xff] }
  0x36   :  { %775 = vmatprep.subr.bf16.mxu1 %v3487_v49  ;;  %4914 = vst [vmem:[#allocation13_spill] sm:$0xff] %v3555_v33 }
  0x37   :  { %735 = vmatpush1.bf16.msra.mxu0 %v3483_v47 }
  0x38   :  { %736 = vmatprep.subr.bf16.mxu0 %v3497_v54 }
  0x39   :  { %776 = vmatpush1.bf16.msra.mxu1 %v3485_v48 }
  0x3a   :  { %3005 = vmatmul.mubr.msk.bf16.gmra.mrb[8].mxu0 %vm148_vm1, %v3095_v50  ;;  %777 = vmatprep.subr.bf16.mxu1 %v3503_v58 }
  0x3b   :  { %236 = vmatprep.mubr.bf16.mxu0 %v4716_v1  ;;  %737 = vmatpush1.bf16.msra.mxu0 %v3499_v56 }
  0x3c   :  { %3010 = vmatmul.mubr.msk.bf16.gmra.mrb[8].mxu1 %vm148_vm1, %v3095_v50  ;;  %738 = vmatprep.subr.bf16.mxu0 %v3512_v62  ;;  %v3573_v50 = vrot.slane %v88_v44, %v4715_v42  ;;  %v331_v42 = vld [vmem:[#allocation5 + $0x58] sm:$0xff] }
  0x3d   :  { %309 = vmatprep.mubr.bf16.mxu1 %v4716_v1  ;;  %778 = vmatpush1.bf16.msra.mxu1 %v3501_v57 }
  0x3e   :  { %779 = vmatprep.subr.bf16.mxu1 %v3518_v3 }
  0x3f   :  { %739 = vmatpush1.bf16.msra.mxu0 %v3514_v0 }
  0x40   :  { %740 = vmatprep.subr.bf16.mxu0 %v3528_v9 }
  0x41   :  { %780 = vmatpush1.bf16.msra.mxu1 %v3516_v2 }
  0x42   :  { %3006 = vmatmul.mubr.msk.bf16.gmra.mrb[12].mxu0 %vm148_vm1, %v3096_v4  ;;  %781 = vmatprep.subr.bf16.mxu1 %v3534_v13 }
  0x43   :  { %760 = vmatprep.mubr.bf16.mxu0 %v4716_v1  ;;  %741 = vmatpush1.bf16.msra.mxu0 %v3530_v11 }
  0x44   :  { %3011 = vmatmul.mubr.msk.bf16.gmra.mrb[12].mxu1 %vm148_vm1, %v3096_v4  ;;  %742 = vmatprep.subr.bf16.mxu0 %v3543_v17 }
  0x45   :  { %801 = vmatprep.mubr.bf16.mxu1 %v4716_v1  ;;  %782 = vmatpush1.bf16.msra.mxu1 %v3532_v12  ;;  %v335_v1 = vld [vmem:[#allocation5 + $0x78] sm:$0xff] }
  0x46   :  { %783 = vmatprep.subr.bf16.mxu1 %v3549_v25 }
  0x47   :  { %743 = vmatpush1.bf16.msra.mxu0 %v3545_v19 }
  0x48   :  { %810 = vmatprep.subr.bf16.mxu0 %v3555_v33  ;;  %v4924_v33 = vmov 0  }
  0x49   :  { %784 = vmatpush1.bf16.msra.mxu1 %v3547_v21 }
  0x4a   :  { %851 = vmatprep.subr.bf16.mxu1 %v3561_v38 }
  0xfd   :  { %v208_v55 = vpop.f32.mrb[0].mxu0 }
  0xfe   :  { %v209_v59 = vadd.f32 %v208_v55, %v3573_v50  ;;  %v210_v60 = vpop.f32.mrb[1].mxu0 }
  0xff   :  { %v211_v61 = vadd.f32 %v210_v60, %v3578_v52  ;;  %v212_v63 = vpop.f32.mrb[2].mxu0  ;;  %v281_v4 = vpop.f32.mrb[0].mxu1 }
 0x100   :  { %v389_v7 = vmul.f32 0.5, %v209_v59  ;;  %v3591_v8 = vadd.f32 %v212_v63, %v3573_v50  ;;  %v214_v10 = vpop.f32.mrb[3].mxu0  ;;  %v282_v14 = vadd.f32 %v281_v4, %v3582_v53  ;;  %v283_v15 = vpop.f32.mrb[1].mxu1 }
 0x101   :  { %v393_v16 = vmul.f32 0.5, %v211_v61  ;;  %v3595_v18 = vadd.f32 %v214_v10, %v3578_v52  ;;  %v285_v26 = vpop.f32.mrb[2].mxu1  ;;  %v284_v44 = vadd.f32 %v283_v15, %v3588_v6 }
 0x102   :  { %3097 = vtanh.f32 %v389_v7  ;;  %v3598_v27 = vadd.f32 %v285_v26, %v3582_v53  ;;  %v287_v29 = vpop.f32.mrb[3].mxu1 }
 0x103   :  { %3099 = vtanh.f32 %v393_v16  ;;  %v3601_v34 = vadd.f32 %v287_v29, %v3588_v6  ;;  %v398_v55 = vmul.f32 0.5, %v284_v44  ;;  %v334_v44 = vld [vmem:[#allocation5 + $0x70] sm:$0xff] }
 0x104   :  { %3101 = vtanh.f32 %v282_v14 }
 0x105   :  { %3103 = vtanh.f32 %v398_v55  ;;  %v3609_v55 = vcombine.high %v330_v43, %v334_v44 }
 0x107   :  { %4918 = vst [vmem:[#allocation17_spill] sm:$0xff] %v3609_v55 }
 0x10c   :  { %v3098_v59 = vpop.eup %3097 }
 0x10d   :  { %v3100_v60 = vpop.eup %3099  ;;  %v391_v61 = vadd.f32 1.0, %v3098_v59 }
 0x10e   :  { %v3102_v63 = vpop.eup %3101  ;;  %v395_v4 = vadd.f32 1.0, %v3100_v60  ;;  %v3611_v60 = vcombine.high %v331_v42, %v335_v1 }
 0x10f   :  { %v392_v10 = vmul.f32 0.5, %v391_v61  ;;  %v3104_v16 = vpop.eup %3103  ;;  %v338_v61 = vld [vmem:[#allocation5 + $0x90] sm:$0xff] }
 0x110   :  { %v396_v7 = vmul.f32 0.5, %v395_v4  ;;  %v400_v29 = vadd.f32 1.0, %v3104_v16  ;;  %4919 = vst [vmem:[#allocation18_spill] sm:$0xff] %v3611_v60  ;;  %v343_v4 = vld [vmem:[#allocation5 + $0xb8] sm:$0xff] }
 0x111   :  { %v403_v51 = vmul.f32 %v3102_v63, %v392_v10  ;;  %v339_v63 = vld [vmem:[#allocation5 + $0x98] sm:$0xff]  ;;  %v3617_v10 = vcombine.low %v330_v43, %v334_v44 }
 0x112   :  { %v402_v26 = vmul.f32 0.0, %v396_v7  ;;  %v401_v14 = vmul.f32 0.5, %v400_v29  ;;  %v3619_v7 = vcombine.low %v331_v42, %v335_v1  ;;  %v3625_v16 = vcombine.high %v339_v63, %v343_v4  ;;  %v346_v29 = vld [vmem:[#allocation5 + $0xd0] sm:$0xff] }
 0x113   :  { %4920 = vst [vmem:[#allocation19_spill] sm:$0xff] %v3617_v10  ;;  %v3633_v42 = vcombine.low %v339_v63, %v343_v4 }
 0x114   :  { %v3604_v46 = vadd.f32 %v403_v51, %v402_v26  ;;  %v342_v51 = vld [vmem:[#allocation5 + $0xb0] sm:$0xff]  ;;  %4921 = vst [vmem:[#allocation20_spill] sm:$0xff] %v3619_v7  ;;  %4923 = vst [vmem:[#allocation22_spill] sm:$0xff] %v3625_v16 }
 0x115   :  { %v3623_v26 = vcombine.high %v338_v61, %v342_v51  ;;  %v3631_v1 = vcombine.low %v338_v61, %v342_v51  ;;  %4926 = vst [vmem:[#allocation24_spill] sm:$0xff] %v3633_v42 }
 0x116   :  { %3105 = vtanh.f32 %v3604_v46 }
 0x117   :  { %4922 = vst [vmem:[#allocation21_spill] sm:$0xff] %v3623_v26  ;;  %4925 = vst [vmem:[#allocation23_spill] sm:$0xff] %v3631_v1 }
 0x120   :  { %v3106_v15 = vpop.eup %3105 }
 0x121   :  { %v406_v59 = vmul.f32 %v3106_v15, %v401_v14  ;;  %v350_v14 = vld [vmem:[#allocation5 + $0xf0] sm:$0xff]  ;;  %v347_v15 = vld [vmem:[#allocation5 + $0xd8] sm:$0xff] }
 0x122   :  { %v3637_v43 = vcombine.high %v346_v29, %v350_v14  ;;  %v3643_v61 = vcombine.low %v346_v29, %v350_v14 }
 0x123   :  { %v3607_v38 = vpack.c.bf16 %v406_v59, %v406_v59  ;;  %v351_v59 = vld [vmem:[#allocation5 + $0xf8] sm:$0xff] }
 0x124   :  { %4927 = vst [vmem:[#allocation25_spill] sm:$0xff] %v3637_v43  ;;  %v3639_v44 = vcombine.high %v347_v15, %v351_v59  ;;  %4929 = vst [vmem:[#allocation27_spill] sm:$0xff] %v3643_v61  ;;  %v3645_v51 = vcombine.low %v347_v15, %v351_v59 }
 0x125   :  { %761 = vmatmul.mubr.bf16.vlgmr.msra.gmra.mrb[16].mxu0 %v3607_v38  ;;  %802 = vmatmul.mubr.bf16.vlgmr.msra.gmra.mrb[16].mxu1 %v3607_v38 }
 0x126   :  { %811 = vmatpush1.bf16.msra.mxu0 %v3557_v35  ;;  %852 = vmatpush1.bf16.msra.mxu1 %v3559_v36  ;;  %4928 = vst [vmem:[#allocation26_spill] sm:$0xff] %v3639_v44  ;;  %v355_v36 = vld [vmem:[#allocation5 + $0x118] sm:$0xff]  ;;  %4930 = vst [vmem:[#allocation28_spill] sm:$0xff] %v3645_v51 }
 0x127   :  { %812 = vmatprep.subr.bf16.mxu0 %v3609_v55  ;;  %853 = vmatprep.subr.bf16.mxu1 %v3611_v60  ;;  %v354_v60 = vld [vmem:[#allocation5 + $0x110] sm:$0xff]  ;;  %v359_v35 = vld [vmem:[#allocation5 + $0x138] sm:$0xff] }
 0x128   :  { %842 = vmatprep.mubr.bf16.mxu0 %v4924_v33  ;;  %883 = vmatprep.mubr.bf16.mxu1 %v4924_v33  ;;  %v358_v55 = vld [vmem:[#allocation5 + $0x130] sm:$0xff]  ;;  %v3651_v4 = vcombine.high %v355_v36, %v359_v35  ;;  %v3657_v14 = vcombine.low %v355_v36, %v359_v35 }
 0x129   :  { %v3649_v63 = vcombine.high %v354_v60, %v358_v55  ;;  %v3655_v29 = vcombine.low %v354_v60, %v358_v55 }
 0x12a   :  { %813 = vmatpush1.bf16.msra.mxu0 %v3617_v10  ;;  %854 = vmatpush1.bf16.msra.mxu1 %v3619_v7  ;;  %4932 = vst [vmem:[#allocation30_spill] sm:$0xff] %v3651_v4  ;;  %v363_v7 = vld [vmem:[#allocation5 + $0x158] sm:$0xff]  ;;  %4934 = vst [vmem:[#allocation32_spill] sm:$0xff] %v3657_v14 }
 0x12b   :  { %814 = vmatprep.subr.bf16.mxu0 %v3623_v26  ;;  %855 = vmatprep.subr.bf16.mxu1 %v3625_v16  ;;  %4931 = vst [vmem:[#allocation29_spill] sm:$0xff] %v3649_v63  ;;  %v362_v16 = vld [vmem:[#allocation5 + $0x150] sm:$0xff]  ;;  %v367_v10 = vld [vmem:[#allocation5 + $0x178] sm:$0xff]  ;;  %4933 = vst [vmem:[#allocation31_spill] sm:$0xff] %v3655_v29 }
 0x12c   :  { %v366_v26 = vld [vmem:[#allocation5 + $0x170] sm:$0xff]  ;;  %v3663_v59 = vcombine.high %v363_v7, %v367_v10  ;;  %v3669_v35 = vcombine.low %v363_v7, %v367_v10 }
 0x12d   :  { %v3661_v15 = vcombine.high %v362_v16, %v366_v26  ;;  %v3667_v55 = vcombine.low %v362_v16, %v366_v26 }
 0x12e   :  { %815 = vmatpush1.bf16.msra.mxu0 %v3631_v1  ;;  %856 = vmatpush1.bf16.msra.mxu1 %v3633_v42  ;;  %4936 = vst [vmem:[#allocation34_spill] sm:$0xff] %v3663_v59  ;;  %v371_v42 = vld [vmem:[#allocation5 + $0x198] sm:$0xff]  ;;  %4938 = vst [vmem:[#allocation36_spill] sm:$0xff] %v3669_v35 }
 0x12f   :  { %816 = vmatprep.subr.bf16.mxu0 %v3637_v43  ;;  %857 = vmatprep.subr.bf16.mxu1 %v3639_v44  ;;  %4935 = vst [vmem:[#allocation33_spill] sm:$0xff] %v3661_v15  ;;  %v370_v44 = vld [vmem:[#allocation5 + $0x190] sm:$0xff]  ;;  %v375_v1 = vld [vmem:[#allocation5 + $0x1b8] sm:$0xff]  ;;  %4937 = vst [vmem:[#allocation35_spill] sm:$0xff] %v3667_v55 }
 0x130   :  { %v374_v43 = vld [vmem:[#allocation5 + $0x1b0] sm:$0xff]  ;;  %v3675_v60 = vcombine.high %v371_v42, %v375_v1  ;;  %v3681_v10 = vcombine.low %v371_v42, %v375_v1  ;;  %v218_v1 = vpop.f32.mrb[4].mxu0 }
 0x131   :  { %v3673_v36 = vcombine.high %v370_v44, %v374_v43  ;;  %v3679_v26 = vcombine.low %v370_v44, %v374_v43  ;;  %v3702_v42 = vadd.f32 %v218_v1, %v3573_v50  ;;  %v220_v43 = vpop.f32.mrb[5].mxu0  ;;  %v291_v44 = vpop.f32.mrb[4].mxu1 }
 0x132   :  { %817 = vmatpush1.bf16.msra.mxu0 %v3643_v61  ;;  %858 = vmatpush1.bf16.msra.mxu1 %v3645_v51  ;;  %4940 = vst [vmem:[#allocation38_spill] sm:$0xff] %v3675_v60  ;;  %v379_v51 = vld [vmem:[#allocation5 + $0x1d8] sm:$0xff]  ;;  %4942 = vst [vmem:[#allocation40_spill] sm:$0xff] %v3681_v10 }
 0x133   :  { %818 = vmatprep.subr.bf16.mxu0 %v3649_v63  ;;  %859 = vmatprep.subr.bf16.mxu1 %v3651_v4  ;;  %4939 = vst [vmem:[#allocation37_spill] sm:$0xff] %v3673_v36  ;;  %v378_v4 = vld [vmem:[#allocation5 + $0x1d0] sm:$0xff]  ;;  %v383_v61 = vld [vmem:[#allocation5 + $0x1f8] sm:$0xff]  ;;  %4941 = vst [vmem:[#allocation39_spill] sm:$0xff] %v3679_v26 }
 0x134   :  { %v382_v63 = vld [vmem:[#allocation5 + $0x1f0] sm:$0xff]  ;;  %v3687_v16 = vcombine.high %v379_v51, %v383_v61  ;;  %4947 = vst [vmem:[#allocation45_spill] sm:$0xff] %v3702_v42 }
 0x135   :  { %v3685_v7 = vcombine.high %v378_v4, %v382_v63 }
 0x136   :  { %819 = vmatpush1.bf16.msra.mxu0 %v3655_v29  ;;  %860 = vmatpush1.bf16.msra.mxu1 %v3657_v14  ;;  %4944 = vst [vmem:[#allocation42_spill] sm:$0xff] %v3687_v16 }
 0x137   :  { %820 = vmatprep.subr.bf16.mxu0 %v3661_v15  ;;  %861 = vmatprep.subr.bf16.mxu1 %v3663_v59  ;;  %4943 = vst [vmem:[#allocation41_spill] sm:$0xff] %v3685_v7  ;;  %v3691_v59 = vcombine.low %v378_v4, %v382_v63  ;;  %v3708_v63 = vadd.f32 %v291_v44, %v3582_v53  ;;  %v293_v4 = vpop.f32.mrb[5].mxu1  ;;  %v4977_v15 = vsub.s32 3, %v3425_v5 }
 0x139   :  { %4945 = vst [vmem:[#allocation43_spill] sm:$0xff] %v3691_v59  ;;  %4949 = vst [vmem:[#allocation47_spill] sm:$0xff] %v3708_v63 }
 0x13a   :  { %821 = vmatpush1.bf16.msra.mxu0 %v3667_v55  ;;  %862 = vmatpush1.bf16.msra.mxu1 %v3669_v35  ;;  %v3693_v55 = vcombine.low %v379_v51, %v383_v61  ;;  %v3705_v61 = vadd.f32 %v220_v43, %v3578_v52  ;;  %v222_v51 = vpop.f32.mrb[6].mxu0 }
 0x13b   :  { %822 = vmatprep.subr.bf16.mxu0 %v3673_v36  ;;  %863 = vmatprep.subr.bf16.mxu1 %v3675_v60 }
 0x13c   :  { %4946 = vst [vmem:[#allocation44_spill] sm:$0xff] %v3693_v55  ;;  %4948 = vst [vmem:[#allocation46_spill] sm:$0xff] %v3705_v61 }
 0x13e   :  { %823 = vmatpush1.bf16.msra.mxu0 %v3679_v26  ;;  %864 = vmatpush1.bf16.msra.mxu1 %v3681_v10 }
 0x13f   :  { %824 = vmatprep.subr.bf16.mxu0 %v3685_v7  ;;  %865 = vmatprep.subr.bf16.mxu1 %v3687_v16  ;;  %v295_v16 = vpop.f32.mrb[6].mxu1 }
 0x140   :  { %v3720_v42 = vadd.f32 %v295_v16, %v3582_v53  ;;  %v297_v43 = vpop.f32.mrb[7].mxu1 }
 0x141   :  { %v3723_v61 = vadd.f32 %v297_v43, %v3588_v6 }
 0x142   :  { %825 = vmatpush1.bf16.msra.mxu0 %v3691_v59  ;;  %866 = vmatpush1.bf16.msra.mxu1 %v3693_v55  ;;  %v3711_v55 = vadd.f32 %v222_v51, %v3573_v50  ;;  %v224_v59 = vpop.f32.mrb[7].mxu0  ;;  %4953 = vst [vmem:[#allocation51_spill] sm:$0xff] %v3720_v42 }
 0x143   :  { %v3717_v1 = vadd.f32 %v224_v59, %v3578_v52  ;;  %4954 = vst [vmem:[#allocation52_spill] sm:$0xff] %v3723_v61  ;;  %v228_v44 = vpop.f32.mrb[8].mxu0 }
 0x144   :  { %4950 = vst [vmem:[#allocation48_spill] sm:$0xff] %v3711_v55  ;;  %v3726_v63 = vadd.f32 %v228_v44, %v3573_v50  ;;  %v230_v51 = vpop.f32.mrb[9].mxu0  ;;  %v301_v55 = vpop.f32.mrb[8].mxu1 }
 0x145   :  { %843 = vmatmul.mubr.bf16.vlgmr.msra.gmra.mrb[20].mxu0 %v3607_v38  ;;  %884 = vmatmul.mubr.bf16.vlgmr.msra.gmra.mrb[20].mxu1 %v3607_v38  ;;  %v3714_v38 = vadd.f32 %v293_v4, %v3588_v6  ;;  %4952 = vst [vmem:[#allocation50_spill] sm:$0xff] %v3717_v1  ;;  %v3729_v4 = vadd.f32 %v230_v51, %v3578_v52  ;;  %v303_v1 = vpop.f32.mrb[9].mxu1 }
 0x146   :  { %4955 = vst [vmem:[#allocation53_spill] sm:$0xff] %v3726_v63  ;;  %v3732_v59 = vadd.f32 %v301_v55, %v3582_v53  ;;  %v3738_v43 = vadd.f32 %v303_v1, %v3588_v6  ;;  %v305_v61 = vpop.f32.mrb[10].mxu1 }
 0x147   :  { %4951 = vst [vmem:[#allocation49_spill] sm:$0xff] %v3714_v38  ;;  %4956 = vst [vmem:[#allocation54_spill] sm:$0xff] %v3729_v4  ;;  %v232_v38 = vpop.f32.mrb[10].mxu0  ;;  %v3744_v63 = vadd.f32 %v305_v61, %v3582_v53  ;;  %v307_v51 = vpop.f32.mrb[11].mxu1 }
 0x148   :  { %4957 = vst [vmem:[#allocation55_spill] sm:$0xff] %v3732_v59  ;;  %v3735_v16 = vadd.f32 %v232_v38, %v3573_v50  ;;  %v234_v42 = vpop.f32.mrb[11].mxu0  ;;  %4959 = vst [vmem:[#allocation57_spill] sm:$0xff] %v3738_v43  ;;  %v3747_v4 = vadd.f32 %v307_v51, %v3588_v6 }
 0x149   :  { %v3741_v44 = vadd.f32 %v234_v42, %v3578_v52  ;;  %4961 = vst [vmem:[#allocation59_spill] sm:$0xff] %v3744_v63  ;;  %v238_v55 = vpop.f32.mrb[12].mxu0 }
 0x14a   :  { %4958 = vst [vmem:[#allocation56_spill] sm:$0xff] %v3735_v16  ;;  %4962 = vst [vmem:[#allocation60_spill] sm:$0xff] %v3747_v4  ;;  %v3750_v59 = vadd.f32 %v238_v55, %v3573_v50  ;;  %v240_v38 = vpop.f32.mrb[13].mxu0  ;;  %v311_v16 = vpop.f32.mrb[12].mxu1 }
 0x14b   :  { %4960 = vst [vmem:[#allocation58_spill] sm:$0xff] %v3741_v44  ;;  %v3753_v1 = vadd.f32 %v240_v38, %v3578_v52  ;;  %v242_v43 = vpop.f32.mrb[14].mxu0  ;;  %v3756_v42 = vadd.f32 %v311_v16, %v3582_v53  ;;  %v313_v44 = vpop.f32.mrb[13].mxu1 }
 0x14c   :  { %4963 = vst [vmem:[#allocation61_spill] sm:$0xff] %v3750_v59  ;;  %v3759_v61 = vadd.f32 %v242_v43, %v3573_v50  ;;  %v244_v63 = vpop.f32.mrb[15].mxu0  ;;  %v3762_v51 = vadd.f32 %v313_v44, %v3588_v6  ;;  %v315_v4 = vpop.f32.mrb[14].mxu1 }
 0x14d   :  { %4964 = vst [vmem:[#allocation62_spill] sm:$0xff] %v3753_v1  ;;  %4965 = vst [vmem:[#allocation63_spill] sm:$0xff] %v3756_v42  ;;  %v3765_v55 = vadd.f32 %v244_v63, %v3578_v52  ;;  %v3768_v59 = vadd.f32 %v315_v4, %v3582_v53  ;;  %v317_v38 = vpop.f32.mrb[15].mxu1  ;;  %v384_v53 = vld [vmem:[%s4707_s4] sm:$0xf]  ;;  %v4971_v63 = vsub.s32 0, %v3425_v5 }
 0x14e   :  { %4966 = vst [vmem:[#allocation64_spill] sm:$0xff] %v3759_v61  ;;  %4967 = vst [vmem:[#allocation65_spill] sm:$0xff] %v3762_v51  ;;  %v3771_v1 = vadd.f32 %v317_v38, %v3588_v6  ;;  %v4973_v4 = vsub.s32 1, %v3425_v5 }
 0x14f   :  { %4968 = vst [vmem:[#allocation66_spill] sm:$0xff] %v3765_v55  ;;  %4969 = vst [vmem:[#allocation67_spill] sm:$0xff] %v3768_v59  ;;  %v3786_v6 = vrot.slane %v384_v53, %v4971_v63 }
 0x150   :  { %4970 = vst [vmem:[#allocation68_spill] sm:$0xff] %v3771_v1  ;;  %v3790_v38 = vrot.slane %v384_v53, %v4973_v4 }
 0x151   :  { %4972 = vst [vmem:[#allocation69_spill] sm:$0xff] %v3786_v6 }
 0x152   :  { %4974 = vst [vmem:[#allocation70_spill] sm:$0xff] %v3790_v38 }
 0x1f8   :  { %v3773_v16 = vpop.f32.mrb[16].mxu0  ;;  %v3775_v42 = vpop.f32.mrb[16].mxu1 }
 0x1f9   :  { %v3777_v50 = vpop.f32.mrb[17].mxu0  ;;  %v3779_v43 = vpop.f32.mrb[17].mxu1 }
 0x1fa   :  { %v766_v44 = vpop.f32.mrb[18].mxu0  ;;  %v807_v61 = vpop.f32.mrb[18].mxu1 }
 0x1fb   :  { %v767_v51 = vpop.f32.mrb[19].mxu0  ;;  %v808_v52 = vpop.f32.mrb[19].mxu1  ;;  %v4975_v61 = vsub.s32 2, %v3425_v5 }
 0x1fd   :  { %v3795_v51 = vrot.slane %v384_v53, %v4975_v61 }
 0x1ff   :  { %4976 = vst [vmem:[#allocation71_spill] sm:$0xff] %v3795_v51 }
 0x218   :  { %v844_v1 = vpop.f32.mrb[20].mxu0  ;;  %v885_v59 = vpop.f32.mrb[20].mxu1 }
 0x219   :  { %v917_v55 = vadd.f32 %v3786_v6, %v844_v1  ;;  %v846_v44 = vpop.f32.mrb[21].mxu0  ;;  %v887_v52 = vpop.f32.mrb[21].mxu1  ;;  %v919_v4 = vadd.f32 %v3795_v51, %v885_v59  ;;  %v3801_v1 = vrot.slane %v384_v53, %v4977_v15 }
 0x21a   :  { %v918_v7 = vadd.f32 %v3790_v38, %v846_v44  ;;  %v848_v10 = vpop.f32.mrb[22].mxu0  ;;  %v889_v26 = vpop.f32.mrb[22].mxu1 }
 0x21b   :  { %v921_v63 = vmul.f32 0.5, %v917_v55  ;;  %v849_v60 = vpop.f32.mrb[23].mxu0  ;;  %v890_v36 = vpop.f32.mrb[23].mxu1  ;;  %4978 = vst [vmem:[#allocation72_spill] sm:$0xff] %v3801_v1  ;;  %v920_v61 = vadd.f32 %v3801_v1, %v887_v52 }
 0x21c   :  { %v925_v35 = vmul.f32 0.5, %v918_v7 }
 0x21d   :  { %3107 = vtanh.f32 %v921_v63  ;;  %v930_v6 = vmul.f32 0.5, %v920_v61 }
 0x21e   :  { %3109 = vtanh.f32 %v925_v35 }
 0x21f   :  { %3111 = vtanh.f32 %v919_v4 }
 0x220   :  { %3113 = vtanh.f32 %v930_v6 }
 0x227   :  { %v3108_v14 = vpop.eup %3107 }
 0x228   :  { %v3110_v44 = vpop.eup %3109  ;;  %v923_v10 = vadd.f32 1.0, %v3108_v14 }
 0x229   :  { %v927_v26 = vadd.f32 1.0, %v3110_v44  ;;  %v3112_v36 = vpop.eup %3111 }
 0x22a   :  { %v924_v60 = vmul.f32 0.5, %v923_v10  ;;  %v3114_v5 = vpop.eup %3113 }
 0x22b   :  { %v928_v7 = vmul.f32 0.5, %v927_v26  ;;  %v932_v15 = vadd.f32 1.0, %v3114_v5 }
 0x22c   :  { %v935_v55 = vmul.f32 %v3112_v36, %v924_v60 }
 0x22d   :  { %v934_v63 = vmul.f32 0.0, %v928_v7  ;;  %v933_v35 = vmul.f32 0.5, %v932_v15 }
 0x22f   :  { %v3804_v59 = vadd.f32 %v935_v55, %v934_v63 }
 0x231   :  { %4979 = vst [vmem:[#allocation73_spill] sm:$0xff] %v3804_v59  ;;  %3115 = vtanh.f32 %v3804_v59 }
 0x23b   :  { %v3116_v53 = vpop.eup %3115 }
 0x23c   :  { %v3807_v52 = vmul.f32 %v3116_v53, %v933_v35 }
 0x23d   :  { %3345 = dma.done.wait [#allocation3], 4096 }
 0x23e   :  { %3346 = vsyncadd [#allocation3], 4294963200  ;;  %1008 = vmatprep.mubr.bf16.mxu0 %v4924_v33  ;;  %1049 = vmatprep.mubr.bf16.mxu1 %v4924_v33  ;;  %v3811_v14 = vld [vmem:[#allocation2 + $0x8] sm:$0xff]  ;;  %v3813_v6 = vld [vmem:[#allocation2 + $0x18] sm:$0xff]  ;;  %v1058_v55 = vadd.f32 %v3773_v16, %v3591_v8  ;;  %v1059_v15 = vadd.f32 %v3777_v50, %v3595_v18  ;;  %vm2983_vm2 = vcmask 1024  }
 0x23f   :  { %4980 = vst [vmem:[#allocation74_spill] sm:$0xff] %v3811_v14  ;;  %4981 = vst [vmem:[#allocation75_spill] sm:$0xff] %v3813_v6  ;;  %v3815_v4 = vld [vmem:[#allocation2] sm:$0xff]  ;;  %976 = vmatprep.subr.bf16.mxu0 %v3811_v14  ;;  %1017 = vmatprep.subr.bf16.mxu1 %v3813_v6  ;;  %v3819_v61 = vld [vmem:[#allocation2 + $0x10] sm:$0xff] }
 0x240   :  { %4982 = vst [vmem:[#allocation76_spill] sm:$0xff] %v3815_v4  ;;  %4983 = vst [vmem:[#allocation77_spill] sm:$0xff] %v3819_v61  ;;  %v3821_v44 = vld [vmem:[#allocation2 + $0x28] sm:$0xff]  ;;  %v3823_v10 = vld [vmem:[#allocation2 + $0x38] sm:$0xff]  ;;  %977 = vmatpush1.bf16.msra.mxu0 %v3815_v4  ;;  %1018 = vmatpush1.bf16.msra.mxu1 %v3819_v61  ;;  %v1062_v8 = vmul.f32 0.5, %v1058_v55  ;;  %v1066_v1 = vmul.f32 0.5, %v1059_v15 }
 0x241   :  { %4984 = vst [vmem:[#allocation78_spill] sm:$0xff] %v3821_v44  ;;  %4985 = vst [vmem:[#allocation79_spill] sm:$0xff] %v3823_v10  ;;  %978 = vmatprep.subr.bf16.mxu0 %v3821_v44  ;;  %1019 = vmatprep.subr.bf16.mxu1 %v3823_v10  ;;  %v3829_v26 = vld [vmem:[#allocation2 + $0x20] sm:$0xff]  ;;  %v3831_v60 = vld [vmem:[#allocation2 + $0x30] sm:$0xff] }
 0x242   :  { %4986 = vst [vmem:[#allocation80_spill] sm:$0xff] %v3829_v26  ;;  %4987 = vst [vmem:[#allocation81_spill] sm:$0xff] %v3831_v60  ;;  %v3833_v36 = vld [vmem:[#allocation2 + $0x48] sm:$0xff]  ;;  %v3835_v7 = vld [vmem:[#allocation2 + $0x58] sm:$0xff]  ;;  %3117 = vtanh.f32 %v1062_v8 }
 0x243   :  { %4988 = vst [vmem:[#allocation82_spill] sm:$0xff] %v3833_v36  ;;  %4989 = vst [vmem:[#allocation83_spill] sm:$0xff] %v3835_v7  ;;  %v3843_v63 = vld [vmem:[#allocation2 + $0x40] sm:$0xff]  ;;  %v3845_v5 = vld [vmem:[#allocation2 + $0x50] sm:$0xff]  ;;  %3119 = vtanh.f32 %v1066_v1 }
 0x244   :  { %979 = vmatpush1.bf16.msra.mxu0 %v3829_v26  ;;  %1020 = vmatpush1.bf16.msra.mxu1 %v3831_v60  ;;  %4990 = vst [vmem:[#allocation84_spill] sm:$0xff] %v3843_v63  ;;  %4991 = vst [vmem:[#allocation85_spill] sm:$0xff] %v3845_v5  ;;  %v3849_v35 = vld [vmem:[#allocation2 + $0x68] sm:$0xff]  ;;  %v3851_v53 = vld [vmem:[#allocation2 + $0x78] sm:$0xff] }
 0x245   :  { %980 = vmatprep.subr.bf16.mxu0 %v3833_v36  ;;  %1021 = vmatprep.subr.bf16.mxu1 %v3835_v7  ;;  %4992 = vst [vmem:[#allocation86_spill] sm:$0xff] %v3849_v35  ;;  %4993 = vst [vmem:[#allocation87_spill] sm:$0xff] %v3851_v53  ;;  %v3857_v16 = vld [vmem:[#allocation2 + $0x60] sm:$0xff]  ;;  %v3859_v59 = vld [vmem:[#allocation2 + $0x70] sm:$0xff] }
 0x246   :  { %4994 = vst [vmem:[#allocation88_spill] sm:$0xff] %v3857_v16  ;;  %4995 = vst [vmem:[#allocation89_spill] sm:$0xff] %v3859_v59  ;;  %v3861_v51 = vld [vmem:[#allocation2 + $0x88] sm:$0xff]  ;;  %v3863_v18 = vld [vmem:[#allocation2 + $0x98] sm:$0xff] }
 0x247   :  { %4996 = vst [vmem:[#allocation90_spill] sm:$0xff] %v3861_v51  ;;  %4997 = vst [vmem:[#allocation91_spill] sm:$0xff] %v3863_v18  ;;  %v3869_v50 = vld [vmem:[#allocation2 + $0x80] sm:$0xff]  ;;  %v3871_v55 = vld [vmem:[#allocation2 + $0x90] sm:$0xff] }
 0x248   :  { %981 = vmatpush1.bf16.msra.mxu0 %v3843_v63  ;;  %1022 = vmatpush1.bf16.msra.mxu1 %v3845_v5  ;;  %4998 = vst [vmem:[#allocation92_spill] sm:$0xff] %v3869_v50  ;;  %4999 = vst [vmem:[#allocation93_spill] sm:$0xff] %v3871_v55  ;;  %v3873_v38 = vld [vmem:[#allocation2 + $0xa8] sm:$0xff]  ;;  %v3875_v15 = vld [vmem:[#allocation2 + $0xb8] sm:$0xff] }
 0x249   :  { %982 = vmatprep.subr.bf16.mxu0 %v3849_v35  ;;  %1023 = vmatprep.subr.bf16.mxu1 %v3851_v53  ;;  %5000 = vst [vmem:[#allocation94_spill] sm:$0xff] %v3873_v38  ;;  %5001 = vst [vmem:[#allocation95_spill] sm:$0xff] %v3875_v15  ;;  %v3881_v8 = vld [vmem:[#allocation2 + $0xa0] sm:$0xff]  ;;  %v3887_v1 = vld [vmem:[#allocation2 + $0xc8] sm:$0xff] }
 0x24a   :  { %5002 = vst [vmem:[#allocation96_spill] sm:$0xff] %v3881_v8  ;;  %5004 = vst [vmem:[#allocation98_spill] sm:$0xff] %v3887_v1 }
 0x24c   :  { %983 = vmatpush1.bf16.msra.mxu0 %v3857_v16  ;;  %1024 = vmatpush1.bf16.msra.mxu1 %v3859_v59  ;;  %v3889_v59 = vld [vmem:[#allocation2 + $0xd8] sm:$0xff]  ;;  %v975_v16 = vpack.c.bf16 %v3807_v52, %v3807_v52 }
 0x24d   :  { %984 = vmatprep.subr.bf16.mxu0 %v3861_v51  ;;  %1025 = vmatprep.subr.bf16.mxu1 %v3863_v18  ;;  %v3883_v18 = vld [vmem:[#allocation2 + $0xb0] sm:$0xff]  ;;  %v1060_v51 = vadd.f32 %v3775_v42, %v3598_v27  ;;  %5005 = vst [vmem:[#allocation99_spill] sm:$0xff] %v3889_v59  ;;  %v3901_v27 = vld [vmem:[#allocation2 + $0xf8] sm:$0xff] }
 0x24e   :  { %5003 = vst [vmem:[#allocation97_spill] sm:$0xff] %v3883_v18  ;;  %5009 = vst [vmem:[#allocation103_spill] sm:$0xff] %v3901_v27 }
 0x24f   :  { %3121 = vtanh.f32 %v1060_v51  ;;  %v1061_v51 = vadd.f32 %v3779_v43, %v3601_v34 }
 0x250   :  { %985 = vmatpush1.bf16.msra.mxu0 %v3869_v50  ;;  %1026 = vmatpush1.bf16.msra.mxu1 %v3871_v55  ;;  %v3118_v55 = vpop.eup %3117  ;;  %v3899_v50 = vld [vmem:[#allocation2 + $0xe8] sm:$0xff] }
 0x251   :  { %986 = vmatprep.subr.bf16.mxu0 %v3873_v38  ;;  %1027 = vmatprep.subr.bf16.mxu1 %v3875_v15  ;;  %v3895_v15 = vld [vmem:[#allocation2 + $0xc0] sm:$0xff]  ;;  %v3897_v38 = vld [vmem:[#allocation2 + $0xd0] sm:$0xff]  ;;  %5008 = vst [vmem:[#allocation102_spill] sm:$0xff] %v3899_v50  ;;  %v3120_v42 = vpop.eup %3119 }
 0x252   :  { %5006 = vst [vmem:[#allocation100_spill] sm:$0xff] %v3895_v15  ;;  %5007 = vst [vmem:[#allocation101_spill] sm:$0xff] %v3897_v38 }
 0x254   :  { %987 = vmatpush1.bf16.msra.mxu0 %v3881_v8  ;;  %1028 = vmatpush1.bf16.msra.mxu1 %v3883_v18  ;;  %v1064_v18 = vadd.f32 1.0, %v3118_v55  ;;  %v1068_v8 = vadd.f32 1.0, %v3120_v42  ;;  %v5015_v42 = vld [vmem:[#allocation15_spill] sm:$0xff] }
 0x255   :  { %988 = vmatprep.subr.bf16.mxu0 %v3887_v1  ;;  %1029 = vmatprep.subr.bf16.mxu1 %v3889_v59  ;;  %v3907_v59 = vld [vmem:[#allocation2 + $0xe0] sm:$0xff]  ;;  %v3909_v1 = vld [vmem:[#allocation2 + $0xf0] sm:$0xff] }
 0x256   :  { %5010 = vst [vmem:[#allocation104_spill] sm:$0xff] %v3907_v59  ;;  %5011 = vst [vmem:[#allocation105_spill] sm:$0xff] %v3909_v1 }
 0x258   :  { %989 = vmatpush1.bf16.msra.mxu0 %v3895_v15  ;;  %1030 = vmatpush1.bf16.msra.mxu1 %v3897_v38  ;;  %v1071_v38 = vmul.f32 0.5, %v1061_v51  ;;  %v5016_v51 = vld [vmem:[#allocation17_spill] sm:$0xff] }
 0x259   :  { %990 = vmatprep.subr.bf16.mxu0 %v3899_v50  ;;  %1031 = vmatprep.subr.bf16.mxu1 %v3901_v27  ;;  %v1065_v27 = vmul.f32 0.5, %v1064_v18  ;;  %v1069_v50 = vmul.f32 0.5, %v1068_v8  ;;  %v3122_v15 = vpop.eup %3121  ;;  %v5013_v8 = vld [vmem:[#allocation16_spill] sm:$0xff] }
 0x25a   :  { %3123 = vtanh.f32 %v1071_v38 }
 0x25b   :  { %v1075_v34 = vmul.f32 %v1069_v50, %v3604_v46  ;;  %v1076_v43 = vmul.f32 %v3122_v15, %v1065_v27  ;;  %v5012_v15 = vld [vmem:[#allocation13_spill] sm:$0xff]  ;;  %v5014_v27 = vld [vmem:[#allocation14_spill] sm:$0xff] }
 0x25c   :  { %991 = vmatpush1.bf16.msra.mxu0 %v3907_v59  ;;  %1032 = vmatpush1.bf16.msra.mxu1 %v3909_v1 }
 0x25d   :  { %1081 = vmatprep.subr.bf16.mxu0 %v3438_v20  ;;  %1122 = vmatprep.subr.bf16.mxu1 %v3444_v24  ;;  %v3930_v52 = vadd.f32 %v1076_v43, %v1075_v34  ;;  %v5017_v34 = vld [vmem:[#allocation18_spill] sm:$0xff]  ;;  %v5018_v43 = vld [vmem:[#allocation19_spill] sm:$0xff] }
 0x25f   :  { %1009 = vmatmul.mubr.bf16.vlgmr.msra.gmra.mrb[24].mxu0 %v975_v16  ;;  %1050 = vmatmul.mubr.bf16.vlgmr.msra.gmra.mrb[24].mxu1 %v975_v16  ;;  %3125 = vtanh.f32 %v3930_v52 }
 0x260   :  { %1082 = vmatpush1.bf16.msra.mxu0 %v3440_v22  ;;  %1123 = vmatpush1.bf16.msra.mxu1 %v3442_v23 }
 0x261   :  { %1083 = vmatprep.subr.bf16.mxu0 %v3450_v28  ;;  %1124 = vmatprep.subr.bf16.mxu1 %v3456_v32 }
 0x262   :  { %1113 = vmatprep.mubr.bf16.mxu0 %v4924_v33  ;;  %1154 = vmatprep.mubr.bf16.mxu1 %v4924_v33 }
 0x264   :  { %1084 = vmatpush1.bf16.msra.mxu0 %v3452_v30  ;;  %1125 = vmatpush1.bf16.msra.mxu1 %v3454_v31  ;;  %v3124_v46 = vpop.eup %3123 }
 0x265   :  { %1085 = vmatprep.subr.bf16.mxu0 %v3466_v37  ;;  %1126 = vmatprep.subr.bf16.mxu1 %v3472_v41  ;;  %v1073_v38 = vadd.f32 1.0, %v3124_v46  ;;  %v5019_v46 = vld [vmem:[#allocation20_spill] sm:$0xff] }
 0x267   :  { %v1074_v16 = vmul.f32 0.5, %v1073_v38  ;;  %v5020_v38 = vld [vmem:[#allocation21_spill] sm:$0xff] }
 0x268   :  { %1086 = vmatpush1.bf16.msra.mxu0 %v3468_v39  ;;  %1127 = vmatpush1.bf16.msra.mxu1 %v3470_v40 }
 0x269   :  { %1087 = vmatprep.subr.bf16.mxu0 %v3481_v45  ;;  %1128 = vmatprep.subr.bf16.mxu1 %v3487_v49  ;;  %v3126_v18 = vpop.eup %3125 }
 0x26a   :  { %v1079_v50 = vmul.f32 %v3126_v18, %v1074_v16  ;;  %v5021_v16 = vld [vmem:[#allocation22_spill] sm:$0xff]  ;;  %v5022_v18 = vld [vmem:[#allocation23_spill] sm:$0xff] }
 0x26c   :  { %1088 = vmatpush1.bf16.msra.mxu0 %v3483_v47  ;;  %1129 = vmatpush1.bf16.msra.mxu1 %v3485_v48  ;;  %v1080_v55 = vpack.c.bf16 %v1079_v50, %v1079_v50  ;;  %v5023_v50 = vld [vmem:[#allocation24_spill] sm:$0xff] }
 0x26d   :  { %1089 = vmatprep.subr.bf16.mxu0 %v3497_v54  ;;  %1130 = vmatprep.subr.bf16.mxu1 %v3503_v58 }
 0x270   :  { %1090 = vmatpush1.bf16.msra.mxu0 %v3499_v56  ;;  %1131 = vmatpush1.bf16.msra.mxu1 %v3501_v57 }
 0x271   :  { %1091 = vmatprep.subr.bf16.mxu0 %v3512_v62  ;;  %1132 = vmatprep.subr.bf16.mxu1 %v3518_v3 }
 0x274   :  { %1092 = vmatpush1.bf16.msra.mxu0 %v3514_v0  ;;  %1133 = vmatpush1.bf16.msra.mxu1 %v3516_v2 }
 0x275   :  { %1093 = vmatprep.subr.bf16.mxu0 %v3528_v9  ;;  %1134 = vmatprep.subr.bf16.mxu1 %v3534_v13 }
 0x278   :  { %1094 = vmatpush1.bf16.msra.mxu0 %v3530_v11  ;;  %1135 = vmatpush1.bf16.msra.mxu1 %v3532_v12 }
 0x279   :  { %1095 = vmatprep.subr.bf16.mxu0 %v3543_v17  ;;  %1136 = vmatprep.subr.bf16.mxu1 %v3549_v25 }
 0x27c   :  { %1096 = vmatpush1.bf16.msra.mxu0 %v3545_v19  ;;  %1137 = vmatpush1.bf16.msra.mxu1 %v3547_v21 }
 0x27d   :  { %1163 = vmatprep.subr.bf16.mxu0 %v5012_v15  ;;  %1204 = vmatprep.subr.bf16.mxu1 %v5013_v8  ;;  %v5028_v8 = vld [vmem:[#allocation29_spill] sm:$0xff] }
 0x27f   :  { %1114 = vmatmul.mubr.bf16.vlgmr.msra.gmra.mrb[28].mxu0 %v1080_v55  ;;  %1155 = vmatmul.mubr.bf16.vlgmr.msra.gmra.mrb[28].mxu1 %v1080_v55 }
 0x280   :  { %1164 = vmatpush1.bf16.msra.mxu0 %v5014_v27  ;;  %1205 = vmatpush1.bf16.msra.mxu1 %v5015_v42  ;;  %v5024_v42 = vld [vmem:[#allocation25_spill] sm:$0xff]  ;;  %v5027_v27 = vld [vmem:[#allocation28_spill] sm:$0xff] }
 0x281   :  { %1165 = vmatprep.subr.bf16.mxu0 %v5016_v51  ;;  %1206 = vmatprep.subr.bf16.mxu1 %v5017_v34  ;;  %v5025_v51 = vld [vmem:[#allocation26_spill] sm:$0xff]  ;;  %v5026_v34 = vld [vmem:[#allocation27_spill] sm:$0xff] }
 0x282   :  { %1195 = vmatprep.mubr.bf16.mxu0 %v4924_v33  ;;  %1236 = vmatprep.mubr.bf16.mxu1 %v4924_v33 }
 0x284   :  { %1166 = vmatpush1.bf16.msra.mxu0 %v5018_v43  ;;  %1207 = vmatpush1.bf16.msra.mxu1 %v5019_v46  ;;  %v5029_v43 = vld [vmem:[#allocation30_spill] sm:$0xff] }
 0x285   :  { %1167 = vmatprep.subr.bf16.mxu0 %v5020_v38  ;;  %1208 = vmatprep.subr.bf16.mxu1 %v5021_v16  ;;  %v5030_v38 = vld [vmem:[#allocation32_spill] sm:$0xff]  ;;  %v5031_v16 = vld [vmem:[#allocation33_spill] sm:$0xff] }
 0x288   :  { %1168 = vmatpush1.bf16.msra.mxu0 %v5022_v18  ;;  %1209 = vmatpush1.bf16.msra.mxu1 %v5023_v50  ;;  %v5032_v18 = vld [vmem:[#allocation34_spill] sm:$0xff]  ;;  %v5033_v50 = vld [vmem:[#allocation35_spill] sm:$0xff] }
 0x289   :  { %1169 = vmatprep.subr.bf16.mxu0 %v5024_v42  ;;  %1210 = vmatprep.subr.bf16.mxu1 %v5025_v51  ;;  %v5034_v42 = vld [vmem:[#allocation36_spill] sm:$0xff]  ;;  %v5035_v51 = vld [vmem:[#allocation37_spill] sm:$0xff] }
 0x28c   :  { %1170 = vmatpush1.bf16.msra.mxu0 %v5026_v34  ;;  %1211 = vmatpush1.bf16.msra.mxu1 %v5027_v27  ;;  %v5036_v34 = vld [vmem:[#allocation38_spill] sm:$0xff]  ;;  %v5037_v27 = vld [vmem:[#allocation39_spill] sm:$0xff] }
 0x28d   :  { %1171 = vmatprep.subr.bf16.mxu0 %v5028_v8  ;;  %1212 = vmatprep.subr.bf16.mxu1 %v5029_v43  ;;  %v5038_v8 = vld [vmem:[#allocation40_spill] sm:$0xff]  ;;  %v5039_v43 = vld [vmem:[#allocation41_spill] sm:$0xff] }
 0x290   :  { %1172 = vmatpush1.bf16.msra.mxu0 %v3655_v29  ;;  %1213 = vmatpush1.bf16.msra.mxu1 %v5030_v38  ;;  %v5040_v29 = vld [vmem:[#allocation42_spill] sm:$0xff]  ;;  %v5041_v38 = vld [vmem:[#allocation43_spill] sm:$0xff] }
 0x291   :  { %1173 = vmatprep.subr.bf16.mxu0 %v5031_v16  ;;  %1214 = vmatprep.subr.bf16.mxu1 %v5032_v18  ;;  %v5042_v16 = vld [vmem:[#allocation44_spill] sm:$0xff] }
 0x294   :  { %1174 = vmatpush1.bf16.msra.mxu0 %v5033_v50  ;;  %1215 = vmatpush1.bf16.msra.mxu1 %v5034_v42 }
 0x295   :  { %1175 = vmatprep.subr.bf16.mxu0 %v5035_v51  ;;  %1216 = vmatprep.subr.bf16.mxu1 %v5036_v34 }
 0x298   :  { %1176 = vmatpush1.bf16.msra.mxu0 %v5037_v27  ;;  %1217 = vmatpush1.bf16.msra.mxu1 %v5038_v8 }
 0x299   :  { %1177 = vmatprep.subr.bf16.mxu0 %v5039_v43  ;;  %1218 = vmatprep.subr.bf16.mxu1 %v5040_v29 }
 0x29c   :  { %1178 = vmatpush1.bf16.msra.mxu0 %v5041_v38  ;;  %1219 = vmatpush1.bf16.msra.mxu1 %v5042_v16  ;;  %v5061_v38 = vld [vmem:[#allocation47_spill] sm:$0xff] }
 0x29d   :  { %1272 = vmatprep.subr.bf16.mxu0 %v3811_v14  ;;  %1313 = vmatprep.subr.bf16.mxu1 %v3813_v6  ;;  %v5060_v6 = vld [vmem:[#allocation46_spill] sm:$0xff] }
 0x29f   :  { %1196 = vmatmul.mubr.bf16.vlgmr.msra.gmra.mrb[32].mxu0 %v1080_v55  ;;  %1237 = vmatmul.mubr.bf16.vlgmr.msra.gmra.mrb[32].mxu1 %v1080_v55  ;;  %v5043_v55 = vld [vmem:[#allocation88_spill] sm:$0xff] }
 0x2a0   :  { %1273 = vmatpush1.bf16.msra.mxu0 %v3815_v4  ;;  %1314 = vmatpush1.bf16.msra.mxu1 %v3819_v61  ;;  %v5059_v61 = vld [vmem:[#allocation45_spill] sm:$0xff] }
 0x2a1   :  { %1274 = vmatprep.subr.bf16.mxu0 %v3821_v44  ;;  %1315 = vmatprep.subr.bf16.mxu1 %v3823_v10  ;;  %v5044_v10 = vld [vmem:[#allocation89_spill] sm:$0xff]  ;;  %v5045_v44 = vld [vmem:[#allocation90_spill] sm:$0xff] }
 0x2a2   :  { %1304 = vmatprep.mubr.bf16.mxu0 %v4924_v33  ;;  %1345 = vmatprep.mubr.bf16.mxu1 %v4924_v33 }
 0x2a4   :  { %1275 = vmatpush1.bf16.msra.mxu0 %v3829_v26  ;;  %1316 = vmatpush1.bf16.msra.mxu1 %v3831_v60  ;;  %v5046_v26 = vld [vmem:[#allocation91_spill] sm:$0xff]  ;;  %v5047_v60 = vld [vmem:[#allocation92_spill] sm:$0xff] }
 0x2a5   :  { %1276 = vmatprep.subr.bf16.mxu0 %v3833_v36  ;;  %1317 = vmatprep.subr.bf16.mxu1 %v3835_v7  ;;  %v5048_v36 = vld [vmem:[#allocation93_spill] sm:$0xff]  ;;  %v5049_v7 = vld [vmem:[#allocation94_spill] sm:$0xff] }
 0x2a8   :  { %1277 = vmatpush1.bf16.msra.mxu0 %v3843_v63  ;;  %1318 = vmatpush1.bf16.msra.mxu1 %v3845_v5  ;;  %v5050_v63 = vld [vmem:[#allocation95_spill] sm:$0xff]  ;;  %v5051_v5 = vld [vmem:[#allocation96_spill] sm:$0xff] }
 0x2a9   :  { %1278 = vmatprep.subr.bf16.mxu0 %v3849_v35  ;;  %1319 = vmatprep.subr.bf16.mxu1 %v3851_v53  ;;  %v5052_v35 = vld [vmem:[#allocation97_spill] sm:$0xff]  ;;  %v5053_v53 = vld [vmem:[#allocation98_spill] sm:$0xff] }
 0x2ac   :  { %1279 = vmatpush1.bf16.msra.mxu0 %v5043_v55  ;;  %1320 = vmatpush1.bf16.msra.mxu1 %v5044_v10  ;;  %v5054_v55 = vld [vmem:[#allocation99_spill] sm:$0xff]  ;;  %v5055_v10 = vld [vmem:[#allocation100_spill] sm:$0xff] }
 0x2ad   :  { %1280 = vmatprep.subr.bf16.mxu0 %v5045_v44  ;;  %1321 = vmatprep.subr.bf16.mxu1 %v5046_v26  ;;  %v5056_v44 = vld [vmem:[#allocation101_spill] sm:$0xff]  ;;  %v5057_v26 = vld [vmem:[#allocation102_spill] sm:$0xff] }
 0x2b0   :  { %1281 = vmatpush1.bf16.msra.mxu0 %v5047_v60  ;;  %1322 = vmatpush1.bf16.msra.mxu1 %v5048_v36  ;;  %v5058_v60 = vld [vmem:[#allocation103_spill] sm:$0xff] }
 0x2b1   :  { %1282 = vmatprep.subr.bf16.mxu0 %v5049_v7  ;;  %1323 = vmatprep.subr.bf16.mxu1 %v5050_v63 }
 0x2b4   :  { %1283 = vmatpush1.bf16.msra.mxu0 %v5051_v5  ;;  %1324 = vmatpush1.bf16.msra.mxu1 %v5052_v35 }
 0x2b5   :  { %1284 = vmatprep.subr.bf16.mxu0 %v5053_v53  ;;  %1325 = vmatprep.subr.bf16.mxu1 %v5054_v55 }
 0x2b8   :  { %1285 = vmatpush1.bf16.msra.mxu0 %v5055_v10  ;;  %1326 = vmatpush1.bf16.msra.mxu1 %v5056_v44 }
 0x2b9   :  { %1286 = vmatprep.subr.bf16.mxu0 %v5057_v26  ;;  %1327 = vmatprep.subr.bf16.mxu1 %v5058_v60 }
 0x2bc   :  { %1287 = vmatpush1.bf16.msra.mxu0 %v3907_v59  ;;  %1328 = vmatpush1.bf16.msra.mxu1 %v3909_v1 }
 0x2bd   :  { %1377 = vmatprep.subr.bf16.mxu0 %v3438_v20  ;;  %1418 = vmatprep.subr.bf16.mxu1 %v3444_v24 }
 0x332   :  { %v1010_v35 = vpop.f32.mrb[24].mxu0  ;;  %v1051_v53 = vpop.f32.mrb[24].mxu1 }
 0x333   :  { %v1012_v5 = vpop.f32.mrb[25].mxu0  ;;  %v1053_v55 = vpop.f32.mrb[25].mxu1 }
 0x334   :  { %v1014_v63 = vpop.f32.mrb[26].mxu0  ;;  %v1055_v10 = vpop.f32.mrb[26].mxu1 }
 0x335   :  { %v1015_v7 = vpop.f32.mrb[27].mxu0  ;;  %v1056_v44 = vpop.f32.mrb[27].mxu1 }
 0x352   :  { %v1115_v36 = vpop.f32.mrb[28].mxu0  ;;  %v1156_v26 = vpop.f32.mrb[28].mxu1 }
 0x353   :  { %v1354_v60 = vadd.f32 %v1115_v36, %v5059_v61  ;;  %v1117_v4 = vpop.f32.mrb[29].mxu0  ;;  %v1158_v59 = vpop.f32.mrb[29].mxu1  ;;  %v1356_v29 = vadd.f32 %v1156_v26, %v5061_v38 }
 0x354   :  { %v1355_v1 = vadd.f32 %v1117_v4, %v5060_v6  ;;  %v1119_v14 = vpop.f32.mrb[30].mxu0  ;;  %v1160_v20 = vpop.f32.mrb[30].mxu1 }
 0x355   :  { %v1358_v16 = vmul.f32 0.5, %v1354_v60  ;;  %v1120_v24 = vpop.f32.mrb[31].mxu0  ;;  %v1161_v43 = vpop.f32.mrb[31].mxu1 }
 0x356   :  { %v1362_v8 = vmul.f32 0.5, %v1355_v1 }
 0x357   :  { %3127 = vtanh.f32 %v1358_v16  ;;  %v5062_v16 = vld [vmem:[#allocation69_spill] sm:$0xff] }
 0x358   :  { %3129 = vtanh.f32 %v1362_v8 }
 0x359   :  { %3131 = vtanh.f32 %v1356_v29 }
 0x361   :  { %v3128_v44 = vpop.eup %3127 }
 0x362   :  { %v3130_v10 = vpop.eup %3129  ;;  %v1360_v7 = vadd.f32 1.0, %v3128_v44 }
 0x363   :  { %v3132_v63 = vpop.eup %3131  ;;  %v1364_v61 = vadd.f32 1.0, %v3130_v10 }
 0x364   :  { %v1361_v36 = vmul.f32 0.5, %v1360_v7 }
 0x365   :  { %v1365_v27 = vmul.f32 0.5, %v1364_v61  ;;  %v5063_v61 = vld [vmem:[#allocation70_spill] sm:$0xff] }
 0x366   :  { %v1372_v34 = vmul.f32 %v3132_v63, %v1361_v36 }
 0x367   :  { %v1371_v14 = vmul.f32 %v1365_v27, %v3930_v52  ;;  %v5064_v27 = vld [vmem:[#allocation71_spill] sm:$0xff] }
 0x369   :  { %v4029_v20 = vadd.f32 %v1372_v34, %v1371_v14 }
 0x372   :  { %v1197_v24 = vpop.f32.mrb[32].mxu0  ;;  %v1238_v6 = vpop.f32.mrb[32].mxu1 }
 0x373   :  { %v1245_v4 = vadd.f32 %v1197_v24, %v1010_v35  ;;  %v1247_v26 = vadd.f32 %v1238_v6, %v1051_v53  ;;  %v1199_v60 = vpop.f32.mrb[33].mxu0  ;;  %v1240_v1 = vpop.f32.mrb[33].mxu1  ;;  %v5065_v35 = vld [vmem:[#allocation72_spill] sm:$0xff] }
 0x374   :  { %v1246_v8 = vadd.f32 %v1199_v60, %v1012_v5  ;;  %v1248_v29 = vadd.f32 %v1240_v1, %v1053_v55  ;;  %v1201_v43 = vpop.f32.mrb[34].mxu0  ;;  %v1242_v38 = vpop.f32.mrb[34].mxu1 }
 0x375   :  { %v1249_v44 = vadd.f32 %v1245_v4, %v5062_v16  ;;  %v1202_v10 = vpop.f32.mrb[35].mxu0  ;;  %v1243_v7 = vpop.f32.mrb[35].mxu1  ;;  %v1251_v34 = vadd.f32 %v1247_v26, %v5064_v27 }
 0x376   :  { %v1250_v63 = vadd.f32 %v1246_v8, %v5063_v61  ;;  %v1252_v53 = vadd.f32 %v1248_v29, %v5065_v35  ;;  %v5066_v8 = vld [vmem:[#allocation73_spill] sm:$0xff] }
 0x377   :  { %v1253_v36 = vmul.f32 0.5, %v1249_v44 }
 0x378   :  { %v1257_v52 = vmul.f32 0.5, %v1250_v63  ;;  %v1262_v14 = vmul.f32 0.5, %v1252_v53 }
 0x379   :  { %3133 = vtanh.f32 %v1253_v36 }
 0x37a   :  { %3135 = vtanh.f32 %v1257_v52  ;;  %v5067_v52 = vld [vmem:[#allocation49_spill] sm:$0xff] }
 0x37b   :  { %3137 = vtanh.f32 %v1251_v34  ;;  %v1357_v34 = vadd.f32 %v1158_v59, %v5067_v52  ;;  %v5080_v52 = vld [vmem:[#allocation27_spill] sm:$0xff] }
 0x37c   :  { %3139 = vtanh.f32 %v1262_v14 }
 0x37d   :  { %v1367_v53 = vmul.f32 0.5, %v1357_v34  ;;  %v5081_v34 = vld [vmem:[#allocation28_spill] sm:$0xff] }
 0x383   :  { %v3134_v5 = vpop.eup %3133 }
 0x384   :  { %v3136_v55 = vpop.eup %3135  ;;  %v1255_v24 = vadd.f32 1.0, %v3134_v5 }
 0x385   :  { %v1259_v6 = vadd.f32 1.0, %v3136_v55  ;;  %v3138_v60 = vpop.eup %3137 }
 0x386   :  { %v1256_v4 = vmul.f32 0.5, %v1255_v24  ;;  %v3140_v26 = vpop.eup %3139 }
 0x387   :  { %v1260_v1 = vmul.f32 0.5, %v1259_v6  ;;  %v1264_v10 = vadd.f32 1.0, %v3140_v26  ;;  %v5074_v26 = vld [vmem:[#allocation21_spill] sm:$0xff] }
 0x388   :  { %v1267_v43 = vmul.f32 %v3138_v60, %v1256_v4  ;;  %v5068_v4 = vld [vmem:[#allocation16_spill] sm:$0xff]  ;;  %v5069_v60 = vld [vmem:[#allocation14_spill] sm:$0xff] }
 0x389   :  { %v1266_v38 = vmul.f32 %v1260_v1, %v5066_v8  ;;  %v1265_v7 = vmul.f32 0.5, %v1264_v10  ;;  %v5070_v1 = vld [vmem:[#allocation15_spill] sm:$0xff]  ;;  %v5072_v8 = vld [vmem:[#allocation18_spill] sm:$0xff] }
 0x38a   :  { %v5075_v10 = vld [vmem:[#allocation22_spill] sm:$0xff] }
 0x38b   :  { %v4036_v44 = vadd.f32 %v1267_v43, %v1266_v38  ;;  %v5071_v43 = vld [vmem:[#allocation17_spill] sm:$0xff]  ;;  %v5073_v38 = vld [vmem:[#allocation19_spill] sm:$0xff] }
 0x38d   :  { %3141 = vtanh.f32 %v4036_v44 }
 0x38e   :  { %3143 = vtanh.f32 %v1367_v53  ;;  %v5082_v53 = vld [vmem:[#allocation29_spill] sm:$0xff] }
 0x38f   :  { %3145 = vtanh.f32 %v4029_v20 }
 0x397   :  { %v3142_v29 = vpop.eup %3141 }
 0x398   :  { %v1270_v63 = vmul.f32 %v3142_v29, %v1265_v7  ;;  %v3144_v59 = vpop.eup %3143  ;;  %v5076_v7 = vld [vmem:[#allocation23_spill] sm:$0xff]  ;;  %v5077_v29 = vld [vmem:[#allocation24_spill] sm:$0xff] }
 0x399   :  { %v1369_v14 = vadd.f32 1.0, %v3144_v59  ;;  %v3146_v5 = vpop.eup %3145  ;;  %v5083_v59 = vld [vmem:[#allocation30_spill] sm:$0xff] }
 0x39a   :  { %v1271_v36 = vpack.c.bf16 %v1270_v63, %v1270_v63  ;;  %v5078_v63 = vld [vmem:[#allocation25_spill] sm:$0xff] }
 0x39b   :  { %v1370_v55 = vmul.f32 0.5, %v1369_v14  ;;  %v5084_v14 = vld [vmem:[#allocation31_spill] sm:$0xff] }
 0x39c   :  { %1305 = vmatmul.mubr.bf16.vlgmr.msra.gmra.mrb[36].mxu0 %v1271_v36  ;;  %1346 = vmatmul.mubr.bf16.vlgmr.msra.gmra.mrb[36].mxu1 %v1271_v36  ;;  %v5079_v36 = vld [vmem:[#allocation26_spill] sm:$0xff] }
 0x39d   :  { %1378 = vmatpush1.bf16.msra.mxu0 %v3440_v22  ;;  %1419 = vmatpush1.bf16.msra.mxu1 %v3442_v23  ;;  %v1375_v24 = vmul.f32 %v3146_v5, %v1370_v55  ;;  %v5085_v5 = vld [vmem:[#allocation32_spill] sm:$0xff]  ;;  %v5086_v55 = vld [vmem:[#allocation33_spill] sm:$0xff] }
 0x39e   :  { %1379 = vmatprep.subr.bf16.mxu0 %v3450_v28  ;;  %1420 = vmatprep.subr.bf16.mxu1 %v3456_v32 }
 0x39f   :  { %1409 = vmatprep.mubr.bf16.mxu0 %v4924_v33  ;;  %1450 = vmatprep.mubr.bf16.mxu1 %v4924_v33  ;;  %v1376_v6 = vpack.c.bf16 %v1375_v24, %v1375_v24  ;;  %v5087_v24 = vld [vmem:[#allocation38_spill] sm:$0xff] }
 0x3a1   :  { %1380 = vmatpush1.bf16.msra.mxu0 %v3452_v30  ;;  %1421 = vmatpush1.bf16.msra.mxu1 %v3454_v31 }
 0x3a2   :  { %1381 = vmatprep.subr.bf16.mxu0 %v3466_v37  ;;  %1422 = vmatprep.subr.bf16.mxu1 %v3472_v41 }
 0x3a5   :  { %1382 = vmatpush1.bf16.msra.mxu0 %v3468_v39  ;;  %1423 = vmatpush1.bf16.msra.mxu1 %v3470_v40 }
 0x3a6   :  { %1383 = vmatprep.subr.bf16.mxu0 %v3481_v45  ;;  %1424 = vmatprep.subr.bf16.mxu1 %v3487_v49 }
 0x3a9   :  { %1384 = vmatpush1.bf16.msra.mxu0 %v3483_v47  ;;  %1425 = vmatpush1.bf16.msra.mxu1 %v3485_v48 }
 0x3aa   :  { %1385 = vmatprep.subr.bf16.mxu0 %v3497_v54  ;;  %1426 = vmatprep.subr.bf16.mxu1 %v3503_v58 }
 0x3ad   :  { %1386 = vmatpush1.bf16.msra.mxu0 %v3499_v56  ;;  %1427 = vmatpush1.bf16.msra.mxu1 %v3501_v57 }
 0x3ae   :  { %1387 = vmatprep.subr.bf16.mxu0 %v3512_v62  ;;  %1428 = vmatprep.subr.bf16.mxu1 %v3518_v3 }
 0x3b1   :  { %1388 = vmatpush1.bf16.msra.mxu0 %v3514_v0  ;;  %1429 = vmatpush1.bf16.msra.mxu1 %v3516_v2 }
 0x3b2   :  { %1389 = vmatprep.subr.bf16.mxu0 %v3528_v9  ;;  %1430 = vmatprep.subr.bf16.mxu1 %v3534_v13 }
 0x3b5   :  { %1390 = vmatpush1.bf16.msra.mxu0 %v3530_v11  ;;  %1431 = vmatpush1.bf16.msra.mxu1 %v3532_v12 }
 0x3b6   :  { %1391 = vmatprep.subr.bf16.mxu0 %v3543_v17  ;;  %1432 = vmatprep.subr.bf16.mxu1 %v3549_v25 }
 0x3b9   :  { %1392 = vmatpush1.bf16.msra.mxu0 %v3545_v19  ;;  %1433 = vmatpush1.bf16.msra.mxu1 %v3547_v21 }
 0x3ba   :  { %1459 = vmatprep.subr.bf16.mxu0 %v5012_v15  ;;  %1500 = vmatprep.subr.bf16.mxu1 %v5068_v4 }
 0x3bc   :  { %1410 = vmatmul.mubr.bf16.vlgmr.msra.gmra.mrb[40].mxu0 %v1376_v6  ;;  %1451 = vmatmul.mubr.bf16.vlgmr.msra.gmra.mrb[40].mxu1 %v1376_v6 }
 0x3bd   :  { %1460 = vmatpush1.bf16.msra.mxu0 %v5069_v60  ;;  %1501 = vmatpush1.bf16.msra.mxu1 %v5070_v1 }
 0x3be   :  { %1461 = vmatprep.subr.bf16.mxu0 %v5071_v43  ;;  %1502 = vmatprep.subr.bf16.mxu1 %v5072_v8  ;;  %v5130_v43 = vld [vmem:[#allocation51_spill] sm:$0xff] }
 0x3bf   :  { %1491 = vmatprep.mubr.bf16.mxu0 %v4924_v33  ;;  %1532 = vmatprep.mubr.bf16.mxu1 %v4924_v33 }
 0x3c1   :  { %1462 = vmatpush1.bf16.msra.mxu0 %v5073_v38  ;;  %1503 = vmatpush1.bf16.msra.mxu1 %v5019_v46 }
 0x3c2   :  { %1463 = vmatprep.subr.bf16.mxu0 %v5074_v26  ;;  %1504 = vmatprep.subr.bf16.mxu1 %v5075_v10  ;;  %v5129_v10 = vld [vmem:[#allocation50_spill] sm:$0xff] }
 0x3c5   :  { %1464 = vmatpush1.bf16.msra.mxu0 %v5076_v7  ;;  %1505 = vmatpush1.bf16.msra.mxu1 %v5077_v29  ;;  %v5128_v29 = vld [vmem:[#allocation48_spill] sm:$0xff] }
 0x3c6   :  { %1465 = vmatprep.subr.bf16.mxu0 %v5078_v63  ;;  %1506 = vmatprep.subr.bf16.mxu1 %v5079_v36 }
 0x3c9   :  { %1466 = vmatpush1.bf16.msra.mxu0 %v5080_v52  ;;  %1507 = vmatpush1.bf16.msra.mxu1 %v5081_v34  ;;  %v5088_v34 = vld [vmem:[#allocation39_spill] sm:$0xff] }
 0x3ca   :  { %1467 = vmatprep.subr.bf16.mxu0 %v5082_v53  ;;  %1508 = vmatprep.subr.bf16.mxu1 %v5083_v59  ;;  %v5089_v53 = vld [vmem:[#allocation40_spill] sm:$0xff]  ;;  %v5090_v59 = vld [vmem:[#allocation41_spill] sm:$0xff] }
 0x3cd   :  { %1468 = vmatpush1.bf16.msra.mxu0 %v5084_v14  ;;  %1509 = vmatpush1.bf16.msra.mxu1 %v5085_v5  ;;  %v5091_v14 = vld [vmem:[#allocation42_spill] sm:$0xff]  ;;  %v5092_v5 = vld [vmem:[#allocation43_spill] sm:$0xff] }
 0x3ce   :  { %1469 = vmatprep.subr.bf16.mxu0 %v5086_v55  ;;  %1510 = vmatprep.subr.bf16.mxu1 %v5032_v18  ;;  %v5093_v55 = vld [vmem:[#allocation44_spill] sm:$0xff]  ;;  %v5094_v18 = vld [vmem:[#allocation74_spill] sm:$0xff] }
 0x3d1   :  { %1470 = vmatpush1.bf16.msra.mxu0 %v5033_v50  ;;  %1511 = vmatpush1.bf16.msra.mxu1 %v5034_v42  ;;  %v5095_v50 = vld [vmem:[#allocation75_spill] sm:$0xff] }
 0x3d2   :  { %1471 = vmatprep.subr.bf16.mxu0 %v5035_v51  ;;  %1512 = vmatprep.subr.bf16.mxu1 %v5087_v24  ;;  %v5096_v51 = vld [vmem:[#allocation76_spill] sm:$0xff]  ;;  %v5097_v24 = vld [vmem:[#allocation77_spill] sm:$0xff] }
 0x3d5   :  { %1472 = vmatpush1.bf16.msra.mxu0 %v5088_v34  ;;  %1513 = vmatpush1.bf16.msra.mxu1 %v5089_v53  ;;  %v5098_v34 = vld [vmem:[#allocation78_spill] sm:$0xff]  ;;  %v5099_v53 = vld [vmem:[#allocation79_spill] sm:$0xff] }
 0x3d6   :  { %1473 = vmatprep.subr.bf16.mxu0 %v5090_v59  ;;  %1514 = vmatprep.subr.bf16.mxu1 %v5091_v14  ;;  %v5109_v14 = vld [vmem:[#allocation89_spill] sm:$0xff]  ;;  %v5110_v59 = vld [vmem:[#allocation90_spill] sm:$0xff] }
 0x3d9   :  { %1474 = vmatpush1.bf16.msra.mxu0 %v5092_v5  ;;  %1515 = vmatpush1.bf16.msra.mxu1 %v5093_v55  ;;  %v5100_v5 = vld [vmem:[#allocation80_spill] sm:$0xff]  ;;  %v5101_v55 = vld [vmem:[#allocation81_spill] sm:$0xff] }
 0x3da   :  { %1568 = vmatprep.subr.bf16.mxu0 %v5094_v18  ;;  %1609 = vmatprep.subr.bf16.mxu1 %v5095_v50  ;;  %v5102_v18 = vld [vmem:[#allocation82_spill] sm:$0xff]  ;;  %v5103_v50 = vld [vmem:[#allocation83_spill] sm:$0xff] }
 0x3dc   :  { %1492 = vmatmul.mubr.bf16.vlgmr.msra.gmra.mrb[44].mxu0 %v1376_v6  ;;  %1533 = vmatmul.mubr.bf16.vlgmr.msra.gmra.mrb[44].mxu1 %v1376_v6  ;;  %v5104_v6 = vld [vmem:[#allocation84_spill] sm:$0xff] }
 0x3dd   :  { %1569 = vmatpush1.bf16.msra.mxu0 %v5096_v51  ;;  %1610 = vmatpush1.bf16.msra.mxu1 %v5097_v24  ;;  %v5105_v51 = vld [vmem:[#allocation85_spill] sm:$0xff]  ;;  %v5106_v24 = vld [vmem:[#allocation86_spill] sm:$0xff] }
 0x3de   :  { %1570 = vmatprep.subr.bf16.mxu0 %v5098_v34  ;;  %1611 = vmatprep.subr.bf16.mxu1 %v5099_v53  ;;  %v5107_v34 = vld [vmem:[#allocation87_spill] sm:$0xff]  ;;  %v5108_v53 = vld [vmem:[#allocation88_spill] sm:$0xff] }
 0x3df   :  { %1600 = vmatprep.mubr.bf16.mxu0 %v4924_v33  ;;  %1641 = vmatprep.mubr.bf16.mxu1 %v4924_v33 }
 0x3e1   :  { %1571 = vmatpush1.bf16.msra.mxu0 %v5100_v5  ;;  %1612 = vmatpush1.bf16.msra.mxu1 %v5101_v55  ;;  %v5111_v5 = vld [vmem:[#allocation91_spill] sm:$0xff]  ;;  %v5112_v55 = vld [vmem:[#allocation92_spill] sm:$0xff] }
 0x3e2   :  { %1572 = vmatprep.subr.bf16.mxu0 %v5102_v18  ;;  %1613 = vmatprep.subr.bf16.mxu1 %v5103_v50  ;;  %v5113_v18 = vld [vmem:[#allocation93_spill] sm:$0xff]  ;;  %v5114_v50 = vld [vmem:[#allocation94_spill] sm:$0xff] }
 0x3e5   :  { %1573 = vmatpush1.bf16.msra.mxu0 %v5104_v6  ;;  %1614 = vmatpush1.bf16.msra.mxu1 %v5105_v51  ;;  %v5115_v6 = vld [vmem:[#allocation95_spill] sm:$0xff]  ;;  %v5116_v51 = vld [vmem:[#allocation96_spill] sm:$0xff] }
 0x3e6   :  { %1574 = vmatprep.subr.bf16.mxu0 %v5106_v24  ;;  %1615 = vmatprep.subr.bf16.mxu1 %v5107_v34  ;;  %v5117_v24 = vld [vmem:[#allocation97_spill] sm:$0xff]  ;;  %v5118_v34 = vld [vmem:[#allocation98_spill] sm:$0xff] }
 0x3e9   :  { %1575 = vmatpush1.bf16.msra.mxu0 %v5108_v53  ;;  %1616 = vmatpush1.bf16.msra.mxu1 %v5109_v14  ;;  %v5119_v53 = vld [vmem:[#allocation99_spill] sm:$0xff]  ;;  %v5120_v14 = vld [vmem:[#allocation100_spill] sm:$0xff] }
 0x3ea   :  { %1576 = vmatprep.subr.bf16.mxu0 %v5110_v59  ;;  %1617 = vmatprep.subr.bf16.mxu1 %v5111_v5  ;;  %v5121_v59 = vld [vmem:[#allocation101_spill] sm:$0xff]  ;;  %v5122_v5 = vld [vmem:[#allocation102_spill] sm:$0xff] }
 0x3ed   :  { %1577 = vmatpush1.bf16.msra.mxu0 %v5112_v55  ;;  %1618 = vmatpush1.bf16.msra.mxu1 %v5113_v18  ;;  %v5123_v55 = vld [vmem:[#allocation103_spill] sm:$0xff]  ;;  %v5124_v18 = vld [vmem:[#allocation104_spill] sm:$0xff] }
 0x3ee   :  { %1578 = vmatprep.subr.bf16.mxu0 %v5114_v50  ;;  %1619 = vmatprep.subr.bf16.mxu1 %v5115_v6  ;;  %v5125_v50 = vld [vmem:[#allocation105_spill] sm:$0xff]  ;;  %v5126_v6 = vld [vmem:[#allocation11_spill] sm:$0xff] }
 0x3f1   :  { %1579 = vmatpush1.bf16.msra.mxu0 %v5116_v51  ;;  %1620 = vmatpush1.bf16.msra.mxu1 %v5117_v24  ;;  %v5127_v51 = vld [vmem:[#allocation12_spill] sm:$0xff] }
 0x3f2   :  { %1580 = vmatprep.subr.bf16.mxu0 %v5118_v34  ;;  %1621 = vmatprep.subr.bf16.mxu1 %v5119_v53 }
 0x3f5   :  { %1581 = vmatpush1.bf16.msra.mxu0 %v5120_v14  ;;  %1622 = vmatpush1.bf16.msra.mxu1 %v5121_v59 }
 0x3f6   :  { %1582 = vmatprep.subr.bf16.mxu0 %v5122_v5  ;;  %1623 = vmatprep.subr.bf16.mxu1 %v5123_v55 }
 0x3f9   :  { %1583 = vmatpush1.bf16.msra.mxu0 %v5124_v18  ;;  %1624 = vmatpush1.bf16.msra.mxu1 %v5125_v50 }
 0x3fa   :  { %1673 = vmatprep.subr.bf16.mxu0 %v5126_v6  ;;  %1714 = vmatprep.subr.bf16.mxu1 %v5127_v51 }
 0x46f   :  { %v1306_v24 = vpop.f32.mrb[36].mxu0  ;;  %v1347_v34 = vpop.f32.mrb[36].mxu1 }
 0x470   :  { %v1308_v42 = vpop.f32.mrb[37].mxu0  ;;  %v1349_v53 = vpop.f32.mrb[37].mxu1 }
 0x471   :  { %v1310_v52 = vpop.f32.mrb[38].mxu0  ;;  %v1351_v14 = vpop.f32.mrb[38].mxu1 }
 0x472   :  { %v1311_v36 = vpop.f32.mrb[39].mxu0  ;;  %v1352_v59 = vpop.f32.mrb[39].mxu1 }
 0x48f   :  { %v1411_v63 = vpop.f32.mrb[40].mxu0  ;;  %v1452_v5 = vpop.f32.mrb[40].mxu1 }
 0x490   :  { %v1650_v55 = vadd.f32 %v1411_v63, %v5128_v29  ;;  %v1413_v7 = vpop.f32.mrb[41].mxu0  ;;  %v1454_v18 = vpop.f32.mrb[41].mxu1  ;;  %v1652_v52 = vadd.f32 %v1452_v5, %v5130_v43 }
 0x491   :  { %v1651_v50 = vadd.f32 %v1413_v7, %v5129_v10  ;;  %v1415_v26 = vpop.f32.mrb[42].mxu0  ;;  %v1456_v6 = vpop.f32.mrb[42].mxu1 }
 0x492   :  { %v1654_v46 = vmul.f32 0.5, %v1650_v55  ;;  %v1416_v51 = vpop.f32.mrb[43].mxu0  ;;  %v1457_v38 = vpop.f32.mrb[43].mxu1 }
 0x493   :  { %v1658_v8 = vmul.f32 0.5, %v1651_v50 }
 0x494   :  { %3147 = vtanh.f32 %v1654_v46 }
 0x495   :  { %3149 = vtanh.f32 %v1658_v8 }
 0x496   :  { %3151 = vtanh.f32 %v1652_v52 }
 0x49e   :  { %v3148_v36 = vpop.eup %3147 }
 0x49f   :  { %v3150_v14 = vpop.eup %3149  ;;  %v1656_v59 = vadd.f32 1.0, %v3148_v36 }
 0x4a0   :  { %v1660_v1 = vadd.f32 1.0, %v3150_v14  ;;  %v3152_v63 = vpop.eup %3151 }
 0x4a1   :  { %v1657_v29 = vmul.f32 0.5, %v1656_v59 }
 0x4a2   :  { %v1661_v60 = vmul.f32 0.5, %v1660_v1 }
 0x4a3   :  { %v1668_v4 = vmul.f32 %v3152_v63, %v1657_v29 }
 0x4a4   :  { %v1667_v26 = vmul.f32 %v1661_v60, %v4029_v20 }
 0x4a6   :  { %v4147_v10 = vadd.f32 %v1668_v4, %v1667_v26 }
 0x4af   :  { %v1493_v7 = vpop.f32.mrb[44].mxu0  ;;  %v1534_v38 = vpop.f32.mrb[44].mxu1 }
 0x4b0   :  { %v1541_v6 = vadd.f32 %v1493_v7, %v1306_v24  ;;  %v1543_v46 = vadd.f32 %v1534_v38, %v1347_v34  ;;  %v1495_v51 = vpop.f32.mrb[45].mxu0  ;;  %v1536_v43 = vpop.f32.mrb[45].mxu1 }
 0x4b1   :  { %v1542_v8 = vadd.f32 %v1495_v51, %v1308_v42  ;;  %v1544_v5 = vadd.f32 %v1536_v43, %v1349_v53  ;;  %v1497_v55 = vpop.f32.mrb[46].mxu0  ;;  %v1538_v50 = vpop.f32.mrb[46].mxu1 }
 0x4b2   :  { %v1545_v52 = vadd.f32 %v1541_v6, %v5062_v16  ;;  %v1498_v36 = vpop.f32.mrb[47].mxu0  ;;  %v1539_v14 = vpop.f32.mrb[47].mxu1  ;;  %v1547_v4 = vadd.f32 %v1543_v46, %v5064_v27 }
 0x4b3   :  { %v1546_v1 = vadd.f32 %v1542_v8, %v5063_v61  ;;  %v1548_v60 = vadd.f32 %v1544_v5, %v5065_v35 }
 0x4b4   :  { %v1549_v59 = vmul.f32 0.5, %v1545_v52  ;;  %v5131_v52 = vld [vmem:[#allocation52_spill] sm:$0xff] }
 0x4b5   :  { %v1553_v20 = vmul.f32 0.5, %v1546_v1  ;;  %v1558_v24 = vmul.f32 0.5, %v1548_v60  ;;  %v1653_v36 = vadd.f32 %v1454_v18, %v5131_v52  ;;  %v5132_v60 = vld [vmem:[#allocation16_spill] sm:$0xff]  ;;  %v5149_v52 = vld [vmem:[#allocation31_spill] sm:$0xff] }
 0x4b6   :  { %3153 = vtanh.f32 %v1549_v59 }
 0x4b7   :  { %3155 = vtanh.f32 %v1553_v20 }
 0x4b8   :  { %3157 = vtanh.f32 %v1547_v4 }
 0x4b9   :  { %3159 = vtanh.f32 %v1558_v24  ;;  %v5133_v24 = vld [vmem:[#allocation14_spill] sm:$0xff] }
 0x4c0   :  { %v3154_v42 = vpop.eup %3153 }
 0x4c1   :  { %v3156_v34 = vpop.eup %3155  ;;  %v1551_v53 = vadd.f32 1.0, %v3154_v42  ;;  %v5134_v42 = vld [vmem:[#allocation15_spill] sm:$0xff] }
 0x4c2   :  { %v1555_v29 = vadd.f32 1.0, %v3156_v34  ;;  %v3158_v26 = vpop.eup %3157  ;;  %v5135_v34 = vld [vmem:[#allocation17_spill] sm:$0xff] }
 0x4c3   :  { %v1552_v63 = vmul.f32 0.5, %v1551_v53  ;;  %v3160_v46 = vpop.eup %3159  ;;  %v5136_v53 = vld [vmem:[#allocation18_spill] sm:$0xff] }
 0x4c4   :  { %v1556_v7 = vmul.f32 0.5, %v1555_v29  ;;  %v1560_v43 = vadd.f32 1.0, %v3160_v46  ;;  %v5137_v29 = vld [vmem:[#allocation19_spill] sm:$0xff]  ;;  %v5143_v46 = vld [vmem:[#allocation25_spill] sm:$0xff] }
 0x4c5   :  { %v1563_v38 = vmul.f32 %v3158_v26, %v1552_v63  ;;  %v5138_v63 = vld [vmem:[#allocation20_spill] sm:$0xff]  ;;  %v5139_v26 = vld [vmem:[#allocation21_spill] sm:$0xff] }
 0x4c6   :  { %v1562_v6 = vmul.f32 %v1556_v7, %v4036_v44  ;;  %v1561_v8 = vmul.f32 0.5, %v1560_v43  ;;  %v1663_v44 = vmul.f32 0.5, %v1653_v36  ;;  %v5140_v7 = vld [vmem:[#allocation22_spill] sm:$0xff]  ;;  %v5150_v36 = vld [vmem:[#allocation32_spill] sm:$0xff] }
 0x4c7   :  { %v5144_v43 = vld [vmem:[#allocation26_spill] sm:$0xff] }
 0x4c8   :  { %v4154_v51 = vadd.f32 %v1563_v38, %v1562_v6  ;;  %v5141_v38 = vld [vmem:[#allocation23_spill] sm:$0xff]  ;;  %v5142_v6 = vld [vmem:[#allocation24_spill] sm:$0xff] }
 0x4ca   :  { %3161 = vtanh.f32 %v4154_v51 }
 0x4cb   :  { %3163 = vtanh.f32 %v1663_v44  ;;  %v5151_v44 = vld [vmem:[#allocation33_spill] sm:$0xff] }
 0x4cc   :  { %3165 = vtanh.f32 %v4147_v10 }
 0x4d4   :  { %v3162_v5 = vpop.eup %3161 }
 0x4d5   :  { %v1566_v55 = vmul.f32 %v3162_v5, %v1561_v8  ;;  %v3164_v18 = vpop.eup %3163  ;;  %v5145_v8 = vld [vmem:[#allocation27_spill] sm:$0xff]  ;;  %v5146_v5 = vld [vmem:[#allocation28_spill] sm:$0xff] }
 0x4d6   :  { %v1665_v14 = vadd.f32 1.0, %v3164_v18  ;;  %v3166_v1 = vpop.eup %3165  ;;  %v5152_v18 = vld [vmem:[#allocation34_spill] sm:$0xff] }
 0x4d7   :  { %v1567_v50 = vpack.c.bf16 %v1566_v55, %v1566_v55  ;;  %v5147_v55 = vld [vmem:[#allocation29_spill] sm:$0xff] }
 0x4d8   :  { %v1666_v59 = vmul.f32 0.5, %v1665_v14  ;;  %v5153_v14 = vld [vmem:[#allocation35_spill] sm:$0xff] }
 0x4d9   :  { %1601 = vmatmul.mubr.bf16.vlgmr.msra.gmra.mrb[48].mxu0 %v1567_v50  ;;  %1642 = vmatmul.mubr.bf16.vlgmr.msra.gmra.mrb[48].mxu1 %v1567_v50  ;;  %v5148_v50 = vld [vmem:[#allocation30_spill] sm:$0xff] }
 0x4da   :  { %1674 = vmatpush1.bf16.msra.mxu0 %v3440_v22  ;;  %1715 = vmatpush1.bf16.msra.mxu1 %v3442_v23  ;;  %v1671_v20 = vmul.f32 %v3166_v1, %v1666_v59  ;;  %v5154_v1 = vld [vmem:[#allocation36_spill] sm:$0xff]  ;;  %v5155_v59 = vld [vmem:[#allocation37_spill] sm:$0xff] }
 0x4db   :  { %1675 = vmatprep.subr.bf16.mxu0 %v3450_v28  ;;  %1716 = vmatprep.subr.bf16.mxu1 %v3456_v32 }
 0x4dc   :  { %1705 = vmatprep.mubr.bf16.mxu0 %v4924_v33  ;;  %1746 = vmatprep.mubr.bf16.mxu1 %v4924_v33  ;;  %v1672_v4 = vpack.c.bf16 %v1671_v20, %v1671_v20  ;;  %v5156_v20 = vld [vmem:[#allocation38_spill] sm:$0xff] }
 0x4de   :  { %1676 = vmatpush1.bf16.msra.mxu0 %v3452_v30  ;;  %1717 = vmatpush1.bf16.msra.mxu1 %v3454_v31 }
 0x4df   :  { %1677 = vmatprep.subr.bf16.mxu0 %v3466_v37  ;;  %1718 = vmatprep.subr.bf16.mxu1 %v3472_v41 }
 0x4e2   :  { %1678 = vmatpush1.bf16.msra.mxu0 %v3468_v39  ;;  %1719 = vmatpush1.bf16.msra.mxu1 %v3470_v40 }
 0x4e3   :  { %1679 = vmatprep.subr.bf16.mxu0 %v3481_v45  ;;  %1720 = vmatprep.subr.bf16.mxu1 %v3487_v49 }
 0x4e6   :  { %1680 = vmatpush1.bf16.msra.mxu0 %v3483_v47  ;;  %1721 = vmatpush1.bf16.msra.mxu1 %v3485_v48 }
 0x4e7   :  { %1681 = vmatprep.subr.bf16.mxu0 %v3497_v54  ;;  %1722 = vmatprep.subr.bf16.mxu1 %v3503_v58 }
 0x4ea   :  { %1682 = vmatpush1.bf16.msra.mxu0 %v3499_v56  ;;  %1723 = vmatpush1.bf16.msra.mxu1 %v3501_v57 }
 0x4eb   :  { %1683 = vmatprep.subr.bf16.mxu0 %v3512_v62  ;;  %1724 = vmatprep.subr.bf16.mxu1 %v3518_v3 }
 0x4ee   :  { %1684 = vmatpush1.bf16.msra.mxu0 %v3514_v0  ;;  %1725 = vmatpush1.bf16.msra.mxu1 %v3516_v2 }
 0x4ef   :  { %1685 = vmatprep.subr.bf16.mxu0 %v3528_v9  ;;  %1726 = vmatprep.subr.bf16.mxu1 %v3534_v13 }
 0x4f2   :  { %1686 = vmatpush1.bf16.msra.mxu0 %v3530_v11  ;;  %1727 = vmatpush1.bf16.msra.mxu1 %v3532_v12 }
 0x4f3   :  { %1687 = vmatprep.subr.bf16.mxu0 %v3543_v17  ;;  %1728 = vmatprep.subr.bf16.mxu1 %v3549_v25 }
 0x4f6   :  { %1688 = vmatpush1.bf16.msra.mxu0 %v3545_v19  ;;  %1729 = vmatpush1.bf16.msra.mxu1 %v3547_v21 }
 0x4f7   :  { %1755 = vmatprep.subr.bf16.mxu0 %v5012_v15  ;;  %1796 = vmatprep.subr.bf16.mxu1 %v5132_v60 }
 0x4f9   :  { %1706 = vmatmul.mubr.bf16.vlgmr.msra.gmra.mrb[52].mxu0 %v1672_v4  ;;  %1747 = vmatmul.mubr.bf16.vlgmr.msra.gmra.mrb[52].mxu1 %v1672_v4 }
 0x4fa   :  { %1756 = vmatpush1.bf16.msra.mxu0 %v5133_v24  ;;  %1797 = vmatpush1.bf16.msra.mxu1 %v5134_v42 }
 0x4fb   :  { %1757 = vmatprep.subr.bf16.mxu0 %v5135_v34  ;;  %1798 = vmatprep.subr.bf16.mxu1 %v5136_v53  ;;  %v5199_v34 = vld [vmem:[#allocation55_spill] sm:$0xff] }
 0x4fc   :  { %1787 = vmatprep.mubr.bf16.mxu0 %v4924_v33  ;;  %1828 = vmatprep.mubr.bf16.mxu1 %v4924_v33 }
 0x4fe   :  { %1758 = vmatpush1.bf16.msra.mxu0 %v5137_v29  ;;  %1799 = vmatpush1.bf16.msra.mxu1 %v5138_v63 }
 0x4ff   :  { %1759 = vmatprep.subr.bf16.mxu0 %v5139_v26  ;;  %1800 = vmatprep.subr.bf16.mxu1 %v5140_v7  ;;  %v5198_v7 = vld [vmem:[#allocation54_spill] sm:$0xff] }
 0x502   :  { %1760 = vmatpush1.bf16.msra.mxu0 %v5141_v38  ;;  %1801 = vmatpush1.bf16.msra.mxu1 %v5142_v6 }
 0x503   :  { %1761 = vmatprep.subr.bf16.mxu0 %v5143_v46  ;;  %1802 = vmatprep.subr.bf16.mxu1 %v5144_v43  ;;  %v5197_v46 = vld [vmem:[#allocation53_spill] sm:$0xff] }
 0x506   :  { %1762 = vmatpush1.bf16.msra.mxu0 %v5145_v8  ;;  %1803 = vmatpush1.bf16.msra.mxu1 %v5146_v5  ;;  %v5157_v5 = vld [vmem:[#allocation39_spill] sm:$0xff] }
 0x507   :  { %1763 = vmatprep.subr.bf16.mxu0 %v5147_v55  ;;  %1804 = vmatprep.subr.bf16.mxu1 %v5148_v50  ;;  %v5158_v55 = vld [vmem:[#allocation40_spill] sm:$0xff]  ;;  %v5159_v50 = vld [vmem:[#allocation41_spill] sm:$0xff] }
 0x50a   :  { %1764 = vmatpush1.bf16.msra.mxu0 %v5149_v52  ;;  %1805 = vmatpush1.bf16.msra.mxu1 %v5150_v36  ;;  %v5160_v52 = vld [vmem:[#allocation42_spill] sm:$0xff]  ;;  %v5161_v36 = vld [vmem:[#allocation43_spill] sm:$0xff] }
 0x50b   :  { %1765 = vmatprep.subr.bf16.mxu0 %v5151_v44  ;;  %1806 = vmatprep.subr.bf16.mxu1 %v5152_v18  ;;  %v5162_v44 = vld [vmem:[#allocation44_spill] sm:$0xff] }
 0x50c   :  { %v4225_v18 = vld [vmem:[#allocation2 + $0x8] sm:$0xff] }
 0x50d   :  { %5163 = vst [vmem:[#allocation13_spill] sm:$0xff] %v4225_v18 }
 0x50e   :  { %1766 = vmatpush1.bf16.msra.mxu0 %v5153_v14  ;;  %1807 = vmatpush1.bf16.msra.mxu1 %v5154_v1  ;;  %v4228_v1 = vld [vmem:[#allocation2 + $0x18] sm:$0xff] }
 0x50f   :  { %1767 = vmatprep.subr.bf16.mxu0 %v5155_v59  ;;  %1808 = vmatprep.subr.bf16.mxu1 %v5156_v20  ;;  %5164 = vst [vmem:[#allocation45_spill] sm:$0xff] %v4228_v1 }
 0x512   :  { %1768 = vmatpush1.bf16.msra.mxu0 %v5157_v5  ;;  %1809 = vmatpush1.bf16.msra.mxu1 %v5158_v55  ;;  %v4231_v5 = vld [vmem:[#allocation2] sm:$0xff] }
 0x513   :  { %1769 = vmatprep.subr.bf16.mxu0 %v5159_v50  ;;  %1810 = vmatprep.subr.bf16.mxu1 %v5160_v52  ;;  %5165 = vst [vmem:[#allocation46_spill] sm:$0xff] %v4231_v5  ;;  %v4234_v50 = vld [vmem:[#allocation2 + $0x10] sm:$0xff] }
 0x514   :  { %5166 = vst [vmem:[#allocation47_spill] sm:$0xff] %v4234_v50 }
 0x516   :  { %1770 = vmatpush1.bf16.msra.mxu0 %v5161_v36  ;;  %1811 = vmatpush1.bf16.msra.mxu1 %v5162_v44  ;;  %v4237_v36 = vld [vmem:[#allocation2 + $0x28] sm:$0xff]  ;;  %v4240_v44 = vld [vmem:[#allocation2 + $0x38] sm:$0xff] }
 0x517   :  { %1864 = vmatprep.subr.bf16.mxu0 %v4225_v18  ;;  %1905 = vmatprep.subr.bf16.mxu1 %v4228_v1  ;;  %5167 = vst [vmem:[#allocation69_spill] sm:$0xff] %v4237_v36  ;;  %5168 = vst [vmem:[#allocation70_spill] sm:$0xff] %v4240_v44  ;;  %v4260_v1 = vld [vmem:[#allocation2 + $0x50] sm:$0xff] }
 0x518   :  { %5174 = vst [vmem:[#allocation75_spill] sm:$0xff] %v4260_v1  ;;  %v5196_v18 = vld [vmem:[#allocation12_spill] sm:$0xff] }
 0x519   :  { %1788 = vmatmul.mubr.bf16.vlgmr.msra.gmra.mrb[56].mxu0 %v1672_v4  ;;  %1829 = vmatmul.mubr.bf16.vlgmr.msra.gmra.mrb[56].mxu1 %v1672_v4  ;;  %v4245_v4 = vld [vmem:[#allocation2 + $0x20] sm:$0xff] }
 0x51a   :  { %1865 = vmatpush1.bf16.msra.mxu0 %v4231_v5  ;;  %1906 = vmatpush1.bf16.msra.mxu1 %v4234_v50  ;;  %5169 = vst [vmem:[#allocation71_spill] sm:$0xff] %v4245_v4  ;;  %v4248_v5 = vld [vmem:[#allocation2 + $0x30] sm:$0xff]  ;;  %v4251_v50 = vld [vmem:[#allocation2 + $0x48] sm:$0xff] }
 0x51b   :  { %1866 = vmatprep.subr.bf16.mxu0 %v4237_v36  ;;  %1907 = vmatprep.subr.bf16.mxu1 %v4240_v44  ;;  %5170 = vst [vmem:[#allocation72_spill] sm:$0xff] %v4248_v5  ;;  %5171 = vst [vmem:[#allocation73_spill] sm:$0xff] %v4251_v50  ;;  %v4254_v36 = vld [vmem:[#allocation2 + $0x58] sm:$0xff]  ;;  %v4257_v44 = vld [vmem:[#allocation2 + $0x40] sm:$0xff] }
 0x51c   :  { %1896 = vmatprep.mubr.bf16.mxu0 %v4924_v33  ;;  %1937 = vmatprep.mubr.bf16.mxu1 %v4924_v33  ;;  %5172 = vst [vmem:[#allocation49_spill] sm:$0xff] %v4254_v36  ;;  %5173 = vst [vmem:[#allocation74_spill] sm:$0xff] %v4257_v44 }
 0x51e   :  { %1867 = vmatpush1.bf16.msra.mxu0 %v4245_v4  ;;  %1908 = vmatpush1.bf16.msra.mxu1 %v4248_v5  ;;  %v4263_v4 = vld [vmem:[#allocation2 + $0x68] sm:$0xff]  ;;  %v4266_v5 = vld [vmem:[#allocation2 + $0x78] sm:$0xff] }
 0x51f   :  { %1868 = vmatprep.subr.bf16.mxu0 %v4251_v50  ;;  %1909 = vmatprep.subr.bf16.mxu1 %v4254_v36  ;;  %5175 = vst [vmem:[#allocation76_spill] sm:$0xff] %v4263_v4  ;;  %5176 = vst [vmem:[#allocation77_spill] sm:$0xff] %v4266_v5  ;;  %v4269_v50 = vld [vmem:[#allocation2 + $0x60] sm:$0xff]  ;;  %v4272_v36 = vld [vmem:[#allocation2 + $0x70] sm:$0xff] }
 0x520   :  { %5177 = vst [vmem:[#allocation78_spill] sm:$0xff] %v4269_v50  ;;  %5178 = vst [vmem:[#allocation79_spill] sm:$0xff] %v4272_v36 }
 0x522   :  { %1869 = vmatpush1.bf16.msra.mxu0 %v4257_v44  ;;  %1910 = vmatpush1.bf16.msra.mxu1 %v4260_v1  ;;  %v4275_v44 = vld [vmem:[#allocation2 + $0x88] sm:$0xff]  ;;  %v4278_v1 = vld [vmem:[#allocation2 + $0x98] sm:$0xff] }
 0x523   :  { %1870 = vmatprep.subr.bf16.mxu0 %v4263_v4  ;;  %1911 = vmatprep.subr.bf16.mxu1 %v4266_v5  ;;  %5179 = vst [vmem:[#allocation80_spill] sm:$0xff] %v4275_v44  ;;  %5180 = vst [vmem:[#allocation81_spill] sm:$0xff] %v4278_v1  ;;  %v4281_v4 = vld [vmem:[#allocation2 + $0x80] sm:$0xff]  ;;  %v4284_v5 = vld [vmem:[#allocation2 + $0x90] sm:$0xff] }
 0x524   :  { %5181 = vst [vmem:[#allocation82_spill] sm:$0xff] %v4281_v4  ;;  %5182 = vst [vmem:[#allocation83_spill] sm:$0xff] %v4284_v5 }
 0x526   :  { %1871 = vmatpush1.bf16.msra.mxu0 %v4269_v50  ;;  %1912 = vmatpush1.bf16.msra.mxu1 %v4272_v36  ;;  %v4287_v50 = vld [vmem:[#allocation2 + $0xa8] sm:$0xff]  ;;  %v4290_v36 = vld [vmem:[#allocation2 + $0xb8] sm:$0xff] }
 0x527   :  { %1872 = vmatprep.subr.bf16.mxu0 %v4275_v44  ;;  %1913 = vmatprep.subr.bf16.mxu1 %v4278_v1  ;;  %5183 = vst [vmem:[#allocation84_spill] sm:$0xff] %v4287_v50  ;;  %5184 = vst [vmem:[#allocation85_spill] sm:$0xff] %v4290_v36  ;;  %v4293_v44 = vld [vmem:[#allocation2 + $0xa0] sm:$0xff]  ;;  %v4296_v1 = vld [vmem:[#allocation2 + $0xb0] sm:$0xff] }
 0x528   :  { %5185 = vst [vmem:[#allocation86_spill] sm:$0xff] %v4293_v44  ;;  %5186 = vst [vmem:[#allocation87_spill] sm:$0xff] %v4296_v1 }
 0x52a   :  { %1873 = vmatpush1.bf16.msra.mxu0 %v4281_v4  ;;  %1914 = vmatpush1.bf16.msra.mxu1 %v4284_v5  ;;  %v4299_v4 = vld [vmem:[#allocation2 + $0xc8] sm:$0xff]  ;;  %v4302_v5 = vld [vmem:[#allocation2 + $0xd8] sm:$0xff] }
 0x52b   :  { %1874 = vmatprep.subr.bf16.mxu0 %v4287_v50  ;;  %1915 = vmatprep.subr.bf16.mxu1 %v4290_v36  ;;  %5187 = vst [vmem:[#allocation88_spill] sm:$0xff] %v4299_v4  ;;  %5188 = vst [vmem:[#allocation89_spill] sm:$0xff] %v4302_v5  ;;  %v4305_v50 = vld [vmem:[#allocation2 + $0xc0] sm:$0xff]  ;;  %v4308_v36 = vld [vmem:[#allocation2 + $0xd0] sm:$0xff] }
 0x52c   :  { %5189 = vst [vmem:[#allocation90_spill] sm:$0xff] %v4305_v50  ;;  %5190 = vst [vmem:[#allocation91_spill] sm:$0xff] %v4308_v36 }
 0x52e   :  { %1875 = vmatpush1.bf16.msra.mxu0 %v4293_v44  ;;  %1916 = vmatpush1.bf16.msra.mxu1 %v4296_v1  ;;  %v4311_v44 = vld [vmem:[#allocation2 + $0xe8] sm:$0xff]  ;;  %v4314_v1 = vld [vmem:[#allocation2 + $0xf8] sm:$0xff] }
 0x52f   :  { %1876 = vmatprep.subr.bf16.mxu0 %v4299_v4  ;;  %1917 = vmatprep.subr.bf16.mxu1 %v4302_v5  ;;  %5191 = vst [vmem:[#allocation92_spill] sm:$0xff] %v4311_v44  ;;  %5192 = vst [vmem:[#allocation93_spill] sm:$0xff] %v4314_v1  ;;  %v4317_v4 = vld [vmem:[#allocation2 + $0xe0] sm:$0xff]  ;;  %v4320_v5 = vld [vmem:[#allocation2 + $0xf0] sm:$0xff] }
 0x530   :  { %5193 = vst [vmem:[#allocation94_spill] sm:$0xff] %v4317_v4  ;;  %5194 = vst [vmem:[#allocation95_spill] sm:$0xff] %v4320_v5 }
 0x532   :  { %1877 = vmatpush1.bf16.msra.mxu0 %v4305_v50  ;;  %1918 = vmatpush1.bf16.msra.mxu1 %v4308_v36  ;;  %v5195_v50 = vld [vmem:[#allocation11_spill] sm:$0xff] }
 0x533   :  { %1878 = vmatprep.subr.bf16.mxu0 %v4311_v44  ;;  %1919 = vmatprep.subr.bf16.mxu1 %v4314_v1 }
 0x536   :  { %1879 = vmatpush1.bf16.msra.mxu0 %v4317_v4  ;;  %1920 = vmatpush1.bf16.msra.mxu1 %v4320_v5 }
 0x537   :  { %1969 = vmatprep.subr.bf16.mxu0 %v5195_v50  ;;  %2010 = vmatprep.subr.bf16.mxu1 %v5196_v18 }
 0x5ac   :  { %v1602_v36 = vpop.f32.mrb[48].mxu0  ;;  %v1643_v52 = vpop.f32.mrb[48].mxu1 }
 0x5ad   :  { %v1604_v55 = vpop.f32.mrb[49].mxu0  ;;  %v1645_v44 = vpop.f32.mrb[49].mxu1 }
 0x5ae   :  { %v1606_v20 = vpop.f32.mrb[50].mxu0  ;;  %v1647_v59 = vpop.f32.mrb[50].mxu1 }
 0x5af   :  { %v1607_v14 = vpop.f32.mrb[51].mxu0  ;;  %v1648_v1 = vpop.f32.mrb[51].mxu1 }
 0x5cc   :  { %v1707_v8 = vpop.f32.mrb[52].mxu0  ;;  %v1748_v43 = vpop.f32.mrb[52].mxu1 }
 0x5cd   :  { %v1946_v4 = vadd.f32 %v1707_v8, %v5197_v46  ;;  %v1709_v6 = vpop.f32.mrb[53].mxu0  ;;  %v1750_v38 = vpop.f32.mrb[53].mxu1  ;;  %v1948_v20 = vadd.f32 %v1748_v43, %v5199_v34 }
 0x5ce   :  { %v1947_v5 = vadd.f32 %v1709_v6, %v5198_v7  ;;  %v1711_v26 = vpop.f32.mrb[54].mxu0  ;;  %v1752_v50 = vpop.f32.mrb[54].mxu1 }
 0x5cf   :  { %v1950_v63 = vmul.f32 0.5, %v1946_v4  ;;  %v1712_v18 = vpop.f32.mrb[55].mxu0  ;;  %v1753_v29 = vpop.f32.mrb[55].mxu1 }
 0x5d0   :  { %v1954_v53 = vmul.f32 0.5, %v1947_v5 }
 0x5d1   :  { %3167 = vtanh.f32 %v1950_v63 }
 0x5d2   :  { %3169 = vtanh.f32 %v1954_v53 }
 0x5d3   :  { %3171 = vtanh.f32 %v1948_v20 }
 0x5db   :  { %v3168_v14 = vpop.eup %3167 }
 0x5dc   :  { %v3170_v1 = vpop.eup %3169  ;;  %v1952_v59 = vadd.f32 1.0, %v3168_v14 }
 0x5dd   :  { %v1956_v42 = vadd.f32 1.0, %v3170_v1  ;;  %v3172_v8 = vpop.eup %3171 }
 0x5de   :  { %v1953_v46 = vmul.f32 0.5, %v1952_v59 }
 0x5df   :  { %v1957_v24 = vmul.f32 0.5, %v1956_v42 }
 0x5e0   :  { %v1964_v60 = vmul.f32 %v3172_v8, %v1953_v46 }
 0x5e1   :  { %v1963_v26 = vmul.f32 %v1957_v24, %v4147_v10 }
 0x5e3   :  { %v4329_v7 = vadd.f32 %v1964_v60, %v1963_v26 }
 0x5ec   :  { %v1789_v6 = vpop.f32.mrb[56].mxu0  ;;  %v1830_v29 = vpop.f32.mrb[56].mxu1 }
 0x5ed   :  { %v1837_v5 = vadd.f32 %v1789_v6, %v1602_v36  ;;  %v1839_v63 = vadd.f32 %v1830_v29, %v1643_v52  ;;  %v1791_v50 = vpop.f32.mrb[57].mxu0  ;;  %v1832_v34 = vpop.f32.mrb[57].mxu1 }
 0x5ee   :  { %v1838_v53 = vadd.f32 %v1791_v50, %v1604_v55  ;;  %v1840_v43 = vadd.f32 %v1832_v34, %v1645_v44  ;;  %v1793_v18 = vpop.f32.mrb[58].mxu0  ;;  %v1834_v4 = vpop.f32.mrb[58].mxu1 }
 0x5ef   :  { %v1841_v20 = vadd.f32 %v1837_v5, %v5062_v16  ;;  %v1794_v14 = vpop.f32.mrb[59].mxu0  ;;  %v1835_v1 = vpop.f32.mrb[59].mxu1  ;;  %v1843_v60 = vadd.f32 %v1839_v63, %v5064_v27 }
 0x5f0   :  { %v1842_v42 = vadd.f32 %v1838_v53, %v5063_v61  ;;  %v1844_v24 = vadd.f32 %v1840_v43, %v5065_v35 }
 0x5f1   :  { %v1845_v59 = vmul.f32 0.5, %v1841_v20  ;;  %v5200_v20 = vld [vmem:[#allocation57_spill] sm:$0xff] }
 0x5f2   :  { %v1849_v10 = vmul.f32 0.5, %v1842_v42  ;;  %v1854_v52 = vmul.f32 0.5, %v1844_v24  ;;  %v1949_v14 = vadd.f32 %v1750_v38, %v5200_v20  ;;  %v5201_v24 = vld [vmem:[#allocation16_spill] sm:$0xff]  ;;  %v5218_v20 = vld [vmem:[#allocation31_spill] sm:$0xff] }
 0x5f3   :  { %3173 = vtanh.f32 %v1845_v59 }
 0x5f4   :  { %3175 = vtanh.f32 %v1849_v10 }
 0x5f5   :  { %3177 = vtanh.f32 %v1843_v60 }
 0x5f6   :  { %3179 = vtanh.f32 %v1854_v52  ;;  %v5202_v52 = vld [vmem:[#allocation14_spill] sm:$0xff] }
 0x5fd   :  { %v3174_v55 = vpop.eup %3173 }
 0x5fe   :  { %v3176_v36 = vpop.eup %3175  ;;  %v1847_v44 = vadd.f32 1.0, %v3174_v55  ;;  %v5203_v55 = vld [vmem:[#allocation15_spill] sm:$0xff] }
 0x5ff   :  { %v1851_v46 = vadd.f32 1.0, %v3176_v36  ;;  %v3178_v26 = vpop.eup %3177  ;;  %v5204_v36 = vld [vmem:[#allocation17_spill] sm:$0xff] }
 0x600   :  { %v1848_v8 = vmul.f32 0.5, %v1847_v44  ;;  %v3180_v63 = vpop.eup %3179  ;;  %v5205_v44 = vld [vmem:[#allocation18_spill] sm:$0xff] }
 0x601   :  { %v1852_v6 = vmul.f32 0.5, %v1851_v46  ;;  %v1856_v34 = vadd.f32 1.0, %v3180_v63  ;;  %v5206_v46 = vld [vmem:[#allocation19_spill] sm:$0xff]  ;;  %v5212_v63 = vld [vmem:[#allocation25_spill] sm:$0xff] }
 0x602   :  { %v1859_v29 = vmul.f32 %v3178_v26, %v1848_v8  ;;  %v5207_v8 = vld [vmem:[#allocation20_spill] sm:$0xff]  ;;  %v5208_v26 = vld [vmem:[#allocation21_spill] sm:$0xff] }
 0x603   :  { %v1858_v5 = vmul.f32 %v1852_v6, %v4154_v51  ;;  %v1857_v53 = vmul.f32 0.5, %v1856_v34  ;;  %v1959_v51 = vmul.f32 0.5, %v1949_v14  ;;  %v5209_v6 = vld [vmem:[#allocation22_spill] sm:$0xff]  ;;  %v5219_v14 = vld [vmem:[#allocation32_spill] sm:$0xff] }
 0x604   :  { %v5213_v34 = vld [vmem:[#allocation26_spill] sm:$0xff] }
 0x605   :  { %v4336_v50 = vadd.f32 %v1859_v29, %v1858_v5  ;;  %v5210_v29 = vld [vmem:[#allocation23_spill] sm:$0xff]  ;;  %v5211_v5 = vld [vmem:[#allocation24_spill] sm:$0xff] }
 0x607   :  { %3181 = vtanh.f32 %v4336_v50 }
 0x608   :  { %3183 = vtanh.f32 %v1959_v51  ;;  %v5220_v51 = vld [vmem:[#allocation33_spill] sm:$0xff] }
 0x609   :  { %3185 = vtanh.f32 %v4329_v7 }
 0x611   :  { %v3182_v43 = vpop.eup %3181 }
 0x612   :  { %v1862_v18 = vmul.f32 %v3182_v43, %v1857_v53  ;;  %v3184_v38 = vpop.eup %3183  ;;  %v5214_v53 = vld [vmem:[#allocation27_spill] sm:$0xff]  ;;  %v5215_v43 = vld [vmem:[#allocation28_spill] sm:$0xff] }
 0x613   :  { %v1961_v1 = vadd.f32 1.0, %v3184_v38  ;;  %v3186_v42 = vpop.eup %3185  ;;  %v5221_v38 = vld [vmem:[#allocation34_spill] sm:$0xff] }
 0x614   :  { %v1863_v4 = vpack.c.bf16 %v1862_v18, %v1862_v18  ;;  %v5216_v18 = vld [vmem:[#allocation29_spill] sm:$0xff] }
 0x615   :  { %v1962_v59 = vmul.f32 0.5, %v1961_v1  ;;  %v5222_v1 = vld [vmem:[#allocation35_spill] sm:$0xff] }
 0x616   :  { %1897 = vmatmul.mubr.bf16.vlgmr.msra.gmra.mrb[60].mxu0 %v1863_v4  ;;  %1938 = vmatmul.mubr.bf16.vlgmr.msra.gmra.mrb[60].mxu1 %v1863_v4  ;;  %v5217_v4 = vld [vmem:[#allocation30_spill] sm:$0xff] }
 0x617   :  { %1970 = vmatpush1.bf16.msra.mxu0 %v3440_v22  ;;  %2011 = vmatpush1.bf16.msra.mxu1 %v3442_v23  ;;  %v1967_v10 = vmul.f32 %v3186_v42, %v1962_v59  ;;  %v5223_v42 = vld [vmem:[#allocation36_spill] sm:$0xff]  ;;  %v5224_v59 = vld [vmem:[#allocation37_spill] sm:$0xff] }
 0x618   :  { %1971 = vmatprep.subr.bf16.mxu0 %v3450_v28  ;;  %2012 = vmatprep.subr.bf16.mxu1 %v3456_v32 }
 0x619   :  { %2001 = vmatprep.mubr.bf16.mxu0 %v4924_v33  ;;  %2042 = vmatprep.mubr.bf16.mxu1 %v4924_v33  ;;  %v1968_v60 = vpack.c.bf16 %v1967_v10, %v1967_v10  ;;  %v5225_v10 = vld [vmem:[#allocation38_spill] sm:$0xff] }
 0x61b   :  { %1972 = vmatpush1.bf16.msra.mxu0 %v3452_v30  ;;  %2013 = vmatpush1.bf16.msra.mxu1 %v3454_v31 }
 0x61c   :  { %1973 = vmatprep.subr.bf16.mxu0 %v3466_v37  ;;  %2014 = vmatprep.subr.bf16.mxu1 %v3472_v41 }
 0x61f   :  { %1974 = vmatpush1.bf16.msra.mxu0 %v3468_v39  ;;  %2015 = vmatpush1.bf16.msra.mxu1 %v3470_v40 }
 0x620   :  { %1975 = vmatprep.subr.bf16.mxu0 %v3481_v45  ;;  %2016 = vmatprep.subr.bf16.mxu1 %v3487_v49 }
 0x623   :  { %1976 = vmatpush1.bf16.msra.mxu0 %v3483_v47  ;;  %2017 = vmatpush1.bf16.msra.mxu1 %v3485_v48 }
 0x624   :  { %1977 = vmatprep.subr.bf16.mxu0 %v3497_v54  ;;  %2018 = vmatprep.subr.bf16.mxu1 %v3503_v58 }
 0x627   :  { %1978 = vmatpush1.bf16.msra.mxu0 %v3499_v56  ;;  %2019 = vmatpush1.bf16.msra.mxu1 %v3501_v57 }
 0x628   :  { %1979 = vmatprep.subr.bf16.mxu0 %v3512_v62  ;;  %2020 = vmatprep.subr.bf16.mxu1 %v3518_v3 }
 0x62b   :  { %1980 = vmatpush1.bf16.msra.mxu0 %v3514_v0  ;;  %2021 = vmatpush1.bf16.msra.mxu1 %v3516_v2 }
 0x62c   :  { %1981 = vmatprep.subr.bf16.mxu0 %v3528_v9  ;;  %2022 = vmatprep.subr.bf16.mxu1 %v3534_v13 }
 0x62f   :  { %1982 = vmatpush1.bf16.msra.mxu0 %v3530_v11  ;;  %2023 = vmatpush1.bf16.msra.mxu1 %v3532_v12 }
 0x630   :  { %1983 = vmatprep.subr.bf16.mxu0 %v3543_v17  ;;  %2024 = vmatprep.subr.bf16.mxu1 %v3549_v25 }
 0x633   :  { %1984 = vmatpush1.bf16.msra.mxu0 %v3545_v19  ;;  %2025 = vmatpush1.bf16.msra.mxu1 %v3547_v21 }
 0x634   :  { %2051 = vmatprep.subr.bf16.mxu0 %v5012_v15  ;;  %2092 = vmatprep.subr.bf16.mxu1 %v5201_v24 }
 0x636   :  { %2002 = vmatmul.mubr.bf16.vlgmr.msra.gmra.mrb[64].mxu0 %v1968_v60  ;;  %2043 = vmatmul.mubr.bf16.vlgmr.msra.gmra.mrb[64].mxu1 %v1968_v60 }
 0x637   :  { %2052 = vmatpush1.bf16.msra.mxu0 %v5202_v52  ;;  %2093 = vmatpush1.bf16.msra.mxu1 %v5203_v55 }
 0x638   :  { %2053 = vmatprep.subr.bf16.mxu0 %v5204_v36  ;;  %2094 = vmatprep.subr.bf16.mxu1 %v5205_v44  ;;  %v5268_v36 = vld [vmem:[#allocation59_spill] sm:$0xff] }
 0x639   :  { %2083 = vmatprep.mubr.bf16.mxu0 %v4924_v33  ;;  %2124 = vmatprep.mubr.bf16.mxu1 %v4924_v33 }
 0x63b   :  { %2054 = vmatpush1.bf16.msra.mxu0 %v5206_v46  ;;  %2095 = vmatpush1.bf16.msra.mxu1 %v5207_v8 }
 0x63c   :  { %2055 = vmatprep.subr.bf16.mxu0 %v5208_v26  ;;  %2096 = vmatprep.subr.bf16.mxu1 %v5209_v6  ;;  %v5267_v6 = vld [vmem:[#allocation58_spill] sm:$0xff] }
 0x63f   :  { %2056 = vmatpush1.bf16.msra.mxu0 %v5210_v29  ;;  %2097 = vmatpush1.bf16.msra.mxu1 %v5211_v5  ;;  %v5266_v5 = vld [vmem:[#allocation56_spill] sm:$0xff] }
 0x640   :  { %2057 = vmatprep.subr.bf16.mxu0 %v5212_v63  ;;  %2098 = vmatprep.subr.bf16.mxu1 %v5213_v34 }
 0x643   :  { %2058 = vmatpush1.bf16.msra.mxu0 %v5214_v53  ;;  %2099 = vmatpush1.bf16.msra.mxu1 %v5215_v43  ;;  %v5226_v43 = vld [vmem:[#allocation39_spill] sm:$0xff] }
 0x644   :  { %2059 = vmatprep.subr.bf16.mxu0 %v5216_v18  ;;  %2100 = vmatprep.subr.bf16.mxu1 %v5217_v4  ;;  %v5227_v18 = vld [vmem:[#allocation40_spill] sm:$0xff]  ;;  %v5228_v4 = vld [vmem:[#allocation41_spill] sm:$0xff] }
 0x647   :  { %2060 = vmatpush1.bf16.msra.mxu0 %v5218_v20  ;;  %2101 = vmatpush1.bf16.msra.mxu1 %v5219_v14  ;;  %v5229_v20 = vld [vmem:[#allocation42_spill] sm:$0xff]  ;;  %v5230_v14 = vld [vmem:[#allocation43_spill] sm:$0xff] }
 0x648   :  { %2061 = vmatprep.subr.bf16.mxu0 %v5220_v51  ;;  %2102 = vmatprep.subr.bf16.mxu1 %v5221_v38  ;;  %v5231_v51 = vld [vmem:[#allocation44_spill] sm:$0xff]  ;;  %v5232_v38 = vld [vmem:[#allocation13_spill] sm:$0xff] }
 0x64b   :  { %2062 = vmatpush1.bf16.msra.mxu0 %v5222_v1  ;;  %2103 = vmatpush1.bf16.msra.mxu1 %v5223_v42  ;;  %v5233_v1 = vld [vmem:[#allocation45_spill] sm:$0xff] }
 0x64c   :  { %2063 = vmatprep.subr.bf16.mxu0 %v5224_v59  ;;  %2104 = vmatprep.subr.bf16.mxu1 %v5225_v10  ;;  %v5234_v59 = vld [vmem:[#allocation46_spill] sm:$0xff]  ;;  %v5235_v10 = vld [vmem:[#allocation47_spill] sm:$0xff] }
 0x64f   :  { %2064 = vmatpush1.bf16.msra.mxu0 %v5226_v43  ;;  %2105 = vmatpush1.bf16.msra.mxu1 %v5227_v18  ;;  %v5236_v43 = vld [vmem:[#allocation69_spill] sm:$0xff]  ;;  %v5237_v18 = vld [vmem:[#allocation70_spill] sm:$0xff] }
 0x650   :  { %2065 = vmatprep.subr.bf16.mxu0 %v5228_v4  ;;  %2106 = vmatprep.subr.bf16.mxu1 %v5229_v20  ;;  %v5247_v20 = vld [vmem:[#allocation79_spill] sm:$0xff]  ;;  %v5248_v4 = vld [vmem:[#allocation80_spill] sm:$0xff] }
 0x653   :  { %2066 = vmatpush1.bf16.msra.mxu0 %v5230_v14  ;;  %2107 = vmatpush1.bf16.msra.mxu1 %v5231_v51  ;;  %v5238_v14 = vld [vmem:[#allocation71_spill] sm:$0xff]  ;;  %v5239_v51 = vld [vmem:[#allocation72_spill] sm:$0xff] }
 0x654   :  { %2160 = vmatprep.subr.bf16.mxu0 %v5232_v38  ;;  %2201 = vmatprep.subr.bf16.mxu1 %v5233_v1  ;;  %v5240_v38 = vld [vmem:[#allocation73_spill] sm:$0xff] }
 0x655   :  { %v5241_v1 = vld [vmem:[#allocation49_spill] sm:$0xff] }
 0x656   :  { %2084 = vmatmul.mubr.bf16.vlgmr.msra.gmra.mrb[68].mxu0 %v1968_v60  ;;  %2125 = vmatmul.mubr.bf16.vlgmr.msra.gmra.mrb[68].mxu1 %v1968_v60  ;;  %v5242_v60 = vld [vmem:[#allocation74_spill] sm:$0xff] }
 0x657   :  { %2161 = vmatpush1.bf16.msra.mxu0 %v5234_v59  ;;  %2202 = vmatpush1.bf16.msra.mxu1 %v5235_v10  ;;  %v5243_v59 = vld [vmem:[#allocation75_spill] sm:$0xff]  ;;  %v5244_v10 = vld [vmem:[#allocation76_spill] sm:$0xff] }
 0x658   :  { %2162 = vmatprep.subr.bf16.mxu0 %v5236_v43  ;;  %2203 = vmatprep.subr.bf16.mxu1 %v5237_v18  ;;  %v5245_v43 = vld [vmem:[#allocation77_spill] sm:$0xff]  ;;  %v5246_v18 = vld [vmem:[#allocation78_spill] sm:$0xff] }
 0x659   :  { %2192 = vmatprep.mubr.bf16.mxu0 %v4924_v33  ;;  %2233 = vmatprep.mubr.bf16.mxu1 %v4924_v33 }
 0x65b   :  { %2163 = vmatpush1.bf16.msra.mxu0 %v5238_v14  ;;  %2204 = vmatpush1.bf16.msra.mxu1 %v5239_v51  ;;  %v5249_v14 = vld [vmem:[#allocation81_spill] sm:$0xff]  ;;  %v5250_v51 = vld [vmem:[#allocation82_spill] sm:$0xff] }
 0x65c   :  { %2164 = vmatprep.subr.bf16.mxu0 %v5240_v38  ;;  %2205 = vmatprep.subr.bf16.mxu1 %v5241_v1  ;;  %v5251_v38 = vld [vmem:[#allocation83_spill] sm:$0xff]  ;;  %v5252_v1 = vld [vmem:[#allocation84_spill] sm:$0xff] }
 0x65f   :  { %2165 = vmatpush1.bf16.msra.mxu0 %v5242_v60  ;;  %2206 = vmatpush1.bf16.msra.mxu1 %v5243_v59  ;;  %v5253_v60 = vld [vmem:[#allocation85_spill] sm:$0xff]  ;;  %v5254_v59 = vld [vmem:[#allocation86_spill] sm:$0xff] }
 0x660   :  { %2166 = vmatprep.subr.bf16.mxu0 %v5244_v10  ;;  %2207 = vmatprep.subr.bf16.mxu1 %v5245_v43  ;;  %v5255_v10 = vld [vmem:[#allocation87_spill] sm:$0xff]  ;;  %v5256_v43 = vld [vmem:[#allocation88_spill] sm:$0xff] }
 0x663   :  { %2167 = vmatpush1.bf16.msra.mxu0 %v5246_v18  ;;  %2208 = vmatpush1.bf16.msra.mxu1 %v5247_v20  ;;  %v5257_v18 = vld [vmem:[#allocation89_spill] sm:$0xff]  ;;  %v5258_v20 = vld [vmem:[#allocation90_spill] sm:$0xff] }
 0x664   :  { %2168 = vmatprep.subr.bf16.mxu0 %v5248_v4  ;;  %2209 = vmatprep.subr.bf16.mxu1 %v5249_v14  ;;  %v5259_v4 = vld [vmem:[#allocation91_spill] sm:$0xff]  ;;  %v5260_v14 = vld [vmem:[#allocation92_spill] sm:$0xff] }
 0x667   :  { %2169 = vmatpush1.bf16.msra.mxu0 %v5250_v51  ;;  %2210 = vmatpush1.bf16.msra.mxu1 %v5251_v38  ;;  %v5261_v51 = vld [vmem:[#allocation93_spill] sm:$0xff]  ;;  %v5262_v38 = vld [vmem:[#allocation94_spill] sm:$0xff] }
 0x668   :  { %2170 = vmatprep.subr.bf16.mxu0 %v5252_v1  ;;  %2211 = vmatprep.subr.bf16.mxu1 %v5253_v60  ;;  %v5263_v1 = vld [vmem:[#allocation95_spill] sm:$0xff] }
 0x669   :  { %v5264_v60 = vld [vmem:[#allocation11_spill] sm:$0xff] }
 0x66b   :  { %2171 = vmatpush1.bf16.msra.mxu0 %v5254_v59  ;;  %2212 = vmatpush1.bf16.msra.mxu1 %v5255_v10  ;;  %v5265_v59 = vld [vmem:[#allocation12_spill] sm:$0xff] }
 0x66c   :  { %2172 = vmatprep.subr.bf16.mxu0 %v5256_v43  ;;  %2213 = vmatprep.subr.bf16.mxu1 %v5257_v18 }
 0x66f   :  { %2173 = vmatpush1.bf16.msra.mxu0 %v5258_v20  ;;  %2214 = vmatpush1.bf16.msra.mxu1 %v5259_v4 }
 0x670   :  { %2174 = vmatprep.subr.bf16.mxu0 %v5260_v14  ;;  %2215 = vmatprep.subr.bf16.mxu1 %v5261_v51 }
 0x673   :  { %2175 = vmatpush1.bf16.msra.mxu0 %v5262_v38  ;;  %2216 = vmatpush1.bf16.msra.mxu1 %v5263_v1 }
 0x674   :  { %2265 = vmatprep.subr.bf16.mxu0 %v5264_v60  ;;  %2306 = vmatprep.subr.bf16.mxu1 %v5265_v59 }
 0x6e9   :  { %v1898_v10 = vpop.f32.mrb[60].mxu0  ;;  %v1939_v43 = vpop.f32.mrb[60].mxu1 }
 0x6ea   :  { %v1900_v42 = vpop.f32.mrb[61].mxu0  ;;  %v1941_v18 = vpop.f32.mrb[61].mxu1 }
 0x6eb   :  { %v1902_v53 = vpop.f32.mrb[62].mxu0  ;;  %v1943_v20 = vpop.f32.mrb[62].mxu1 }
 0x6ec   :  { %v1903_v34 = vpop.f32.mrb[63].mxu0  ;;  %v1944_v4 = vpop.f32.mrb[63].mxu1 }
 0x709   :  { %v2003_v63 = vpop.f32.mrb[64].mxu0  ;;  %v2044_v14 = vpop.f32.mrb[64].mxu1 }
 0x70a   :  { %v2242_v51 = vadd.f32 %v2003_v63, %v5266_v5  ;;  %v2005_v29 = vpop.f32.mrb[65].mxu0  ;;  %v2046_v38 = vpop.f32.mrb[65].mxu1  ;;  %v2244_v53 = vadd.f32 %v2044_v14, %v5268_v36 }
 0x70b   :  { %v2243_v1 = vadd.f32 %v2005_v29, %v5267_v6  ;;  %v2007_v26 = vpop.f32.mrb[66].mxu0  ;;  %v2048_v60 = vpop.f32.mrb[66].mxu1 }
 0x70c   :  { %v2246_v8 = vmul.f32 0.5, %v2242_v51  ;;  %v2008_v59 = vpop.f32.mrb[67].mxu0  ;;  %v2049_v46 = vpop.f32.mrb[67].mxu1 }
 0x70d   :  { %v2250_v44 = vmul.f32 0.5, %v2243_v1 }
 0x70e   :  { %3187 = vtanh.f32 %v2246_v8 }
 0x70f   :  { %3189 = vtanh.f32 %v2250_v44 }
 0x710   :  { %3191 = vtanh.f32 %v2244_v53 }
 0x718   :  { %v3188_v34 = vpop.eup %3187 }
 0x719   :  { %v3190_v4 = vpop.eup %3189  ;;  %v2248_v20 = vadd.f32 1.0, %v3188_v34 }
 0x71a   :  { %v2252_v55 = vadd.f32 1.0, %v3190_v4  ;;  %v3192_v63 = vpop.eup %3191 }
 0x71b   :  { %v2249_v5 = vmul.f32 0.5, %v2248_v20 }
 0x71c   :  { %v2253_v52 = vmul.f32 0.5, %v2252_v55 }
 0x71d   :  { %v2260_v24 = vmul.f32 %v3192_v63, %v2249_v5 }
 0x71e   :  { %v2259_v26 = vmul.f32 %v2253_v52, %v4329_v7 }
 0x720   :  { %v4447_v6 = vadd.f32 %v2260_v24, %v2259_v26 }
 0x729   :  { %v2085_v29 = vpop.f32.mrb[68].mxu0  ;;  %v2126_v46 = vpop.f32.mrb[68].mxu1 }
 0x72a   :  { %v2133_v51 = vadd.f32 %v2085_v29, %v1898_v10  ;;  %v2135_v8 = vadd.f32 %v2126_v46, %v1939_v43  ;;  %v2087_v1 = vpop.f32.mrb[69].mxu0  ;;  %v2128_v36 = vpop.f32.mrb[69].mxu1 }
 0x72b   :  { %v2134_v44 = vadd.f32 %v2087_v1, %v1900_v42  ;;  %v2136_v14 = vadd.f32 %v2128_v36, %v1941_v18  ;;  %v2089_v59 = vpop.f32.mrb[70].mxu0  ;;  %v2130_v60 = vpop.f32.mrb[70].mxu1 }
 0x72c   :  { %v2137_v53 = vadd.f32 %v2133_v51, %v5062_v16  ;;  %v2090_v34 = vpop.f32.mrb[71].mxu0  ;;  %v2131_v4 = vpop.f32.mrb[71].mxu1  ;;  %v2139_v24 = vadd.f32 %v2135_v8, %v5064_v27 }
 0x72d   :  { %v2138_v55 = vadd.f32 %v2134_v44, %v5063_v61  ;;  %v2140_v52 = vadd.f32 %v2136_v14, %v5065_v35 }
 0x72e   :  { %v2141_v20 = vmul.f32 0.5, %v2137_v53  ;;  %v5269_v53 = vld [vmem:[#allocation60_spill] sm:$0xff] }
 0x72f   :  { %v2145_v7 = vmul.f32 0.5, %v2138_v55  ;;  %v2150_v43 = vmul.f32 0.5, %v2140_v52  ;;  %v2245_v34 = vadd.f32 %v2046_v38, %v5269_v53  ;;  %v5270_v52 = vld [vmem:[#allocation16_spill] sm:$0xff]  ;;  %v5287_v53 = vld [vmem:[#allocation31_spill] sm:$0xff] }
 0x730   :  { %3193 = vtanh.f32 %v2141_v20 }
 0x731   :  { %3195 = vtanh.f32 %v2145_v7 }
 0x732   :  { %3197 = vtanh.f32 %v2139_v24 }
 0x733   :  { %3199 = vtanh.f32 %v2150_v43  ;;  %v5271_v43 = vld [vmem:[#allocation14_spill] sm:$0xff] }
 0x73a   :  { %v3194_v42 = vpop.eup %3193 }
 0x73b   :  { %v3196_v18 = vpop.eup %3195  ;;  %v2143_v10 = vadd.f32 1.0, %v3194_v42  ;;  %v5272_v42 = vld [vmem:[#allocation15_spill] sm:$0xff] }
 0x73c   :  { %v2147_v5 = vadd.f32 1.0, %v3196_v18  ;;  %v3198_v26 = vpop.eup %3197  ;;  %v5273_v18 = vld [vmem:[#allocation17_spill] sm:$0xff] }
 0x73d   :  { %v2144_v63 = vmul.f32 0.5, %v2143_v10  ;;  %v3200_v8 = vpop.eup %3199  ;;  %v5274_v10 = vld [vmem:[#allocation18_spill] sm:$0xff] }
 0x73e   :  { %v2148_v29 = vmul.f32 0.5, %v2147_v5  ;;  %v2152_v36 = vadd.f32 1.0, %v3200_v8  ;;  %v5275_v5 = vld [vmem:[#allocation19_spill] sm:$0xff]  ;;  %v5281_v8 = vld [vmem:[#allocation25_spill] sm:$0xff] }
 0x73f   :  { %v2155_v46 = vmul.f32 %v3198_v26, %v2144_v63  ;;  %v5276_v63 = vld [vmem:[#allocation20_spill] sm:$0xff]  ;;  %v5277_v26 = vld [vmem:[#allocation21_spill] sm:$0xff] }
 0x740   :  { %v2154_v51 = vmul.f32 %v2148_v29, %v4336_v50  ;;  %v2153_v44 = vmul.f32 0.5, %v2152_v36  ;;  %v2255_v50 = vmul.f32 0.5, %v2245_v34  ;;  %v5278_v29 = vld [vmem:[#allocation22_spill] sm:$0xff]  ;;  %v5288_v34 = vld [vmem:[#allocation32_spill] sm:$0xff] }
 0x741   :  { %v5282_v36 = vld [vmem:[#allocation26_spill] sm:$0xff] }
 0x742   :  { %v4454_v1 = vadd.f32 %v2155_v46, %v2154_v51  ;;  %v5279_v46 = vld [vmem:[#allocation23_spill] sm:$0xff]  ;;  %v5280_v51 = vld [vmem:[#allocation24_spill] sm:$0xff] }
 0x744   :  { %3201 = vtanh.f32 %v4454_v1 }
 0x745   :  { %3203 = vtanh.f32 %v2255_v50  ;;  %v5289_v50 = vld [vmem:[#allocation33_spill] sm:$0xff] }
 0x746   :  { %3205 = vtanh.f32 %v4447_v6 }
 0x74e   :  { %v3202_v14 = vpop.eup %3201 }
 0x74f   :  { %v2158_v59 = vmul.f32 %v3202_v14, %v2153_v44  ;;  %v3204_v38 = vpop.eup %3203  ;;  %v5283_v44 = vld [vmem:[#allocation27_spill] sm:$0xff]  ;;  %v5284_v14 = vld [vmem:[#allocation28_spill] sm:$0xff] }
 0x750   :  { %v2257_v4 = vadd.f32 1.0, %v3204_v38  ;;  %v3206_v55 = vpop.eup %3205  ;;  %v5290_v38 = vld [vmem:[#allocation34_spill] sm:$0xff] }
 0x751   :  { %v2159_v60 = vpack.c.bf16 %v2158_v59, %v2158_v59  ;;  %v5285_v59 = vld [vmem:[#allocation29_spill] sm:$0xff] }
 0x752   :  { %v2258_v20 = vmul.f32 0.5, %v2257_v4  ;;  %v5291_v4 = vld [vmem:[#allocation35_spill] sm:$0xff] }
 0x753   :  { %2193 = vmatmul.mubr.bf16.vlgmr.msra.gmra.mrb[72].mxu0 %v2159_v60  ;;  %2234 = vmatmul.mubr.bf16.vlgmr.msra.gmra.mrb[72].mxu1 %v2159_v60  ;;  %v5286_v60 = vld [vmem:[#allocation30_spill] sm:$0xff] }
 0x754   :  { %2266 = vmatpush1.bf16.msra.mxu0 %v3440_v22  ;;  %2307 = vmatpush1.bf16.msra.mxu1 %v3442_v23  ;;  %v2263_v7 = vmul.f32 %v3206_v55, %v2258_v20  ;;  %v5292_v55 = vld [vmem:[#allocation36_spill] sm:$0xff]  ;;  %v5293_v20 = vld [vmem:[#allocation37_spill] sm:$0xff] }
 0x755   :  { %2267 = vmatprep.subr.bf16.mxu0 %v3450_v28  ;;  %2308 = vmatprep.subr.bf16.mxu1 %v3456_v32 }
 0x756   :  { %2297 = vmatprep.mubr.bf16.mxu0 %v4924_v33  ;;  %2338 = vmatprep.mubr.bf16.mxu1 %v4924_v33  ;;  %v2264_v24 = vpack.c.bf16 %v2263_v7, %v2263_v7  ;;  %v5294_v7 = vld [vmem:[#allocation38_spill] sm:$0xff] }
 0x758   :  { %2268 = vmatpush1.bf16.msra.mxu0 %v3452_v30  ;;  %2309 = vmatpush1.bf16.msra.mxu1 %v3454_v31 }
 0x759   :  { %2269 = vmatprep.subr.bf16.mxu0 %v3466_v37  ;;  %2310 = vmatprep.subr.bf16.mxu1 %v3472_v41 }
 0x75c   :  { %2270 = vmatpush1.bf16.msra.mxu0 %v3468_v39  ;;  %2311 = vmatpush1.bf16.msra.mxu1 %v3470_v40 }
 0x75d   :  { %2271 = vmatprep.subr.bf16.mxu0 %v3481_v45  ;;  %2312 = vmatprep.subr.bf16.mxu1 %v3487_v49 }
 0x760   :  { %2272 = vmatpush1.bf16.msra.mxu0 %v3483_v47  ;;  %2313 = vmatpush1.bf16.msra.mxu1 %v3485_v48 }
 0x761   :  { %2273 = vmatprep.subr.bf16.mxu0 %v3497_v54  ;;  %2314 = vmatprep.subr.bf16.mxu1 %v3503_v58 }
 0x764   :  { %2274 = vmatpush1.bf16.msra.mxu0 %v3499_v56  ;;  %2315 = vmatpush1.bf16.msra.mxu1 %v3501_v57 }
 0x765   :  { %2275 = vmatprep.subr.bf16.mxu0 %v3512_v62  ;;  %2316 = vmatprep.subr.bf16.mxu1 %v3518_v3 }
 0x768   :  { %2276 = vmatpush1.bf16.msra.mxu0 %v3514_v0  ;;  %2317 = vmatpush1.bf16.msra.mxu1 %v3516_v2 }
 0x769   :  { %2277 = vmatprep.subr.bf16.mxu0 %v3528_v9  ;;  %2318 = vmatprep.subr.bf16.mxu1 %v3534_v13 }
 0x76c   :  { %2278 = vmatpush1.bf16.msra.mxu0 %v3530_v11  ;;  %2319 = vmatpush1.bf16.msra.mxu1 %v3532_v12 }
 0x76d   :  { %2279 = vmatprep.subr.bf16.mxu0 %v3543_v17  ;;  %2320 = vmatprep.subr.bf16.mxu1 %v3549_v25 }
 0x770   :  { %2280 = vmatpush1.bf16.msra.mxu0 %v3545_v19  ;;  %2321 = vmatpush1.bf16.msra.mxu1 %v3547_v21 }
 0x771   :  { %2347 = vmatprep.subr.bf16.mxu0 %v5012_v15  ;;  %2388 = vmatprep.subr.bf16.mxu1 %v5270_v52 }
 0x773   :  { %2298 = vmatmul.mubr.bf16.vlgmr.msra.gmra.mrb[76].mxu0 %v2264_v24  ;;  %2339 = vmatmul.mubr.bf16.vlgmr.msra.gmra.mrb[76].mxu1 %v2264_v24 }
 0x774   :  { %2348 = vmatpush1.bf16.msra.mxu0 %v5271_v43  ;;  %2389 = vmatpush1.bf16.msra.mxu1 %v5272_v42 }
 0x775   :  { %2349 = vmatprep.subr.bf16.mxu0 %v5273_v18  ;;  %2390 = vmatprep.subr.bf16.mxu1 %v5274_v10  ;;  %v5337_v18 = vld [vmem:[#allocation63_spill] sm:$0xff] }
 0x776   :  { %2379 = vmatprep.mubr.bf16.mxu0 %v4924_v33  ;;  %2420 = vmatprep.mubr.bf16.mxu1 %v4924_v33 }
 0x778   :  { %2350 = vmatpush1.bf16.msra.mxu0 %v5275_v5  ;;  %2391 = vmatpush1.bf16.msra.mxu1 %v5276_v63 }
 0x779   :  { %2351 = vmatprep.subr.bf16.mxu0 %v5277_v26  ;;  %2392 = vmatprep.subr.bf16.mxu1 %v5278_v29  ;;  %v5336_v29 = vld [vmem:[#allocation62_spill] sm:$0xff] }
 0x77c   :  { %2352 = vmatpush1.bf16.msra.mxu0 %v5279_v46  ;;  %2393 = vmatpush1.bf16.msra.mxu1 %v5280_v51  ;;  %v5335_v51 = vld [vmem:[#allocation61_spill] sm:$0xff] }
 0x77d   :  { %2353 = vmatprep.subr.bf16.mxu0 %v5281_v8  ;;  %2394 = vmatprep.subr.bf16.mxu1 %v5282_v36 }
 0x780   :  { %2354 = vmatpush1.bf16.msra.mxu0 %v5283_v44  ;;  %2395 = vmatpush1.bf16.msra.mxu1 %v5284_v14  ;;  %v5295_v14 = vld [vmem:[#allocation39_spill] sm:$0xff] }
 0x781   :  { %2355 = vmatprep.subr.bf16.mxu0 %v5285_v59  ;;  %2396 = vmatprep.subr.bf16.mxu1 %v5286_v60  ;;  %v5296_v59 = vld [vmem:[#allocation40_spill] sm:$0xff]  ;;  %v5297_v60 = vld [vmem:[#allocation41_spill] sm:$0xff] }
 0x784   :  { %2356 = vmatpush1.bf16.msra.mxu0 %v5287_v53  ;;  %2397 = vmatpush1.bf16.msra.mxu1 %v5288_v34  ;;  %v5298_v53 = vld [vmem:[#allocation42_spill] sm:$0xff]  ;;  %v5299_v34 = vld [vmem:[#allocation43_spill] sm:$0xff] }
 0x785   :  { %2357 = vmatprep.subr.bf16.mxu0 %v5289_v50  ;;  %2398 = vmatprep.subr.bf16.mxu1 %v5290_v38  ;;  %v5300_v50 = vld [vmem:[#allocation44_spill] sm:$0xff]  ;;  %v5301_v38 = vld [vmem:[#allocation13_spill] sm:$0xff] }
 0x788   :  { %2358 = vmatpush1.bf16.msra.mxu0 %v5291_v4  ;;  %2399 = vmatpush1.bf16.msra.mxu1 %v5292_v55  ;;  %v5302_v4 = vld [vmem:[#allocation45_spill] sm:$0xff] }
 0x789   :  { %2359 = vmatprep.subr.bf16.mxu0 %v5293_v20  ;;  %2400 = vmatprep.subr.bf16.mxu1 %v5294_v7  ;;  %v5303_v20 = vld [vmem:[#allocation46_spill] sm:$0xff]  ;;  %v5304_v7 = vld [vmem:[#allocation47_spill] sm:$0xff] }
 0x78c   :  { %2360 = vmatpush1.bf16.msra.mxu0 %v5295_v14  ;;  %2401 = vmatpush1.bf16.msra.mxu1 %v5296_v59  ;;  %v5305_v14 = vld [vmem:[#allocation69_spill] sm:$0xff]  ;;  %v5306_v59 = vld [vmem:[#allocation70_spill] sm:$0xff] }
 0x78d   :  { %2361 = vmatprep.subr.bf16.mxu0 %v5297_v60  ;;  %2402 = vmatprep.subr.bf16.mxu1 %v5298_v53  ;;  %v5316_v53 = vld [vmem:[#allocation79_spill] sm:$0xff]  ;;  %v5317_v60 = vld [vmem:[#allocation80_spill] sm:$0xff] }
 0x790   :  { %2362 = vmatpush1.bf16.msra.mxu0 %v5299_v34  ;;  %2403 = vmatpush1.bf16.msra.mxu1 %v5300_v50  ;;  %v5307_v34 = vld [vmem:[#allocation71_spill] sm:$0xff]  ;;  %v5308_v50 = vld [vmem:[#allocation72_spill] sm:$0xff] }
 0x791   :  { %2456 = vmatprep.subr.bf16.mxu0 %v5301_v38  ;;  %2497 = vmatprep.subr.bf16.mxu1 %v5302_v4  ;;  %v5309_v38 = vld [vmem:[#allocation73_spill] sm:$0xff] }
 0x792   :  { %v5310_v4 = vld [vmem:[#allocation49_spill] sm:$0xff] }
 0x793   :  { %2380 = vmatmul.mubr.bf16.vlgmr.msra.gmra.mrb[80].mxu0 %v2264_v24  ;;  %2421 = vmatmul.mubr.bf16.vlgmr.msra.gmra.mrb[80].mxu1 %v2264_v24  ;;  %v5311_v24 = vld [vmem:[#allocation74_spill] sm:$0xff] }
 0x794   :  { %2457 = vmatpush1.bf16.msra.mxu0 %v5303_v20  ;;  %2498 = vmatpush1.bf16.msra.mxu1 %v5304_v7  ;;  %v5312_v20 = vld [vmem:[#allocation75_spill] sm:$0xff]  ;;  %v5313_v7 = vld [vmem:[#allocation76_spill] sm:$0xff] }
 0x795   :  { %2458 = vmatprep.subr.bf16.mxu0 %v5305_v14  ;;  %2499 = vmatprep.subr.bf16.mxu1 %v5306_v59  ;;  %v5314_v14 = vld [vmem:[#allocation77_spill] sm:$0xff]  ;;  %v5315_v59 = vld [vmem:[#allocation78_spill] sm:$0xff] }
 0x796   :  { %2488 = vmatprep.mubr.bf16.mxu0 %v4924_v33  ;;  %2529 = vmatprep.mubr.bf16.mxu1 %v4924_v33 }
 0x798   :  { %2459 = vmatpush1.bf16.msra.mxu0 %v5307_v34  ;;  %2500 = vmatpush1.bf16.msra.mxu1 %v5308_v50  ;;  %v5318_v34 = vld [vmem:[#allocation81_spill] sm:$0xff]  ;;  %v5319_v50 = vld [vmem:[#allocation82_spill] sm:$0xff] }
 0x799   :  { %2460 = vmatprep.subr.bf16.mxu0 %v5309_v38  ;;  %2501 = vmatprep.subr.bf16.mxu1 %v5310_v4  ;;  %v5320_v38 = vld [vmem:[#allocation83_spill] sm:$0xff]  ;;  %v5321_v4 = vld [vmem:[#allocation84_spill] sm:$0xff] }
 0x79c   :  { %2461 = vmatpush1.bf16.msra.mxu0 %v5311_v24  ;;  %2502 = vmatpush1.bf16.msra.mxu1 %v5312_v20  ;;  %v5322_v24 = vld [vmem:[#allocation85_spill] sm:$0xff]  ;;  %v5323_v20 = vld [vmem:[#allocation86_spill] sm:$0xff] }
 0x79d   :  { %2462 = vmatprep.subr.bf16.mxu0 %v5313_v7  ;;  %2503 = vmatprep.subr.bf16.mxu1 %v5314_v14  ;;  %v5324_v7 = vld [vmem:[#allocation87_spill] sm:$0xff]  ;;  %v5325_v14 = vld [vmem:[#allocation88_spill] sm:$0xff] }
 0x7a0   :  { %2463 = vmatpush1.bf16.msra.mxu0 %v5315_v59  ;;  %2504 = vmatpush1.bf16.msra.mxu1 %v5316_v53  ;;  %v5326_v59 = vld [vmem:[#allocation89_spill] sm:$0xff]  ;;  %v5327_v53 = vld [vmem:[#allocation90_spill] sm:$0xff] }
 0x7a1   :  { %2464 = vmatprep.subr.bf16.mxu0 %v5317_v60  ;;  %2505 = vmatprep.subr.bf16.mxu1 %v5318_v34  ;;  %v5328_v60 = vld [vmem:[#allocation91_spill] sm:$0xff]  ;;  %v5329_v34 = vld [vmem:[#allocation92_spill] sm:$0xff] }
 0x7a4   :  { %2465 = vmatpush1.bf16.msra.mxu0 %v5319_v50  ;;  %2506 = vmatpush1.bf16.msra.mxu1 %v5320_v38  ;;  %v5330_v50 = vld [vmem:[#allocation93_spill] sm:$0xff]  ;;  %v5331_v38 = vld [vmem:[#allocation94_spill] sm:$0xff] }
 0x7a5   :  { %2466 = vmatprep.subr.bf16.mxu0 %v5321_v4  ;;  %2507 = vmatprep.subr.bf16.mxu1 %v5322_v24  ;;  %v5332_v4 = vld [vmem:[#allocation95_spill] sm:$0xff] }
 0x7a6   :  { %v5333_v24 = vld [vmem:[#allocation11_spill] sm:$0xff] }
 0x7a8   :  { %2467 = vmatpush1.bf16.msra.mxu0 %v5323_v20  ;;  %2508 = vmatpush1.bf16.msra.mxu1 %v5324_v7  ;;  %v5334_v20 = vld [vmem:[#allocation12_spill] sm:$0xff] }
 0x7a9   :  { %2468 = vmatprep.subr.bf16.mxu0 %v5325_v14  ;;  %2509 = vmatprep.subr.bf16.mxu1 %v5326_v59 }
 0x7ac   :  { %2469 = vmatpush1.bf16.msra.mxu0 %v5327_v53  ;;  %2510 = vmatpush1.bf16.msra.mxu1 %v5328_v60 }
 0x7ad   :  { %2470 = vmatprep.subr.bf16.mxu0 %v5329_v34  ;;  %2511 = vmatprep.subr.bf16.mxu1 %v5330_v50 }
 0x7b0   :  { %2471 = vmatpush1.bf16.msra.mxu0 %v5331_v38  ;;  %2512 = vmatpush1.bf16.msra.mxu1 %v5332_v4 }
 0x7b1   :  { %2561 = vmatprep.subr.bf16.mxu0 %v5333_v24  ;;  %2602 = vmatprep.subr.bf16.mxu1 %v5334_v20 }
 0x826   :  { %v2194_v7 = vpop.f32.mrb[72].mxu0  ;;  %v2235_v14 = vpop.f32.mrb[72].mxu1 }
 0x827   :  { %v2196_v55 = vpop.f32.mrb[73].mxu0  ;;  %v2237_v59 = vpop.f32.mrb[73].mxu1 }
 0x828   :  { %v2198_v44 = vpop.f32.mrb[74].mxu0  ;;  %v2239_v53 = vpop.f32.mrb[74].mxu1 }
 0x829   :  { %v2199_v36 = vpop.f32.mrb[75].mxu0  ;;  %v2240_v60 = vpop.f32.mrb[75].mxu1 }
 0x846   :  { %v2299_v8 = vpop.f32.mrb[76].mxu0  ;;  %v2340_v34 = vpop.f32.mrb[76].mxu1 }
 0x847   :  { %v2538_v50 = vadd.f32 %v2299_v8, %v5335_v51  ;;  %v2301_v46 = vpop.f32.mrb[77].mxu0  ;;  %v2342_v38 = vpop.f32.mrb[77].mxu1  ;;  %v2540_v44 = vadd.f32 %v2340_v34, %v5337_v18 }
 0x848   :  { %v2539_v4 = vadd.f32 %v2301_v46, %v5336_v29  ;;  %v2303_v26 = vpop.f32.mrb[78].mxu0  ;;  %v2344_v24 = vpop.f32.mrb[78].mxu1 }
 0x849   :  { %v2542_v63 = vmul.f32 0.5, %v2538_v50  ;;  %v2304_v20 = vpop.f32.mrb[79].mxu0  ;;  %v2345_v5 = vpop.f32.mrb[79].mxu1 }
 0x84a   :  { %v2546_v10 = vmul.f32 0.5, %v2539_v4 }
 0x84b   :  { %3207 = vtanh.f32 %v2542_v63 }
 0x84c   :  { %3209 = vtanh.f32 %v2546_v10 }
 0x84d   :  { %3211 = vtanh.f32 %v2540_v44 }
 0x855   :  { %v3208_v36 = vpop.eup %3207 }
 0x856   :  { %v3210_v53 = vpop.eup %3209  ;;  %v2544_v60 = vadd.f32 1.0, %v3208_v36 }
 0x857   :  { %v2548_v42 = vadd.f32 1.0, %v3210_v53  ;;  %v3212_v8 = vpop.eup %3211 }
 0x858   :  { %v2545_v51 = vmul.f32 0.5, %v2544_v60 }
 0x859   :  { %v2549_v43 = vmul.f32 0.5, %v2548_v42 }
 0x85a   :  { %v2556_v52 = vmul.f32 %v3212_v8, %v2545_v51 }
 0x85b   :  { %v2555_v26 = vmul.f32 %v2549_v43, %v4447_v6 }
 0x85d   :  { %v4565_v29 = vadd.f32 %v2556_v52, %v2555_v26 }
 0x866   :  { %v2381_v46 = vpop.f32.mrb[80].mxu0  ;;  %v2422_v5 = vpop.f32.mrb[80].mxu1 }
 0x867   :  { %v2429_v50 = vadd.f32 %v2381_v46, %v2194_v7  ;;  %v2431_v63 = vadd.f32 %v2422_v5, %v2235_v14  ;;  %v2383_v4 = vpop.f32.mrb[81].mxu0  ;;  %v2424_v18 = vpop.f32.mrb[81].mxu1 }
 0x868   :  { %v2430_v10 = vadd.f32 %v2383_v4, %v2196_v55  ;;  %v2432_v34 = vadd.f32 %v2424_v18, %v2237_v59  ;;  %v2385_v24 = vpop.f32.mrb[82].mxu0  ;;  %v2426_v20 = vpop.f32.mrb[82].mxu1 }
 0x869   :  { %v2433_v44 = vadd.f32 %v2429_v50, %v5062_v16  ;;  %v2386_v36 = vpop.f32.mrb[83].mxu0  ;;  %v2427_v53 = vpop.f32.mrb[83].mxu1  ;;  %v2435_v52 = vadd.f32 %v2431_v63, %v5064_v27 }
 0x86a   :  { %v2434_v42 = vadd.f32 %v2430_v10, %v5063_v61  ;;  %v2436_v43 = vadd.f32 %v2432_v34, %v5065_v35  ;;  %v5364_v53 = vld [vmem:[#allocation39_spill] sm:$0xff] }
 0x86b   :  { %v2437_v60 = vmul.f32 0.5, %v2433_v44  ;;  %v5338_v44 = vld [vmem:[#allocation65_spill] sm:$0xff] }
 0x86c   :  { %v2441_v6 = vmul.f32 0.5, %v2434_v42  ;;  %v2446_v7 = vmul.f32 0.5, %v2436_v43  ;;  %v2541_v36 = vadd.f32 %v2342_v38, %v5338_v44  ;;  %v5363_v38 = vld [vmem:[#allocation38_spill] sm:$0xff]  ;;  %v5365_v42 = vld [vmem:[#allocation40_spill] sm:$0xff] }
 0x86d   :  { %3213 = vtanh.f32 %v2437_v60  ;;  %v5366_v60 = vld [vmem:[#allocation41_spill] sm:$0xff]  ;;  %v5369_v43 = vld [vmem:[#allocation44_spill] sm:$0xff] }
 0x86e   :  { %3215 = vtanh.f32 %v2441_v6  ;;  %v5367_v6 = vld [vmem:[#allocation42_spill] sm:$0xff]  ;;  %v3305_v44 = vld [vmem:[#allocation2 + $0x88] sm:$0xff] }
 0x86f   :  { %3217 = vtanh.f32 %v2435_v52  ;;  %v5368_v52 = vld [vmem:[#allocation43_spill] sm:$0xff] }
 0x870   :  { %3219 = vtanh.f32 %v2446_v7  ;;  %v3289_v7 = vld [vmem:[#allocation2 + $0x8] sm:$0xff] }
 0x877   :  { %v3214_v55 = vpop.eup %3213 }
 0x878   :  { %v3216_v14 = vpop.eup %3215  ;;  %v2439_v59 = vadd.f32 1.0, %v3214_v55  ;;  %v3290_v55 = vld [vmem:[#allocation2 + $0x18] sm:$0xff] }
 0x879   :  { %v2443_v51 = vadd.f32 1.0, %v3216_v14  ;;  %v3218_v26 = vpop.eup %3217  ;;  %v3291_v14 = vld [vmem:[#allocation2] sm:$0xff] }
 0x87a   :  { %v2440_v8 = vmul.f32 0.5, %v2439_v59  ;;  %v3220_v63 = vpop.eup %3219  ;;  %v3292_v59 = vld [vmem:[#allocation2 + $0x10] sm:$0xff] }
 0x87b   :  { %v2444_v46 = vmul.f32 0.5, %v2443_v51  ;;  %v2448_v18 = vadd.f32 1.0, %v3220_v63  ;;  %v3293_v51 = vld [vmem:[#allocation2 + $0x28] sm:$0xff]  ;;  %v3299_v63 = vld [vmem:[#allocation2 + $0x40] sm:$0xff] }
 0x87c   :  { %v2451_v5 = vmul.f32 %v3218_v26, %v2440_v8  ;;  %v3294_v8 = vld [vmem:[#allocation2 + $0x38] sm:$0xff]  ;;  %v3295_v26 = vld [vmem:[#allocation2 + $0x20] sm:$0xff] }
 0x87d   :  { %v2450_v50 = vmul.f32 %v2444_v46, %v4454_v1  ;;  %v2449_v10 = vmul.f32 0.5, %v2448_v18  ;;  %v2551_v1 = vmul.f32 0.5, %v2541_v36  ;;  %v3296_v46 = vld [vmem:[#allocation2 + $0x30] sm:$0xff]  ;;  %v3306_v36 = vld [vmem:[#allocation2 + $0x98] sm:$0xff] }
 0x87e   :  { %v3300_v18 = vld [vmem:[#allocation2 + $0x50] sm:$0xff] }
 0x87f   :  { %v4572_v4 = vadd.f32 %v2451_v5, %v2450_v50  ;;  %v3297_v5 = vld [vmem:[#allocation2 + $0x48] sm:$0xff]  ;;  %v3298_v50 = vld [vmem:[#allocation2 + $0x58] sm:$0xff] }
 0x881   :  { %3221 = vtanh.f32 %v4572_v4 }
 0x882   :  { %3223 = vtanh.f32 %v2551_v1  ;;  %v3307_v1 = vld [vmem:[#allocation2 + $0x80] sm:$0xff] }
 0x883   :  { %3225 = vtanh.f32 %v4565_v29 }
 0x88b   :  { %v3222_v34 = vpop.eup %3221 }
 0x88c   :  { %v2454_v24 = vmul.f32 %v3222_v34, %v2449_v10  ;;  %v3301_v10 = vld [vmem:[#allocation2 + $0x68] sm:$0xff]  ;;  %v3302_v34 = vld [vmem:[#allocation2 + $0x78] sm:$0xff] }
 0x88e   :  { %v2455_v20 = vpack.c.bf16 %v2454_v24, %v2454_v24  ;;  %v3303_v24 = vld [vmem:[#allocation2 + $0x60] sm:$0xff] }
 0x890   :  { %2489 = vmatmul.mubr.bf16.vlgmr.msra.gmra.mrb[84].mxu0 %v2455_v20  ;;  %2530 = vmatmul.mubr.bf16.vlgmr.msra.gmra.mrb[84].mxu1 %v2455_v20  ;;  %v3304_v20 = vld [vmem:[#allocation2 + $0x70] sm:$0xff] }
 0x891   :  { %2562 = vmatpush1.bf16.msra.mxu0 %v3440_v22  ;;  %2603 = vmatpush1.bf16.msra.mxu1 %v3442_v23  ;;  %v3224_v22 = vpop.eup %3223 }
 0x892   :  { %2563 = vmatprep.subr.bf16.mxu0 %v3450_v28  ;;  %2604 = vmatprep.subr.bf16.mxu1 %v3456_v32  ;;  %v2553_v23 = vadd.f32 1.0, %v3224_v22  ;;  %v3226_v28 = vpop.eup %3225  ;;  %v3308_v22 = vld [vmem:[#allocation2 + $0x90] sm:$0xff] }
 0x893   :  { %2593 = vmatprep.mubr.bf16.mxu0 %v4924_v33  ;;  %2634 = vmatprep.mubr.bf16.mxu1 %v4924_v33 }
 0x895   :  { %2564 = vmatpush1.bf16.msra.mxu0 %v3452_v30  ;;  %2605 = vmatpush1.bf16.msra.mxu1 %v3454_v31  ;;  %v2554_v30 = vmul.f32 0.5, %v2553_v23  ;;  %v3309_v23 = vld [vmem:[#allocation2 + $0xa8] sm:$0xff] }
 0x896   :  { %2565 = vmatprep.subr.bf16.mxu0 %v3466_v37  ;;  %2606 = vmatprep.subr.bf16.mxu1 %v3472_v41  ;;  %v5339_v37 = vld [vmem:[#allocation16_spill] sm:$0xff]  ;;  %v5342_v41 = vld [vmem:[#allocation17_spill] sm:$0xff] }
 0x897   :  { %v2559_v31 = vmul.f32 %v3226_v28, %v2554_v30  ;;  %v3310_v28 = vld [vmem:[#allocation2 + $0xb8] sm:$0xff]  ;;  %v3311_v30 = vld [vmem:[#allocation2 + $0xa0] sm:$0xff] }
 0x899   :  { %2566 = vmatpush1.bf16.msra.mxu0 %v3468_v39  ;;  %2607 = vmatpush1.bf16.msra.mxu1 %v3470_v40  ;;  %v2560_v32 = vpack.c.bf16 %v2559_v31, %v2559_v31  ;;  %v5340_v39 = vld [vmem:[#allocation14_spill] sm:$0xff]  ;;  %v5341_v40 = vld [vmem:[#allocation15_spill] sm:$0xff]  ;;  %v3312_v31 = vld [vmem:[#allocation2 + $0xb0] sm:$0xff] }
 0x89a   :  { %2567 = vmatprep.subr.bf16.mxu0 %v3481_v45  ;;  %2608 = vmatprep.subr.bf16.mxu1 %v3487_v49  ;;  %v5343_v45 = vld [vmem:[#allocation18_spill] sm:$0xff]  ;;  %v5346_v49 = vld [vmem:[#allocation21_spill] sm:$0xff] }
 0x89d   :  { %2568 = vmatpush1.bf16.msra.mxu0 %v3483_v47  ;;  %2609 = vmatpush1.bf16.msra.mxu1 %v3485_v48  ;;  %v5344_v47 = vld [vmem:[#allocation19_spill] sm:$0xff]  ;;  %v5345_v48 = vld [vmem:[#allocation20_spill] sm:$0xff] }
 0x89e   :  { %2569 = vmatprep.subr.bf16.mxu0 %v3497_v54  ;;  %2610 = vmatprep.subr.bf16.mxu1 %v3503_v58  ;;  %v5347_v54 = vld [vmem:[#allocation22_spill] sm:$0xff]  ;;  %v5350_v58 = vld [vmem:[#allocation25_spill] sm:$0xff] }
 0x8a1   :  { %2570 = vmatpush1.bf16.msra.mxu0 %v3499_v56  ;;  %2611 = vmatpush1.bf16.msra.mxu1 %v3501_v57  ;;  %v5348_v56 = vld [vmem:[#allocation23_spill] sm:$0xff]  ;;  %v5349_v57 = vld [vmem:[#allocation24_spill] sm:$0xff] }
 0x8a2   :  { %2571 = vmatprep.subr.bf16.mxu0 %v3512_v62  ;;  %2612 = vmatprep.subr.bf16.mxu1 %v3518_v3  ;;  %v5351_v62 = vld [vmem:[#allocation26_spill] sm:$0xff]  ;;  %v5354_v3 = vld [vmem:[#allocation29_spill] sm:$0xff] }
 0x8a5   :  { %2572 = vmatpush1.bf16.msra.mxu0 %v3514_v0  ;;  %2613 = vmatpush1.bf16.msra.mxu1 %v3516_v2  ;;  %v5352_v0 = vld [vmem:[#allocation27_spill] sm:$0xff]  ;;  %v5353_v2 = vld [vmem:[#allocation28_spill] sm:$0xff] }
 0x8a6   :  { %2573 = vmatprep.subr.bf16.mxu0 %v3528_v9  ;;  %2614 = vmatprep.subr.bf16.mxu1 %v3534_v13  ;;  %v5355_v9 = vld [vmem:[#allocation30_spill] sm:$0xff]  ;;  %v5358_v13 = vld [vmem:[#allocation33_spill] sm:$0xff] }
 0x8a9   :  { %2574 = vmatpush1.bf16.msra.mxu0 %v3530_v11  ;;  %2615 = vmatpush1.bf16.msra.mxu1 %v3532_v12  ;;  %v5356_v11 = vld [vmem:[#allocation31_spill] sm:$0xff]  ;;  %v5357_v12 = vld [vmem:[#allocation32_spill] sm:$0xff] }
 0x8aa   :  { %2575 = vmatprep.subr.bf16.mxu0 %v3543_v17  ;;  %2616 = vmatprep.subr.bf16.mxu1 %v3549_v25  ;;  %v5359_v17 = vld [vmem:[#allocation34_spill] sm:$0xff]  ;;  %v5362_v25 = vld [vmem:[#allocation37_spill] sm:$0xff] }
 0x8ad   :  { %2576 = vmatpush1.bf16.msra.mxu0 %v3545_v19  ;;  %2617 = vmatpush1.bf16.msra.mxu1 %v3547_v21  ;;  %v5360_v19 = vld [vmem:[#allocation35_spill] sm:$0xff]  ;;  %v5361_v21 = vld [vmem:[#allocation36_spill] sm:$0xff] }
 0x8ae   :  { %2643 = vmatprep.subr.bf16.mxu0 %v5012_v15  ;;  %2684 = vmatprep.subr.bf16.mxu1 %v5339_v37 }
 0x8b0   :  { %2594 = vmatmul.mubr.bf16.vlgmr.msra.gmra.mrb[88].mxu0 %v2560_v32  ;;  %2635 = vmatmul.mubr.bf16.vlgmr.msra.gmra.mrb[88].mxu1 %v2560_v32 }
 0x8b1   :  { %2644 = vmatpush1.bf16.msra.mxu0 %v5340_v39  ;;  %2685 = vmatpush1.bf16.msra.mxu1 %v5341_v40 }
 0x8b2   :  { %2645 = vmatprep.subr.bf16.mxu0 %v5342_v41  ;;  %2686 = vmatprep.subr.bf16.mxu1 %v5343_v45 }
 0x8b3   :  { %2675 = vmatprep.mubr.bf16.mxu0 %v4924_v33  ;;  %2716 = vmatprep.mubr.bf16.mxu1 %v4924_v33 }
 0x8b5   :  { %2646 = vmatpush1.bf16.msra.mxu0 %v5344_v47  ;;  %2687 = vmatpush1.bf16.msra.mxu1 %v5345_v48 }
 0x8b6   :  { %2647 = vmatprep.subr.bf16.mxu0 %v5346_v49  ;;  %2688 = vmatprep.subr.bf16.mxu1 %v5347_v54 }
 0x8b9   :  { %2648 = vmatpush1.bf16.msra.mxu0 %v5348_v56  ;;  %2689 = vmatpush1.bf16.msra.mxu1 %v5349_v57 }
 0x8ba   :  { %2649 = vmatprep.subr.bf16.mxu0 %v5350_v58  ;;  %2690 = vmatprep.subr.bf16.mxu1 %v5351_v62 }
 0x8bd   :  { %2650 = vmatpush1.bf16.msra.mxu0 %v5352_v0  ;;  %2691 = vmatpush1.bf16.msra.mxu1 %v5353_v2 }
 0x8be   :  { %2651 = vmatprep.subr.bf16.mxu0 %v5354_v3  ;;  %2692 = vmatprep.subr.bf16.mxu1 %v5355_v9 }
 0x8c1   :  { %2652 = vmatpush1.bf16.msra.mxu0 %v5356_v11  ;;  %2693 = vmatpush1.bf16.msra.mxu1 %v5357_v12 }
 0x8c2   :  { %2653 = vmatprep.subr.bf16.mxu0 %v5358_v13  ;;  %2694 = vmatprep.subr.bf16.mxu1 %v5359_v17 }
 0x8c5   :  { %2654 = vmatpush1.bf16.msra.mxu0 %v5360_v19  ;;  %2695 = vmatpush1.bf16.msra.mxu1 %v5361_v21 }
 0x8c6   :  { %2655 = vmatprep.subr.bf16.mxu0 %v5362_v25  ;;  %2696 = vmatprep.subr.bf16.mxu1 %v5363_v38 }
 0x8c9   :  { %2656 = vmatpush1.bf16.msra.mxu0 %v5364_v53  ;;  %2697 = vmatpush1.bf16.msra.mxu1 %v5365_v42 }
 0x8ca   :  { %2657 = vmatprep.subr.bf16.mxu0 %v5366_v60  ;;  %2698 = vmatprep.subr.bf16.mxu1 %v5367_v6 }
 0x8cd   :  { %2658 = vmatpush1.bf16.msra.mxu0 %v5368_v52  ;;  %2699 = vmatpush1.bf16.msra.mxu1 %v5369_v43 }
 0x8ce   :  { %2752 = vmatprep.subr.bf16.mxu0 %v3289_v7  ;;  %2793 = vmatprep.subr.bf16.mxu1 %v3290_v55  ;;  %v3314_v7 = vld [vmem:[#allocation2 + $0xd8] sm:$0xff]  ;;  %v3315_v55 = vld [vmem:[#allocation2 + $0xc0] sm:$0xff] }
 0x8d0   :  { %2676 = vmatmul.mubr.bf16.vlgmr.msra.gmra.mrb[92].mxu0 %v2560_v32  ;;  %2717 = vmatmul.mubr.bf16.vlgmr.msra.gmra.mrb[92].mxu1 %v2560_v32  ;;  %v3313_v32 = vld [vmem:[#allocation2 + $0xc8] sm:$0xff] }
 0x8d1   :  { %2753 = vmatpush1.bf16.msra.mxu0 %v3291_v14  ;;  %2794 = vmatpush1.bf16.msra.mxu1 %v3292_v59  ;;  %v3316_v14 = vld [vmem:[#allocation2 + $0xd0] sm:$0xff]  ;;  %v3317_v59 = vld [vmem:[#allocation2 + $0xe8] sm:$0xff] }
 0x8d2   :  { %2754 = vmatprep.subr.bf16.mxu0 %v3293_v51  ;;  %2795 = vmatprep.subr.bf16.mxu1 %v3294_v8  ;;  %v3318_v51 = vld [vmem:[#allocation2 + $0xf8] sm:$0xff]  ;;  %v3319_v8 = vld [vmem:[#allocation2 + $0xe0] sm:$0xff] }
 0x8d3   :  { %2784 = vmatprep.mubr.bf16.mxu0 %v4924_v33  ;;  %2825 = vmatprep.mubr.bf16.mxu1 %v4924_v33 }
 0x8d5   :  { %2755 = vmatpush1.bf16.msra.mxu0 %v3295_v26  ;;  %2796 = vmatpush1.bf16.msra.mxu1 %v3296_v46  ;;  %v3320_v26 = vld [vmem:[#allocation2 + $0xf0] sm:$0xff] }
 0x8d6   :  { %2756 = vmatprep.subr.bf16.mxu0 %v3297_v5  ;;  %2797 = vmatprep.subr.bf16.mxu1 %v3298_v50 }
 0x8d9   :  { %2757 = vmatpush1.bf16.msra.mxu0 %v3299_v63  ;;  %2798 = vmatpush1.bf16.msra.mxu1 %v3300_v18 }
 0x8da   :  { %2758 = vmatprep.subr.bf16.mxu0 %v3301_v10  ;;  %2799 = vmatprep.subr.bf16.mxu1 %v3302_v34 }
 0x8dd   :  { %2759 = vmatpush1.bf16.msra.mxu0 %v3303_v24  ;;  %2800 = vmatpush1.bf16.msra.mxu1 %v3304_v20 }
 0x8de   :  { %2760 = vmatprep.subr.bf16.mxu0 %v3305_v44  ;;  %2801 = vmatprep.subr.bf16.mxu1 %v3306_v36  ;;  %v5370_v36 = vld [vmem:[#allocation64_spill] sm:$0xff] }
 0x8e1   :  { %2761 = vmatpush1.bf16.msra.mxu0 %v3307_v1  ;;  %2802 = vmatpush1.bf16.msra.mxu1 %v3308_v22 }
 0x8e2   :  { %2762 = vmatprep.subr.bf16.mxu0 %v3309_v23  ;;  %2803 = vmatprep.subr.bf16.mxu1 %v3310_v28  ;;  %v5371_v28 = vld [vmem:[#allocation66_spill] sm:$0xff] }
 0x8e5   :  { %2763 = vmatpush1.bf16.msra.mxu0 %v3311_v30  ;;  %2804 = vmatpush1.bf16.msra.mxu1 %v3312_v31 }
 0x8e6   :  { %2764 = vmatprep.subr.bf16.mxu0 %v3313_v32  ;;  %2805 = vmatprep.subr.bf16.mxu1 %v3314_v7 }
 0x8e9   :  { %2765 = vmatpush1.bf16.msra.mxu0 %v3315_v55  ;;  %2806 = vmatpush1.bf16.msra.mxu1 %v3316_v14  ;;  %v5372_v14 = vld [vmem:[#allocation67_spill] sm:$0xff] }
 0x8ea   :  { %2766 = vmatprep.subr.bf16.mxu0 %v3317_v59  ;;  %2807 = vmatprep.subr.bf16.mxu1 %v3318_v51  ;;  %v5373_v51 = vld [vmem:[#allocation68_spill] sm:$0xff] }
 0x8ed   :  { %2767 = vmatpush1.bf16.msra.mxu0 %v3319_v8  ;;  %2808 = vmatpush1.bf16.msra.mxu1 %v3320_v26 }
 0x8ee   :  { %2857 = vmatprep.subr.bf16.mxu0 %v5012_v15  ;;  %2898 = vmatprep.subr.bf16.mxu1 %v5339_v37 }
 0x963   :  { %v2490_v46 = vpop.f32.mrb[84].mxu0  ;;  %v2531_v5 = vpop.f32.mrb[84].mxu1 }
 0x964   :  { %v2492_v50 = vpop.f32.mrb[85].mxu0  ;;  %v2533_v63 = vpop.f32.mrb[85].mxu1 }
 0x965   :  { %v2494_v18 = vpop.f32.mrb[86].mxu0  ;;  %v2535_v10 = vpop.f32.mrb[86].mxu1 }
 0x966   :  { %v2495_v34 = vpop.f32.mrb[87].mxu0  ;;  %v2536_v24 = vpop.f32.mrb[87].mxu1 }
 0x983   :  { %v2595_v20 = vpop.f32.mrb[88].mxu0  ;;  %v2636_v44 = vpop.f32.mrb[88].mxu1 }
 0x984   :  { %v2834_v1 = vadd.f32 %v2595_v20, %v5370_v36  ;;  %v2597_v22 = vpop.f32.mrb[89].mxu0  ;;  %v2638_v23 = vpop.f32.mrb[89].mxu1  ;;  %v2836_v59 = vadd.f32 %v2636_v44, %v5372_v14 }
 0x985   :  { %v2835_v30 = vadd.f32 %v2597_v22, %v5371_v28  ;;  %v2599_v31 = vpop.f32.mrb[90].mxu0  ;;  %v2640_v15 = vpop.f32.mrb[90].mxu1  ;;  %v2837_v8 = vadd.f32 %v2638_v23, %v5373_v51 }
 0x986   :  { %v2838_v32 = vmul.f32 0.5, %v2834_v1  ;;  %v2600_v37 = vpop.f32.mrb[91].mxu0  ;;  %v2641_v7 = vpop.f32.mrb[91].mxu1 }
 0x987   :  { %v2842_v55 = vmul.f32 0.5, %v2835_v30  ;;  %v2847_v26 = vmul.f32 0.5, %v2837_v8 }
 0x988   :  { %3227 = vtanh.f32 %v2838_v32 }
 0x989   :  { %3229 = vtanh.f32 %v2842_v55 }
 0x98a   :  { %3231 = vtanh.f32 %v2836_v59 }
 0x98b   :  { %3233 = vtanh.f32 %v2847_v26 }
 0x992   :  { %v3228_v18 = vpop.eup %3227 }
 0x993   :  { %v3230_v10 = vpop.eup %3229  ;;  %v2840_v34 = vadd.f32 1.0, %v3228_v18 }
 0x994   :  { %v2844_v24 = vadd.f32 1.0, %v3230_v10  ;;  %v3232_v36 = vpop.eup %3231 }
 0x995   :  { %v2841_v20 = vmul.f32 0.5, %v2840_v34  ;;  %v3234_v31 = vpop.eup %3233 }
 0x996   :  { %v2845_v22 = vmul.f32 0.5, %v2844_v24  ;;  %v2849_v44 = vadd.f32 1.0, %v3234_v31 }
 0x997   :  { %v2852_v1 = vmul.f32 %v3232_v36, %v2841_v20 }
 0x998   :  { %v2851_v28 = vmul.f32 %v2845_v22, %v4565_v29  ;;  %v2850_v14 = vmul.f32 0.5, %v2849_v44 }
 0x99a   :  { %v2853_v30 = vadd.f32 %v2852_v1, %v2851_v28 }
 0x99c   :  { %3235 = vtanh.f32 %v2853_v30 }
 0x9a3   :  { %v2677_v15 = vpop.f32.mrb[92].mxu0  ;;  %v2718_v32 = vpop.f32.mrb[92].mxu1 }
 0x9a4   :  { %v2725_v37 = vadd.f32 %v2677_v15, %v2490_v46  ;;  %v2727_v23 = vadd.f32 %v2718_v32, %v2531_v5  ;;  %v2679_v7 = vpop.f32.mrb[93].mxu0  ;;  %v2720_v55 = vpop.f32.mrb[93].mxu1 }
 0x9a5   :  { %v2726_v59 = vadd.f32 %v2679_v7, %v2492_v50  ;;  %v2728_v51 = vadd.f32 %v2720_v55, %v2533_v63  ;;  %v2681_v8 = vpop.f32.mrb[94].mxu0  ;;  %v2722_v26 = vpop.f32.mrb[94].mxu1 }
 0x9a6   :  { %v3236_v18 = vpop.eup %3235  ;;  %v2729_v10 = vadd.f32 %v2725_v37, %v5062_v16  ;;  %v2682_v34 = vpop.f32.mrb[95].mxu0  ;;  %v2731_v46 = vadd.f32 %v2727_v23, %v5064_v27 }
 0x9a7   :  { %v2723_v29 = vpop.f32.mrb[95].mxu1  ;;  %v2855_v24 = vmul.f32 %v3236_v18, %v2850_v14  ;;  %v2730_v20 = vadd.f32 %v2726_v59, %v5063_v61  ;;  %v2732_v5 = vadd.f32 %v2728_v51, %v5065_v35 }
 0x9a8   :  { %v2733_v36 = vmul.f32 0.5, %v2729_v10 }
 0x9a9   :  { %v2737_v22 = vmul.f32 0.5, %v2730_v20  ;;  %v2742_v50 = vmul.f32 0.5, %v2732_v5 }
 0x9aa   :  { %3237 = vtanh.f32 %v2733_v36 }
 0x9ab   :  { %3239 = vtanh.f32 %v2737_v22 }
 0x9ac   :  { %3241 = vtanh.f32 %v2731_v46  ;;  %v3077_v46 = vld [vmem:[#allocation4] ss:$0 sm:$0xff] }
 0x9ad   :  { %3243 = vtanh.f32 %v2742_v50 }
 0x9b4   :  { %v3238_v63 = vpop.eup %3237 }
 0x9b5   :  { %v3240_v1 = vpop.eup %3239  ;;  %v2735_v28 = vadd.f32 1.0, %v3238_v63 }
 0x9b6   :  { %v2739_v30 = vadd.f32 1.0, %v3240_v1  ;;  %v3242_v44 = vpop.eup %3241 }
 0x9b7   :  { %v2736_v31 = vmul.f32 0.5, %v2735_v28  ;;  %v3244_v23 = vpop.eup %3243 }
 0x9b8   :  { %v2740_v15 = vmul.f32 0.5, %v2739_v30  ;;  %v2744_v55 = vadd.f32 1.0, %v3244_v23 }
 0x9b9   :  { %v2747_v32 = vmul.f32 %v3242_v44, %v2736_v31 }
 0x9ba   :  { %v2746_v37 = vmul.f32 %v2740_v15, %v4572_v4  ;;  %v2745_v14 = vmul.f32 0.5, %v2744_v55 }
 0x9bc   :  { %v4657_v7 = vadd.f32 %v2747_v32, %v2746_v37 }
 0x9be   :  { %3245 = vtanh.f32 %v4657_v7 }
 0x9c8   :  { %v3246_v59 = vpop.eup %3245 }
 0x9c9   :  { %v2750_v51 = vmul.f32 %v3246_v59, %v2745_v14 }
 0x9cb   :  { %v2751_v8 = vpack.c.bf16 %v2750_v51, %v2750_v51 }
 0x9cd   :  { %2785 = vmatmul.mubr.bf16.vlgmr.msra.gmra.mrb[96].mxu0 %v2751_v8  ;;  %2826 = vmatmul.mubr.bf16.vlgmr.msra.gmra.mrb[96].mxu1 %v2751_v8 }
 0x9ce   :  { %2858 = vmatpush1.bf16.msra.mxu0 %v5340_v39  ;;  %2899 = vmatpush1.bf16.msra.mxu1 %v5341_v40 }
 0x9cf   :  { %2859 = vmatprep.subr.bf16.mxu0 %v5342_v41  ;;  %2900 = vmatprep.subr.bf16.mxu1 %v5343_v45 }
 0x9d0   :  { %2889 = vmatprep.mubr.bf16.mxu0 %v4924_v33  ;;  %2930 = vmatprep.mubr.bf16.mxu1 %v4924_v33  ;;  %v2856_v33 = vpack.c.bf16 %v2855_v24, %v2855_v24 }
 0x9d2   :  { %2860 = vmatpush1.bf16.msra.mxu0 %v5344_v47  ;;  %2901 = vmatpush1.bf16.msra.mxu1 %v5345_v48 }
 0x9d3   :  { %2861 = vmatprep.subr.bf16.mxu0 %v5346_v49  ;;  %2902 = vmatprep.subr.bf16.mxu1 %v5347_v54 }
 0x9d6   :  { %2862 = vmatpush1.bf16.msra.mxu0 %v5348_v56  ;;  %2903 = vmatpush1.bf16.msra.mxu1 %v5349_v57 }
 0x9d7   :  { %2863 = vmatprep.subr.bf16.mxu0 %v5350_v58  ;;  %2904 = vmatprep.subr.bf16.mxu1 %v5351_v62 }
 0x9da   :  { %2864 = vmatpush1.bf16.msra.mxu0 %v5352_v0  ;;  %2905 = vmatpush1.bf16.msra.mxu1 %v5353_v2 }
 0x9db   :  { %2865 = vmatprep.subr.bf16.mxu0 %v5354_v3  ;;  %2906 = vmatprep.subr.bf16.mxu1 %v5355_v9 }
 0x9de   :  { %2866 = vmatpush1.bf16.msra.mxu0 %v5356_v11  ;;  %2907 = vmatpush1.bf16.msra.mxu1 %v5357_v12 }
 0x9df   :  { %2867 = vmatprep.subr.bf16.mxu0 %v5358_v13  ;;  %2908 = vmatprep.subr.bf16.mxu1 %v5359_v17 }
 0x9e2   :  { %2868 = vmatpush1.bf16.msra.mxu0 %v5360_v19  ;;  %2909 = vmatpush1.bf16.msra.mxu1 %v5361_v21 }
 0x9e3   :  { %2869 = vmatprep.subr.bf16.mxu0 %v5362_v25  ;;  %2910 = vmatprep.subr.bf16.mxu1 %v5363_v38 }
 0x9e6   :  { %2870 = vmatpush1.bf16.msra.mxu0 %v5364_v53  ;;  %2911 = vmatpush1.bf16.msra.mxu1 %v5365_v42 }
 0x9e7   :  { %2871 = vmatprep.subr.bf16.mxu0 %v5366_v60  ;;  %2912 = vmatprep.subr.bf16.mxu1 %v5367_v6 }
 0x9ea   :  { %2872 = vmatpush1.bf16.msra.mxu0 %v5368_v52  ;;  %2913 = vmatpush1.bf16.msra.mxu1 %v5369_v43 }
 0x9ed   :  { %2890 = vmatmul.mubr.bf16.vlgmr.msra.gmra.mrb[100].mxu0 %v2856_v33  ;;  %2931 = vmatmul.mubr.bf16.vlgmr.msra.gmra.mrb[100].mxu1 %v2856_v33 }
 0xaa0   :  { %v2786_v4 = vpop.f32.mrb[96].mxu0  ;;  %v2827_v39 = vpop.f32.mrb[96].mxu1 }
 0xaa1   :  { %v2788_v40 = vpop.f32.mrb[97].mxu0  ;;  %v2829_v41 = vpop.f32.mrb[97].mxu1 }
 0xaa2   :  { %v2790_v45 = vpop.f32.mrb[98].mxu0  ;;  %v2831_v47 = vpop.f32.mrb[98].mxu1 }
 0xaa3   :  { %v2791_v48 = vpop.f32.mrb[99].mxu0  ;;  %v2832_v49 = vpop.f32.mrb[99].mxu1 }
 0xac0   :  { %v2891_v54 = vpop.f32.mrb[100].mxu0  ;;  %v2932_v56 = vpop.f32.mrb[100].mxu1 }
 0xac1   :  { %v2939_v57 = vadd.f32 %v2891_v54, %v2786_v4  ;;  %v2941_v58 = vadd.f32 %v2932_v56, %v2827_v39  ;;  %v2893_v62 = vpop.f32.mrb[101].mxu0  ;;  %v2934_v0 = vpop.f32.mrb[101].mxu1 }
 0xac2   :  { %v2940_v2 = vadd.f32 %v2893_v62, %v2788_v40  ;;  %v2942_v3 = vadd.f32 %v2934_v0, %v2829_v41  ;;  %v2895_v9 = vpop.f32.mrb[102].mxu0  ;;  %v2936_v11 = vpop.f32.mrb[102].mxu1 }
 0xac3   :  { %v2943_v12 = vadd.f32 %v2939_v57, %v5062_v16  ;;  %v2896_v13 = vpop.f32.mrb[103].mxu0  ;;  %v2937_v17 = vpop.f32.mrb[103].mxu1  ;;  %v2945_v38 = vadd.f32 %v2941_v58, %v5064_v27 }
 0xac4   :  { %v2944_v19 = vadd.f32 %v2940_v2, %v5063_v61  ;;  %v2946_v53 = vadd.f32 %v2942_v3, %v5065_v35  ;;  %v3076_v35 = vld [vmem:[%s4708_s5] ss:$0 sm:$0xff] }
 0xac5   :  { %v2947_v21 = vmul.f32 0.5, %v2943_v12 }
 0xac6   :  { %v2951_v25 = vmul.f32 0.5, %v2944_v19  ;;  %v2956_v42 = vmul.f32 0.5, %v2946_v53 }
 0xac7   :  { %3247 = vtanh.f32 %v2947_v21 }
 0xac8   :  { %3249 = vtanh.f32 %v2951_v25 }
 0xac9   :  { %3251 = vtanh.f32 %v2945_v38 }
 0xaca   :  { %3253 = vtanh.f32 %v2956_v42 }
 0xad1   :  { %v3248_v60 = vpop.eup %3247 }
 0xad2   :  { %v3250_v6 = vpop.eup %3249  ;;  %v2949_v52 = vadd.f32 1.0, %v3248_v60 }
 0xad3   :  { %v2953_v43 = vadd.f32 1.0, %v3250_v6  ;;  %v3252_v26 = vpop.eup %3251 }
 0xad4   :  { %v2950_v16 = vmul.f32 0.5, %v2949_v52  ;;  %v3254_v29 = vpop.eup %3253 }
 0xad5   :  { %v2954_v18 = vmul.f32 0.5, %v2953_v43  ;;  %v2958_v27 = vadd.f32 1.0, %v3254_v29 }
 0xad6   :  { %v2961_v10 = vmul.f32 %v3252_v26, %v2950_v16 }
 0xad7   :  { %v2960_v61 = vmul.f32 %v2954_v18, %v4657_v7  ;;  %v2959_v24 = vmul.f32 0.5, %v2958_v27 }
 0xad9   :  { %v2962_v34 = vadd.f32 %v2961_v10, %v2960_v61 }
 0xadb   :  { %3255 = vtanh.f32 %v2962_v34 }
 0xae5   :  { %v3256_v20 = vpop.eup %3255 }
 0xae6   :  { %v2964_v36 = vmul.f32 %v3256_v20, %v2959_v24 }
 0xae8   :  { %v2972_v22 = vmul.f32 %v3076_v35, %v2964_v36 }
 0xaea   :  { %2973 = vadd.xlane.f32.xlu0 %v2972_v22 }
 0xb77   :  { %v2974_v5 = vpop.xlane.xlu0 %2973 }
 0xb78   :  { %v2982_v50 = vadd.f32 %v3077_v46, %v2974_v5 }
 0xb7a   :  { %2984 = vst.msk [vmem:[%s4711_s8] sm:$0x3] %vm2983_vm2, %v2982_v50 }
 0xb7b   :  { %2989 = vsyncpa [#allocation6], 1 }
 0xb7c   :  { %2990 = vsyncmov [#allocation3] }
 0xb7f   :  { %s2991_s23 = vpop.sfrf %2990 }
 0xb80   :  { %p3078_p8 = scmp.ne.s32.totalorder %s2991_s23, 0 }
 0xb82   :  { %2995 = shalt.err (%p3078_p8)  }

</bundles_post_ra>
